<compile_context>
chip_gen: v5e
topology: v5e:2x2
jax: 0.10.0
libtpu: 0.0.40
codegen_flags: <defaults>
</compile_context>

<pallas_src>
import functools
import math

import numpy as np
import jax
import jax.numpy as jnp
from jax import lax
from jax.experimental import pallas as pl
from jax.experimental.pallas import tpu as pltpu


# --------------------------------------------------------------------------
# Host-side exact 0-dim superlevel persistence (= LevelSetLayer2D forward).
# --------------------------------------------------------------------------
def _superlevel_h0_bar_lengths(img2d: np.ndarray) -> np.ndarray:
    """Finite H0 bar lengths of the superlevel filtration, sorted descending,
    zero-padded to H*W.  Freudenthal connectivity (4-neighbours plus the
    (i,j)-(i+1,j+1) diagonal), matching topologylayer's init_freudenthal_2d.
    The essential (infinite) bar gets length 0, as in TopKBarcodeLengths."""
    H, W = img2d.shape
    N = H * W
    f = img2d.reshape(-1).astype(np.float64)
    order = np.argsort(-f, kind="stable")          # descending value order
    parent = np.arange(N)
    birth = np.full(N, -np.inf)
    added = np.zeros(N, dtype=bool)

    def find(i):
        while parent[i] != i:
            parent[i] = parent[parent[i]]
            i = parent[i]
        return i

    lengths = []
    for v in order:
        v = int(v)
        i, j = divmod(v, W)
        added[v] = True
        birth[v] = f[v]
        nbrs = []
        if j + 1 < W:              nbrs.append(v + 1)
        if j - 1 >= 0:             nbrs.append(v - 1)
        if i + 1 < H:              nbrs.append(v + W)
        if i - 1 >= 0:             nbrs.append(v - W)
        if i + 1 < H and j + 1 < W: nbrs.append(v + W + 1)   # Freudenthal diag
        if i - 1 >= 0 and j - 1 >= 0: nbrs.append(v - W - 1)
        for n in nbrs:
            if not added[n]:
                continue
            rv, rn = find(v), find(n)
            if rv == rn:
                continue
            # elder rule: component with lower birth dies at f[v]
            if birth[rv] <= birth[rn]:
                dying, surv = rv, rn
            else:
                dying, surv = rn, rv
            lengths.append(birth[dying] - f[v])
            parent[dying] = surv

    out = np.zeros(N, dtype=np.float32)
    if lengths:
        ls = np.sort(np.asarray(lengths, dtype=np.float32))[::-1]
        out[: ls.size] = ls
    return out


# --------------------------------------------------------------------------
# Pallas kernel: B = Dt*P original slices per grid step.
# --------------------------------------------------------------------------
def _topo_slice_loss_kernel(mask_ref, bars_ref, key_ref, comb_ref, ssel_ref,
                            loss_ref, *, stride, big, chunk):
    # mask_ref : (1, Dt*H, P*W) f32  -- P GT slices packed along the 128-lane
    #                                   axis, Dt packed rows stacked on rows.
    # bars_ref : (1, B, Nb)     f32  -- bar lengths, sorted desc, 0-pad, trimmed.
    # key_ref  : (Dt*H, P*W)    i32  -- "gapped" cell key: genuine in-slice
    #                                   4-neighbours differ by exactly 1 (lane
    #                                   axis) or `stride` (row axis); wraps and
    #                                   packed-slice/row crossings never do.
    # comb_ref : (B, Dt*H)      bf16 -- comb[b, r] = [row r belongs to slice b]
    # ssel_ref : (B, P*W)       f32  -- ssel[b, j] = [lane j belongs to slice b]
    # loss_ref : (1, B, 1)      f32  -- per-slice losses (one slab per step).
    DtH, PW = mask_ref.shape[1], mask_ref.shape[2]
    B, Nb = bars_ref.shape[1], bars_ref.shape[2]

    m = mask_ref[0]                              # raw float mask
    fg = m > 0.0
    key = key_ref[...]
    BIG = jnp.int32(big)

    # Neighbour-validity planes, built once.  The geometric test (absolute key
    # delta) is roll-direction agnostic and rejects lane/row wraps as well as
    # packed-slice / packed-row crossings; folding both the cell's and the
    # neighbour's foreground bit in means the hot loop below never touches
    # `fg` again and needs no trailing background reset.
    shifts = ((0, 1), (0, DtH - 1), (1, 1), (1, PW - 1))
    deltas = (stride, stride, 1, 1)
    valid = []
    for (ax, sh), d in zip(shifts, deltas):
        geom = jnp.abs(pltpu.roll(key, sh, ax) - key) == d
        nbr_fg = pltpu.roll(m, sh, ax) > 0.0
        valid.append(geom & fg & nbr_fg)

    lab0 = jnp.where(fg, key, BIG)

    def prop_step(lab):                          # one 4-neighbour min step
        mn = lab
        for (ax, sh), ok in zip(shifts, valid):
            mn = jnp.minimum(mn, jnp.where(ok, pltpu.roll(lab, sh, ax), BIG))
        return mn

    # Convergence-bounded min-label propagation: `chunk` unrolled steps per
    # check (lets rolls / mins co-issue).  Labels only decrease, so a chunk
    # made progress iff min(new - lab) < 0 -- one subtract + one min-reduce,
    # amortised over `chunk` steps.
    def cond(state):
        return state[1] < 0

    def body(state):
        lab, _ = state
        new = lab
        for _ in range(chunk):
            new = prop_step(new)
        return new, jnp.min(new - lab)

    lab, _ = lax.while_loop(cond, body, (lab0, jnp.int32(-1)))

    # Component roots = foreground cells holding their own (minimal) key.
    root = jnp.where(fg & (lab == key), 1.0, 0.0).astype(jnp.bfloat16)

    # Per-slice component count k_gt as a (B, 1) column:
    #   comb @ root sums the H rows of each slice's packed row (one bf16 MXU
    #   op, exact for 0/1 operands with f32 accumulate),
    #   * ssel + lane reduce keeps only that slice's W lanes.
    rows = jnp.dot(comb_ref[...], root, preferred_element_type=jnp.float32)
    k_f = jnp.sum(rows * ssel_ref[...], axis=1, keepdims=True)  # exact ints
    k_i = k_f.astype(jnp.int32)                               # (B, 1)

    # Top-k / signs / L1 reduction over the (already sorted) bar lengths.
    bars = bars_ref[0]                                        # (B, Nb)
    idx = lax.broadcasted_iota(jnp.int32, (B, Nb), 1)
    nz = bars > 0.0                                           # i < non_zero_bars
    signs = jnp.where(nz & (idx < k_i), 1.0, 0.0)
    per = jnp.where(nz, jnp.abs(bars - signs), 0.0)
    loss = jnp.sum(per, axis=1, keepdims=True)                # (B, 1)
    loss_ref[0] = jnp.where(k_i > 0, loss, 0.0)               # empty GT -> 0


# --------------------------------------------------------------------------
# Wrapper: packing, per-generation sizing, pallas_call.
# --------------------------------------------------------------------------
def _vmem_capacity_bytes() -> int:
    try:
        v = getattr(pltpu.get_tpu_info(), "vmem_capacity_bytes", None)
        if v:
            return int(v)
    except Exception:
        pass
    return 64 << 20        # conservative fallback (v7x per-TensorCore VMEM)


def _working_set_bytes(dt: int, H: int, PW: int, P: int, Nb: int) -> int:
    """Generous estimate of the per-step VMEM footprint for Dt packed rows."""
    dth, b = dt * H, dt * P
    io = 2 * 4 * (dth * PW          # packed mask block (double-buffered)
                  + b * Nb          # bars block
                  + dth * PW        # key plane (constant)
                  + b * PW)         # ssel
    io += 2 * 2 * b * dth           # comb (bf16)
    io += 2 * 4 * b                 # per-slice loss output
    # in-kernel temps: fg, 4 validity planes, lab/new/rolled, bars-side temps
    tmp = 4 * (8 * dth * PW + 3 * b * Nb)
    return io + tmp + (256 << 10)


def topo3d_loss(patch3d: jnp.ndarray, mask3d: jnp.ndarray, *,
                chunk: int = 16) -> jnp.ndarray:
    """Forward pass of Topo3DLoss (sum of per-slice topological losses)."""
    assert patch3d.shape == mask3d.shape and patch3d.ndim == 3
    D, H, W = map(int, patch3d.shape)
    N = H * W

    # ---- host: exact persistence barcodes per slice (see TODO above) ------
    patch_np = np.asarray(jax.device_get(patch3d), dtype=np.float32)
    bars_full = np.zeros((D, N), dtype=np.float32)
    for d in range(D):
        bars_full[d] = _superlevel_h0_bar_lengths(patch_np[d])
    # Bars past the largest per-slice non-zero count contribute exactly 0, so
    # the slab shipped to the TPU is trimmed to a lane-aligned prefix.
    max_nnz = int((bars_full > 0.0).sum(axis=1).max()) if D else 0
    Nb = min(N, max(128, ((max_nnz + 127) // 128) * 128))

    # ---- lane packing / per-step batching parameters ----------------------
    P = 128 // W if (W <= 128 and 128 % W == 0) else 1   # slices per vreg row
    PW = P * W
    q = 8 // math.gcd(P, 8)                    # keep B = Dt*P a multiple of 8
    Dt_want = min(max(1, 128 // P), (D + P - 1) // P)    # <=128 slices / step
    Dt_want = ((Dt_want + q - 1) // q) * q

    # Per-generation VMEM sizing: target ~1/4 of physical VMEM as working set
    # (v5e/v6e 128 MiB -> 32 MiB, v7x 64 MiB -> 16 MiB) and raise the scoped
    # limit to cover whatever block is finally chosen (budget-aware floor, so
    # even the minimum q-row block compiles for large H*W).
    vmem_phys = _vmem_capacity_bytes()
    ws_budget = max(12 << 20, min(vmem_phys // 4, 32 << 20))
    Dt = q
    for dt in range(q, Dt_want + 1, q):
        if _working_set_bytes(dt, H, PW, P, Nb) > ws_budget:
            break
        Dt = dt
    # Keep at least two grid steps whenever D allows it, so the "parallel"
    # grid axis shards across both TensorCores on v7x (harmless elsewhere).
    if D > q * P:
        Dt = min(Dt, max(q, (((D - 1) // P) // q) * q))

    B = Dt * P                                  # original slices per grid step
    G = (D + B - 1) // B                        # grid size ("parallel" over D)
    D_pad, DtH = G * B, Dt * H
    need = _working_set_bytes(Dt, H, PW, P, Nb)
    vmem_limit = int(min(vmem_phys, max(need + (8 << 20), 32 << 20)))

    # ---- bars (trimmed + padded) -------------------------------------------
    bars = jnp.asarray(
        np.pad(bars_full[:, :Nb], ((0, D_pad - D), (0, 0)))).reshape(G, B, Nb)

    # ---- pack the GT mask (keep float dtype; the >0 test stays in-kernel) --
    mask_p = jnp.pad(mask3d.astype(jnp.float32),
                     ((0, D_pad - D), (0, 0), (0, 0)))
    mask_packed = (mask_p.reshape(G, Dt, P, H, W)
                   .transpose(0, 1, 3, 2, 4)              # (G, Dt, H, P, W)
                   .reshape(G, DtH, PW))                  # slice b = t*P + s
                                                          # -> lanes [sW,(s+1)W)
                                                          #    of packed row t

    # ---- host-precomputed constant index planes (no vector int-div on TPU) -
    stride = PW + P
    rr = np.arange(DtH, dtype=np.int64)
    cc = np.arange(PW, dtype=np.int64)
    bb = np.arange(B, dtype=np.int64)
    key_np = ((rr + rr // H)[:, None] * stride
              + (cc + cc // W)[None, :]).astype(np.int32)
    comb_np = (rr[None, :] // H == bb[:, None] // P).astype(np.float32)
    ssel_np = (cc[None, :] // W == (bb % P)[:, None]).astype(np.float32)
    big = int((DtH + Dt) * stride)

    kernel = functools.partial(_topo_slice_loss_kernel,
                               stride=stride, big=big, chunk=chunk)

    losses = pl.pallas_call(
        kernel,
        out_shape=jax.ShapeDtypeStruct((G, B, 1), jnp.float32),
        grid_spec=pltpu.PrefetchScalarGridSpec(
            num_scalar_prefetch=0,
            grid=(G,),
            in_specs=[
                pl.BlockSpec((1, DtH, PW), lambda g: (g, 0, 0)),  # packed mask
                pl.BlockSpec((1, B, Nb), lambda g: (g, 0, 0)),    # bars
                pl.BlockSpec((DtH, PW), lambda g: (0, 0)),        # key  (const)
                pl.BlockSpec((B, DtH), lambda g: (0, 0)),         # comb (const)
                pl.BlockSpec((B, PW), lambda g: (0, 0)),          # ssel (const)
            ],
            out_specs=pl.BlockSpec((1, B, 1), lambda g: (g, 0, 0)),
        ),
        compiler_params=pltpu.CompilerParams(
            dimension_semantics=("parallel",),      # megacore shards D on v7x
            vmem_limit_bytes=vmem_limit),
    )(mask_packed, bars,
      jnp.asarray(key_np),
      jnp.asarray(comb_np).astype(jnp.bfloat16),
      jnp.asarray(ssel_np))

    return jnp.sum(losses)        # padded slices contribute exactly 0


# --------------------------------------------------------------------------
# Pure-host reference for a numerical self-check.
# --------------------------------------------------------------------------
def _cc_count_4(fg: np.ndarray) -> int:
    H, W = fg.shape
    parent = {}

    def find(a):
        while parent[a] != a:
            parent[a] = parent[parent[a]]
            a = parent[a]
        return a

    for i in range(H):
        for j in range(W):
            if fg[i, j]:
                parent[(i, j)] = (i, j)
    for i in range(H):
        for j in range(W):
            if not fg[i, j]:
                continue
            if i + 1 < H and fg[i + 1, j]:
                ra, rb = find((i, j)), find((i + 1, j))
                if ra != rb:
                    parent[ra] = rb
            if j + 1 < W and fg[i, j + 1]:
                ra, rb = find((i, j)), find((i, j + 1))
                if ra != rb:
                    parent[ra] = rb
    return len({find(p) for p in parent})


def _reference_loss(patch_np: np.ndarray, mask_np: np.ndarray) -> float:
    D, H, W = patch_np.shape
    total = 0.0
    for d in range(D):
        gt = mask_np[d] > 0
        if not gt.any():
            continue
        k_gt = _cc_count_4(gt)
        bars = _superlevel_h0_bar_lengths(patch_np[d].astype(np.float32))
        nnz = int((bars > 0).sum())
        b = bars[:nnz].astype(np.float64)
        signs = np.zeros(nnz)
        signs[:min(k_gt, nnz)] = 1.0
        total += float(np.abs(b - signs).sum())
    return total


if __name__ == "__main__":
    D, H, W = 24, 16, 16
    rng = jax.random.PRNGKey(0)
    kp, km = jax.random.split(rng)
    patch3d = jax.random.normal(kp, (D, H, W), dtype=jnp.float32)
    mask3d = (jax.random.uniform(km, (D, H, W)) > 0.7).astype(jnp.float32)
    mask3d = mask3d.at[0].set(0.0)   # all-background GT slice (loss-0 branch)
    mask3d = mask3d.at[1].set(1.0)   # single big component (long propagation)

    loss = topo3d_loss(patch3d, mask3d)
    jax.block_until_ready(loss)

    ref = _reference_loss(np.asarray(patch3d), np.asarray(mask3d))
    assert np.allclose(float(loss), ref, rtol=1e-4, atol=1e-3), (float(loss), ref)
    print("KERNEL_OK")
</pallas_src>

<mosaic_0001>
module attributes {stable_mosaic.version = 11 : i64} {
  func.func @_topo_slice_loss_kernel(%arg0: i32, %arg1: memref<1x32x128xf32, #tpu.memory_space<vmem>>, %arg2: memref<1x16x128xf32, #tpu.memory_space<vmem>>, %arg3: memref<32x128xi32, #tpu.memory_space<vmem>>, %arg4: memref<16x32xbf16, #tpu.memory_space<vmem>>, %arg5: memref<16x128xf32, #tpu.memory_space<vmem>>, %arg6: memref<1x16x1xf32, #tpu.memory_space<vmem>>) attributes {dimension_semantics = [#tpu.dimension_semantics<parallel>], iteration_bounds = array<i64: 2>, scalar_prefetch = 0 : i64, scratch_operands = 0 : i64, tpu.core_type = #tpu.core_type<tc>, window_params = [{transform_indices = @transform_0, window_bounds = array<i64: 1, 32, 128>}, {transform_indices = @transform_1, window_bounds = array<i64: 1, 16, 128>}, {pipeline_mode = #tpu.pipeline_mode<synchronous>, transform_indices = @transform_2, window_bounds = array<i64: 32, 128>}, {pipeline_mode = #tpu.pipeline_mode<synchronous>, transform_indices = @transform_3, window_bounds = array<i64: 16, 32>}, {pipeline_mode = #tpu.pipeline_mode<synchronous>, transform_indices = @transform_4, window_bounds = array<i64: 16, 128>}, {transform_indices = @transform_5, window_bounds = array<i64: 1, 16, 1>}]} {
    %c0 = arith.constant 0 : index
    %c0_0 = arith.constant 0 : index
    %c0_1 = arith.constant 0 : index
    %0 = vector.load %arg1[%c0, %c0_0, %c0_1] : memref<1x32x128xf32, #tpu.memory_space<vmem>>, vector<1x32x128xf32>
    %1 = vector.shape_cast %0 : vector<1x32x128xf32> to vector<32x128xf32>
    %cst = arith.constant 0.000000e+00 : f32
    %2 = vector.broadcast %cst : f32 to vector<32x128xf32>
    %3 = arith.cmpf ogt, %1, %2 : vector<32x128xf32>
    %c0_2 = arith.constant 0 : index
    %c0_3 = arith.constant 0 : index
    %4 = vector.load %arg3[%c0_2, %c0_3] : memref<32x128xi32, #tpu.memory_space<vmem>>, vector<32x128xi32>
    %c1_i32 = arith.constant 1 : i32
    %5 = tpu.dynamic_rotate %4 by %c1_i32 dim 0 : vector<32x128xi32>, i32 -> vector<32x128xi32>
    %6 = arith.subi %5, %4 : vector<32x128xi32>
    %7 = math.absi %6 : vector<32x128xi32>
    %c136_i32 = arith.constant 136 : i32
    %8 = vector.broadcast %c136_i32 : i32 to vector<32x128xi32>
    %9 = arith.cmpi eq, %7, %8 : vector<32x128xi32>
    %c1_i32_4 = arith.constant 1 : i32
    %10 = tpu.dynamic_rotate %1 by %c1_i32_4 dim 0 : vector<32x128xf32>, i32 -> vector<32x128xf32>
    %cst_5 = arith.constant 0.000000e+00 : f32
    %11 = vector.broadcast %cst_5 : f32 to vector<32x128xf32>
    %12 = arith.cmpf ogt, %10, %11 : vector<32x128xf32>
    %13 = arith.andi %9, %3 : vector<32x128xi1>
    %14 = arith.andi %13, %12 : vector<32x128xi1>
    %c31_i32 = arith.constant 31 : i32
    %15 = tpu.dynamic_rotate %4 by %c31_i32 dim 0 : vector<32x128xi32>, i32 -> vector<32x128xi32>
    %16 = arith.subi %15, %4 : vector<32x128xi32>
    %17 = math.absi %16 : vector<32x128xi32>
    %c136_i32_6 = arith.constant 136 : i32
    %18 = vector.broadcast %c136_i32_6 : i32 to vector<32x128xi32>
    %19 = arith.cmpi eq, %17, %18 : vector<32x128xi32>
    %c31_i32_7 = arith.constant 31 : i32
    %20 = tpu.dynamic_rotate %1 by %c31_i32_7 dim 0 : vector<32x128xf32>, i32 -> vector<32x128xf32>
    %cst_8 = arith.constant 0.000000e+00 : f32
    %21 = vector.broadcast %cst_8 : f32 to vector<32x128xf32>
    %22 = arith.cmpf ogt, %20, %21 : vector<32x128xf32>
    %23 = arith.andi %19, %3 : vector<32x128xi1>
    %24 = arith.andi %23, %22 : vector<32x128xi1>
    %c1_i32_9 = arith.constant 1 : i32
    %25 = tpu.dynamic_rotate %4 by %c1_i32_9 dim 1 : vector<32x128xi32>, i32 -> vector<32x128xi32>
    %26 = arith.subi %25, %4 : vector<32x128xi32>
    %27 = math.absi %26 : vector<32x128xi32>
    %c1_i32_10 = arith.constant 1 : i32
    %28 = vector.broadcast %c1_i32_10 : i32 to vector<32x128xi32>
    %29 = arith.cmpi eq, %27, %28 : vector<32x128xi32>
    %c1_i32_11 = arith.constant 1 : i32
    %30 = tpu.dynamic_rotate %1 by %c1_i32_11 dim 1 : vector<32x128xf32>, i32 -> vector<32x128xf32>
    %cst_12 = arith.constant 0.000000e+00 : f32
    %31 = vector.broadcast %cst_12 : f32 to vector<32x128xf32>
    %32 = arith.cmpf ogt, %30, %31 : vector<32x128xf32>
    %33 = arith.andi %29, %3 : vector<32x128xi1>
    %34 = arith.andi %33, %32 : vector<32x128xi1>
    %c127_i32 = arith.constant 127 : i32
    %35 = tpu.dynamic_rotate %4 by %c127_i32 dim 1 : vector<32x128xi32>, i32 -> vector<32x128xi32>
    %36 = arith.subi %35, %4 : vector<32x128xi32>
    %37 = math.absi %36 : vector<32x128xi32>
    %c1_i32_13 = arith.constant 1 : i32
    %38 = vector.broadcast %c1_i32_13 : i32 to vector<32x128xi32>
    %39 = arith.cmpi eq, %37, %38 : vector<32x128xi32>
    %c127_i32_14 = arith.constant 127 : i32
    %40 = tpu.dynamic_rotate %1 by %c127_i32_14 dim 1 : vector<32x128xf32>, i32 -> vector<32x128xf32>
    %cst_15 = arith.constant 0.000000e+00 : f32
    %41 = vector.broadcast %cst_15 : f32 to vector<32x128xf32>
    %42 = arith.cmpf ogt, %40, %41 : vector<32x128xf32>
    %43 = arith.andi %39, %3 : vector<32x128xi1>
    %44 = arith.andi %43, %42 : vector<32x128xi1>
    %c4624_i32 = arith.constant 4624 : i32
    %45 = vector.broadcast %c4624_i32 : i32 to vector<32x128xi32>
    %46 = arith.select %3, %4, %45 : vector<32x128xi1>, vector<32x128xi32>
    %c4624_i32_16 = arith.constant 4624 : i32
    %c-1_i32 = arith.constant -1 : i32
    %47:2 = scf.while (%arg7 = %46, %arg8 = %c-1_i32) : (vector<32x128xi32>, i32) -> (vector<32x128xi32>, i32) {
      %c0_i32_37 = arith.constant 0 : i32
      %85 = arith.cmpi slt, %arg8, %c0_i32_37 : i32
      scf.condition(%85) %arg7, %arg8 : vector<32x128xi32>, i32
    } do {
    ^bb0(%arg7: vector<32x128xi32>, %arg8: i32):
      %c1_i32_37 = arith.constant 1 : i32
      %85 = tpu.dynamic_rotate %arg7 by %c1_i32_37 dim 0 : vector<32x128xi32>, i32 -> vector<32x128xi32>
      %86 = vector.broadcast %c4624_i32_16 : i32 to vector<32x128xi32>
      %87 = arith.select %14, %85, %86 : vector<32x128xi1>, vector<32x128xi32>
      %88 = arith.minsi %arg7, %87 : vector<32x128xi32>
      %c31_i32_38 = arith.constant 31 : i32
      %89 = tpu.dynamic_rotate %arg7 by %c31_i32_38 dim 0 : vector<32x128xi32>, i32 -> vector<32x128xi32>
      %90 = vector.broadcast %c4624_i32_16 : i32 to vector<32x128xi32>
      %91 = arith.select %24, %89, %90 : vector<32x128xi1>, vector<32x128xi32>
      %92 = arith.minsi %88, %91 : vector<32x128xi32>
      %c1_i32_39 = arith.constant 1 : i32
      %93 = tpu.dynamic_rotate %arg7 by %c1_i32_39 dim 1 : vector<32x128xi32>, i32 -> vector<32x128xi32>
      %94 = vector.broadcast %c4624_i32_16 : i32 to vector<32x128xi32>
      %95 = arith.select %34, %93, %94 : vector<32x128xi1>, vector<32x128xi32>
      %96 = arith.minsi %92, %95 : vector<32x128xi32>
      %c127_i32_40 = arith.constant 127 : i32
      %97 = tpu.dynamic_rotate %arg7 by %c127_i32_40 dim 1 : vector<32x128xi32>, i32 -> vector<32x128xi32>
      %98 = vector.broadcast %c4624_i32_16 : i32 to vector<32x128xi32>
      %99 = arith.select %44, %97, %98 : vector<32x128xi1>, vector<32x128xi32>
      %100 = arith.minsi %96, %99 : vector<32x128xi32>
      %c1_i32_41 = arith.constant 1 : i32
      %101 = tpu.dynamic_rotate %100 by %c1_i32_41 dim 0 : vector<32x128xi32>, i32 -> vector<32x128xi32>
      %102 = vector.broadcast %c4624_i32_16 : i32 to vector<32x128xi32>
      %103 = arith.select %14, %101, %102 : vector<32x128xi1>, vector<32x128xi32>
      %104 = arith.minsi %100, %103 : vector<32x128xi32>
      %c31_i32_42 = arith.constant 31 : i32
      %105 = tpu.dynamic_rotate %100 by %c31_i32_42 dim 0 : vector<32x128xi32>, i32 -> vector<32x128xi32>
      %106 = vector.broadcast %c4624_i32_16 : i32 to vector<32x128xi32>
      %107 = arith.select %24, %105, %106 : vector<32x128xi1>, vector<32x128xi32>
      %108 = arith.minsi %104, %107 : vector<32x128xi32>
      %c1_i32_43 = arith.constant 1 : i32
      %109 = tpu.dynamic_rotate %100 by %c1_i32_43 dim 1 : vector<32x128xi32>, i32 -> vector<32x128xi32>
      %110 = vector.broadcast %c4624_i32_16 : i32 to vector<32x128xi32>
      %111 = arith.select %34, %109, %110 : vector<32x128xi1>, vector<32x128xi32>
      %112 = arith.minsi %108, %111 : vector<32x128xi32>
      %c127_i32_44 = arith.constant 127 : i32
      %113 = tpu.dynamic_rotate %100 by %c127_i32_44 dim 1 : vector<32x128xi32>, i32 -> vector<32x128xi32>
      %114 = vector.broadcast %c4624_i32_16 : i32 to vector<32x128xi32>
      %115 = arith.select %44, %113, %114 : vector<32x128xi1>, vector<32x128xi32>
      %116 = arith.minsi %112, %115 : vector<32x128xi32>
      %c1_i32_45 = arith.constant 1 : i32
      %117 = tpu.dynamic_rotate %116 by %c1_i32_45 dim 0 : vector<32x128xi32>, i32 -> vector<32x128xi32>
      %118 = vector.broadcast %c4624_i32_16 : i32 to vector<32x128xi32>
      %119 = arith.select %14, %117, %118 : vector<32x128xi1>, vector<32x128xi32>
      %120 = arith.minsi %116, %119 : vector<32x128xi32>
      %c31_i32_46 = arith.constant 31 : i32
      %121 = tpu.dynamic_rotate %116 by %c31_i32_46 dim 0 : vector<32x128xi32>, i32 -> vector<32x128xi32>
      %122 = vector.broadcast %c4624_i32_16 : i32 to vector<32x128xi32>
      %123 = arith.select %24, %121, %122 : vector<32x128xi1>, vector<32x128xi32>
      %124 = arith.minsi %120, %123 : vector<32x128xi32>
      %c1_i32_47 = arith.constant 1 : i32
      %125 = tpu.dynamic_rotate %116 by %c1_i32_47 dim 1 : vector<32x128xi32>, i32 -> vector<32x128xi32>
      %126 = vector.broadcast %c4624_i32_16 : i32 to vector<32x128xi32>
      %127 = arith.select %34, %125, %126 : vector<32x128xi1>, vector<32x128xi32>
      %128 = arith.minsi %124, %127 : vector<32x128xi32>
      %c127_i32_48 = arith.constant 127 : i32
      %129 = tpu.dynamic_rotate %116 by %c127_i32_48 dim 1 : vector<32x128xi32>, i32 -> vector<32x128xi32>
      %130 = vector.broadcast %c4624_i32_16 : i32 to vector<32x128xi32>
      %131 = arith.select %44, %129, %130 : vector<32x128xi1>, vector<32x128xi32>
      %132 = arith.minsi %128, %131 : vector<32x128xi32>
      %c1_i32_49 = arith.constant 1 : i32
      %133 = tpu.dynamic_rotate %132 by %c1_i32_49 dim 0 : vector<32x128xi32>, i32 -> vector<32x128xi32>
      %134 = vector.broadcast %c4624_i32_16 : i32 to vector<32x128xi32>
      %135 = arith.select %14, %133, %134 : vector<32x128xi1>, vector<32x128xi32>
      %136 = arith.minsi %132, %135 : vector<32x128xi32>
      %c31_i32_50 = arith.constant 31 : i32
      %137 = tpu.dynamic_rotate %132 by %c31_i32_50 dim 0 : vector<32x128xi32>, i32 -> vector<32x128xi32>
      %138 = vector.broadcast %c4624_i32_16 : i32 to vector<32x128xi32>
      %139 = arith.select %24, %137, %138 : vector<32x128xi1>, vector<32x128xi32>
      %140 = arith.minsi %136, %139 : vector<32x128xi32>
      %c1_i32_51 = arith.constant 1 : i32
      %141 = tpu.dynamic_rotate %132 by %c1_i32_51 dim 1 : vector<32x128xi32>, i32 -> vector<32x128xi32>
      %142 = vector.broadcast %c4624_i32_16 : i32 to vector<32x128xi32>
      %143 = arith.select %34, %141, %142 : vector<32x128xi1>, vector<32x128xi32>
      %144 = arith.minsi %140, %143 : vector<32x128xi32>
      %c127_i32_52 = arith.constant 127 : i32
      %145 = tpu.dynamic_rotate %132 by %c127_i32_52 dim 1 : vector<32x128xi32>, i32 -> vector<32x128xi32>
      %146 = vector.broadcast %c4624_i32_16 : i32 to vector<32x128xi32>
      %147 = arith.select %44, %145, %146 : vector<32x128xi1>, vector<32x128xi32>
      %148 = arith.minsi %144, %147 : vector<32x128xi32>
      %c1_i32_53 = arith.constant 1 : i32
      %149 = tpu.dynamic_rotate %148 by %c1_i32_53 dim 0 : vector<32x128xi32>, i32 -> vector<32x128xi32>
      %150 = vector.broadcast %c4624_i32_16 : i32 to vector<32x128xi32>
      %151 = arith.select %14, %149, %150 : vector<32x128xi1>, vector<32x128xi32>
      %152 = arith.minsi %148, %151 : vector<32x128xi32>
      %c31_i32_54 = arith.constant 31 : i32
      %153 = tpu.dynamic_rotate %148 by %c31_i32_54 dim 0 : vector<32x128xi32>, i32 -> vector<32x128xi32>
      %154 = vector.broadcast %c4624_i32_16 : i32 to vector<32x128xi32>
      %155 = arith.select %24, %153, %154 : vector<32x128xi1>, vector<32x128xi32>
      %156 = arith.minsi %152, %155 : vector<32x128xi32>
      %c1_i32_55 = arith.constant 1 : i32
      %157 = tpu.dynamic_rotate %148 by %c1_i32_55 dim 1 : vector<32x128xi32>, i32 -> vector<32x128xi32>
      %158 = vector.broadcast %c4624_i32_16 : i32 to vector<32x128xi32>
      %159 = arith.select %34, %157, %158 : vector<32x128xi1>, vector<32x128xi32>
      %160 = arith.minsi %156, %159 : vector<32x128xi32>
      %c127_i32_56 = arith.constant 127 : i32
      %161 = tpu.dynamic_rotate %148 by %c127_i32_56 dim 1 : vector<32x128xi32>, i32 -> vector<32x128xi32>
      %162 = vector.broadcast %c4624_i32_16 : i32 to vector<32x128xi32>
      %163 = arith.select %44, %161, %162 : vector<32x128xi1>, vector<32x128xi32>
      %164 = arith.minsi %160, %163 : vector<32x128xi32>
      %c1_i32_57 = arith.constant 1 : i32
      %165 = tpu.dynamic_rotate %164 by %c1_i32_57 dim 0 : vector<32x128xi32>, i32 -> vector<32x128xi32>
      %166 = vector.broadcast %c4624_i32_16 : i32 to vector<32x128xi32>
      %167 = arith.select %14, %165, %166 : vector<32x128xi1>, vector<32x128xi32>
      %168 = arith.minsi %164, %167 : vector<32x128xi32>
      %c31_i32_58 = arith.constant 31 : i32
      %169 = tpu.dynamic_rotate %164 by %c31_i32_58 dim 0 : vector<32x128xi32>, i32 -> vector<32x128xi32>
      %170 = vector.broadcast %c4624_i32_16 : i32 to vector<32x128xi32>
      %171 = arith.select %24, %169, %170 : vector<32x128xi1>, vector<32x128xi32>
      %172 = arith.minsi %168, %171 : vector<32x128xi32>
      %c1_i32_59 = arith.constant 1 : i32
      %173 = tpu.dynamic_rotate %164 by %c1_i32_59 dim 1 : vector<32x128xi32>, i32 -> vector<32x128xi32>
      %174 = vector.broadcast %c4624_i32_16 : i32 to vector<32x128xi32>
      %175 = arith.select %34, %173, %174 : vector<32x128xi1>, vector<32x128xi32>
      %176 = arith.minsi %172, %175 : vector<32x128xi32>
      %c127_i32_60 = arith.constant 127 : i32
      %177 = tpu.dynamic_rotate %164 by %c127_i32_60 dim 1 : vector<32x128xi32>, i32 -> vector<32x128xi32>
      %178 = vector.broadcast %c4624_i32_16 : i32 to vector<32x128xi32>
      %179 = arith.select %44, %177, %178 : vector<32x128xi1>, vector<32x128xi32>
      %180 = arith.minsi %176, %179 : vector<32x128xi32>
      %c1_i32_61 = arith.constant 1 : i32
      %181 = tpu.dynamic_rotate %180 by %c1_i32_61 dim 0 : vector<32x128xi32>, i32 -> vector<32x128xi32>
      %182 = vector.broadcast %c4624_i32_16 : i32 to vector<32x128xi32>
      %183 = arith.select %14, %181, %182 : vector<32x128xi1>, vector<32x128xi32>
      %184 = arith.minsi %180, %183 : vector<32x128xi32>
      %c31_i32_62 = arith.constant 31 : i32
      %185 = tpu.dynamic_rotate %180 by %c31_i32_62 dim 0 : vector<32x128xi32>, i32 -> vector<32x128xi32>
      %186 = vector.broadcast %c4624_i32_16 : i32 to vector<32x128xi32>
      %187 = arith.select %24, %185, %186 : vector<32x128xi1>, vector<32x128xi32>
      %188 = arith.minsi %184, %187 : vector<32x128xi32>
      %c1_i32_63 = arith.constant 1 : i32
      %189 = tpu.dynamic_rotate %180 by %c1_i32_63 dim 1 : vector<32x128xi32>, i32 -> vector<32x128xi32>
      %190 = vector.broadcast %c4624_i32_16 : i32 to vector<32x128xi32>
      %191 = arith.select %34, %189, %190 : vector<32x128xi1>, vector<32x128xi32>
      %192 = arith.minsi %188, %191 : vector<32x128xi32>
      %c127_i32_64 = arith.constant 127 : i32
      %193 = tpu.dynamic_rotate %180 by %c127_i32_64 dim 1 : vector<32x128xi32>, i32 -> vector<32x128xi32>
      %194 = vector.broadcast %c4624_i32_16 : i32 to vector<32x128xi32>
      %195 = arith.select %44, %193, %194 : vector<32x128xi1>, vector<32x128xi32>
      %196 = arith.minsi %192, %195 : vector<32x128xi32>
      %c1_i32_65 = arith.constant 1 : i32
      %197 = tpu.dynamic_rotate %196 by %c1_i32_65 dim 0 : vector<32x128xi32>, i32 -> vector<32x128xi32>
      %198 = vector.broadcast %c4624_i32_16 : i32 to vector<32x128xi32>
      %199 = arith.select %14, %197, %198 : vector<32x128xi1>, vector<32x128xi32>
      %200 = arith.minsi %196, %199 : vector<32x128xi32>
      %c31_i32_66 = arith.constant 31 : i32
      %201 = tpu.dynamic_rotate %196 by %c31_i32_66 dim 0 : vector<32x128xi32>, i32 -> vector<32x128xi32>
      %202 = vector.broadcast %c4624_i32_16 : i32 to vector<32x128xi32>
      %203 = arith.select %24, %201, %202 : vector<32x128xi1>, vector<32x128xi32>
      %204 = arith.minsi %200, %203 : vector<32x128xi32>
      %c1_i32_67 = arith.constant 1 : i32
      %205 = tpu.dynamic_rotate %196 by %c1_i32_67 dim 1 : vector<32x128xi32>, i32 -> vector<32x128xi32>
      %206 = vector.broadcast %c4624_i32_16 : i32 to vector<32x128xi32>
      %207 = arith.select %34, %205, %206 : vector<32x128xi1>, vector<32x128xi32>
      %208 = arith.minsi %204, %207 : vector<32x128xi32>
      %c127_i32_68 = arith.constant 127 : i32
      %209 = tpu.dynamic_rotate %196 by %c127_i32_68 dim 1 : vector<32x128xi32>, i32 -> vector<32x128xi32>
      %210 = vector.broadcast %c4624_i32_16 : i32 to vector<32x128xi32>
      %211 = arith.select %44, %209, %210 : vector<32x128xi1>, vector<32x128xi32>
      %212 = arith.minsi %208, %211 : vector<32x128xi32>
      %c1_i32_69 = arith.constant 1 : i32
      %213 = tpu.dynamic_rotate %212 by %c1_i32_69 dim 0 : vector<32x128xi32>, i32 -> vector<32x128xi32>
      %214 = vector.broadcast %c4624_i32_16 : i32 to vector<32x128xi32>
      %215 = arith.select %14, %213, %214 : vector<32x128xi1>, vector<32x128xi32>
      %216 = arith.minsi %212, %215 : vector<32x128xi32>
      %c31_i32_70 = arith.constant 31 : i32
      %217 = tpu.dynamic_rotate %212 by %c31_i32_70 dim 0 : vector<32x128xi32>, i32 -> vector<32x128xi32>
      %218 = vector.broadcast %c4624_i32_16 : i32 to vector<32x128xi32>
      %219 = arith.select %24, %217, %218 : vector<32x128xi1>, vector<32x128xi32>
      %220 = arith.minsi %216, %219 : vector<32x128xi32>
      %c1_i32_71 = arith.constant 1 : i32
      %221 = tpu.dynamic_rotate %212 by %c1_i32_71 dim 1 : vector<32x128xi32>, i32 -> vector<32x128xi32>
      %222 = vector.broadcast %c4624_i32_16 : i32 to vector<32x128xi32>
      %223 = arith.select %34, %221, %222 : vector<32x128xi1>, vector<32x128xi32>
      %224 = arith.minsi %220, %223 : vector<32x128xi32>
      %c127_i32_72 = arith.constant 127 : i32
      %225 = tpu.dynamic_rotate %212 by %c127_i32_72 dim 1 : vector<32x128xi32>, i32 -> vector<32x128xi32>
      %226 = vector.broadcast %c4624_i32_16 : i32 to vector<32x128xi32>
      %227 = arith.select %44, %225, %226 : vector<32x128xi1>, vector<32x128xi32>
      %228 = arith.minsi %224, %227 : vector<32x128xi32>
      %c1_i32_73 = arith.constant 1 : i32
      %229 = tpu.dynamic_rotate %228 by %c1_i32_73 dim 0 : vector<32x128xi32>, i32 -> vector<32x128xi32>
      %230 = vector.broadcast %c4624_i32_16 : i32 to vector<32x128xi32>
      %231 = arith.select %14, %229, %230 : vector<32x128xi1>, vector<32x128xi32>
      %232 = arith.minsi %228, %231 : vector<32x128xi32>
      %c31_i32_74 = arith.constant 31 : i32
      %233 = tpu.dynamic_rotate %228 by %c31_i32_74 dim 0 : vector<32x128xi32>, i32 -> vector<32x128xi32>
      %234 = vector.broadcast %c4624_i32_16 : i32 to vector<32x128xi32>
      %235 = arith.select %24, %233, %234 : vector<32x128xi1>, vector<32x128xi32>
      %236 = arith.minsi %232, %235 : vector<32x128xi32>
      %c1_i32_75 = arith.constant 1 : i32
      %237 = tpu.dynamic_rotate %228 by %c1_i32_75 dim 1 : vector<32x128xi32>, i32 -> vector<32x128xi32>
      %238 = vector.broadcast %c4624_i32_16 : i32 to vector<32x128xi32>
      %239 = arith.select %34, %237, %238 : vector<32x128xi1>, vector<32x128xi32>
      %240 = arith.minsi %236, %239 : vector<32x128xi32>
      %c127_i32_76 = arith.constant 127 : i32
      %241 = tpu.dynamic_rotate %228 by %c127_i32_76 dim 1 : vector<32x128xi32>, i32 -> vector<32x128xi32>
      %242 = vector.broadcast %c4624_i32_16 : i32 to vector<32x128xi32>
      %243 = arith.select %44, %241, %242 : vector<32x128xi1>, vector<32x128xi32>
      %244 = arith.minsi %240, %243 : vector<32x128xi32>
      %c1_i32_77 = arith.constant 1 : i32
      %245 = tpu.dynamic_rotate %244 by %c1_i32_77 dim 0 : vector<32x128xi32>, i32 -> vector<32x128xi32>
      %246 = vector.broadcast %c4624_i32_16 : i32 to vector<32x128xi32>
      %247 = arith.select %14, %245, %246 : vector<32x128xi1>, vector<32x128xi32>
      %248 = arith.minsi %244, %247 : vector<32x128xi32>
      %c31_i32_78 = arith.constant 31 : i32
      %249 = tpu.dynamic_rotate %244 by %c31_i32_78 dim 0 : vector<32x128xi32>, i32 -> vector<32x128xi32>
      %250 = vector.broadcast %c4624_i32_16 : i32 to vector<32x128xi32>
      %251 = arith.select %24, %249, %250 : vector<32x128xi1>, vector<32x128xi32>
      %252 = arith.minsi %248, %251 : vector<32x128xi32>
      %c1_i32_79 = arith.constant 1 : i32
      %253 = tpu.dynamic_rotate %244 by %c1_i32_79 dim 1 : vector<32x128xi32>, i32 -> vector<32x128xi32>
      %254 = vector.broadcast %c4624_i32_16 : i32 to vector<32x128xi32>
      %255 = arith.select %34, %253, %254 : vector<32x128xi1>, vector<32x128xi32>
      %256 = arith.minsi %252, %255 : vector<32x128xi32>
      %c127_i32_80 = arith.constant 127 : i32
      %257 = tpu.dynamic_rotate %244 by %c127_i32_80 dim 1 : vector<32x128xi32>, i32 -> vector<32x128xi32>
      %258 = vector.broadcast %c4624_i32_16 : i32 to vector<32x128xi32>
      %259 = arith.select %44, %257, %258 : vector<32x128xi1>, vector<32x128xi32>
      %260 = arith.minsi %256, %259 : vector<32x128xi32>
      %c1_i32_81 = arith.constant 1 : i32
      %261 = tpu.dynamic_rotate %260 by %c1_i32_81 dim 0 : vector<32x128xi32>, i32 -> vector<32x128xi32>
      %262 = vector.broadcast %c4624_i32_16 : i32 to vector<32x128xi32>
      %263 = arith.select %14, %261, %262 : vector<32x128xi1>, vector<32x128xi32>
      %264 = arith.minsi %260, %263 : vector<32x128xi32>
      %c31_i32_82 = arith.constant 31 : i32
      %265 = tpu.dynamic_rotate %260 by %c31_i32_82 dim 0 : vector<32x128xi32>, i32 -> vector<32x128xi32>
      %266 = vector.broadcast %c4624_i32_16 : i32 to vector<32x128xi32>
      %267 = arith.select %24, %265, %266 : vector<32x128xi1>, vector<32x128xi32>
      %268 = arith.minsi %264, %267 : vector<32x128xi32>
      %c1_i32_83 = arith.constant 1 : i32
      %269 = tpu.dynamic_rotate %260 by %c1_i32_83 dim 1 : vector<32x128xi32>, i32 -> vector<32x128xi32>
      %270 = vector.broadcast %c4624_i32_16 : i32 to vector<32x128xi32>
      %271 = arith.select %34, %269, %270 : vector<32x128xi1>, vector<32x128xi32>
      %272 = arith.minsi %268, %271 : vector<32x128xi32>
      %c127_i32_84 = arith.constant 127 : i32
      %273 = tpu.dynamic_rotate %260 by %c127_i32_84 dim 1 : vector<32x128xi32>, i32 -> vector<32x128xi32>
      %274 = vector.broadcast %c4624_i32_16 : i32 to vector<32x128xi32>
      %275 = arith.select %44, %273, %274 : vector<32x128xi1>, vector<32x128xi32>
      %276 = arith.minsi %272, %275 : vector<32x128xi32>
      %c1_i32_85 = arith.constant 1 : i32
      %277 = tpu.dynamic_rotate %276 by %c1_i32_85 dim 0 : vector<32x128xi32>, i32 -> vector<32x128xi32>
      %278 = vector.broadcast %c4624_i32_16 : i32 to vector<32x128xi32>
      %279 = arith.select %14, %277, %278 : vector<32x128xi1>, vector<32x128xi32>
      %280 = arith.minsi %276, %279 : vector<32x128xi32>
      %c31_i32_86 = arith.constant 31 : i32
      %281 = tpu.dynamic_rotate %276 by %c31_i32_86 dim 0 : vector<32x128xi32>, i32 -> vector<32x128xi32>
      %282 = vector.broadcast %c4624_i32_16 : i32 to vector<32x128xi32>
      %283 = arith.select %24, %281, %282 : vector<32x128xi1>, vector<32x128xi32>
      %284 = arith.minsi %280, %283 : vector<32x128xi32>
      %c1_i32_87 = arith.constant 1 : i32
      %285 = tpu.dynamic_rotate %276 by %c1_i32_87 dim 1 : vector<32x128xi32>, i32 -> vector<32x128xi32>
      %286 = vector.broadcast %c4624_i32_16 : i32 to vector<32x128xi32>
      %287 = arith.select %34, %285, %286 : vector<32x128xi1>, vector<32x128xi32>
      %288 = arith.minsi %284, %287 : vector<32x128xi32>
      %c127_i32_88 = arith.constant 127 : i32
      %289 = tpu.dynamic_rotate %276 by %c127_i32_88 dim 1 : vector<32x128xi32>, i32 -> vector<32x128xi32>
      %290 = vector.broadcast %c4624_i32_16 : i32 to vector<32x128xi32>
      %291 = arith.select %44, %289, %290 : vector<32x128xi1>, vector<32x128xi32>
      %292 = arith.minsi %288, %291 : vector<32x128xi32>
      %c1_i32_89 = arith.constant 1 : i32
      %293 = tpu.dynamic_rotate %292 by %c1_i32_89 dim 0 : vector<32x128xi32>, i32 -> vector<32x128xi32>
      %294 = vector.broadcast %c4624_i32_16 : i32 to vector<32x128xi32>
      %295 = arith.select %14, %293, %294 : vector<32x128xi1>, vector<32x128xi32>
      %296 = arith.minsi %292, %295 : vector<32x128xi32>
      %c31_i32_90 = arith.constant 31 : i32
      %297 = tpu.dynamic_rotate %292 by %c31_i32_90 dim 0 : vector<32x128xi32>, i32 -> vector<32x128xi32>
      %298 = vector.broadcast %c4624_i32_16 : i32 to vector<32x128xi32>
      %299 = arith.select %24, %297, %298 : vector<32x128xi1>, vector<32x128xi32>
      %300 = arith.minsi %296, %299 : vector<32x128xi32>
      %c1_i32_91 = arith.constant 1 : i32
      %301 = tpu.dynamic_rotate %292 by %c1_i32_91 dim 1 : vector<32x128xi32>, i32 -> vector<32x128xi32>
      %302 = vector.broadcast %c4624_i32_16 : i32 to vector<32x128xi32>
      %303 = arith.select %34, %301, %302 : vector<32x128xi1>, vector<32x128xi32>
      %304 = arith.minsi %300, %303 : vector<32x128xi32>
      %c127_i32_92 = arith.constant 127 : i32
      %305 = tpu.dynamic_rotate %292 by %c127_i32_92 dim 1 : vector<32x128xi32>, i32 -> vector<32x128xi32>
      %306 = vector.broadcast %c4624_i32_16 : i32 to vector<32x128xi32>
      %307 = arith.select %44, %305, %306 : vector<32x128xi1>, vector<32x128xi32>
      %308 = arith.minsi %304, %307 : vector<32x128xi32>
      %c1_i32_93 = arith.constant 1 : i32
      %309 = tpu.dynamic_rotate %308 by %c1_i32_93 dim 0 : vector<32x128xi32>, i32 -> vector<32x128xi32>
      %310 = vector.broadcast %c4624_i32_16 : i32 to vector<32x128xi32>
      %311 = arith.select %14, %309, %310 : vector<32x128xi1>, vector<32x128xi32>
      %312 = arith.minsi %308, %311 : vector<32x128xi32>
      %c31_i32_94 = arith.constant 31 : i32
      %313 = tpu.dynamic_rotate %308 by %c31_i32_94 dim 0 : vector<32x128xi32>, i32 -> vector<32x128xi32>
      %314 = vector.broadcast %c4624_i32_16 : i32 to vector<32x128xi32>
      %315 = arith.select %24, %313, %314 : vector<32x128xi1>, vector<32x128xi32>
      %316 = arith.minsi %312, %315 : vector<32x128xi32>
      %c1_i32_95 = arith.constant 1 : i32
      %317 = tpu.dynamic_rotate %308 by %c1_i32_95 dim 1 : vector<32x128xi32>, i32 -> vector<32x128xi32>
      %318 = vector.broadcast %c4624_i32_16 : i32 to vector<32x128xi32>
      %319 = arith.select %34, %317, %318 : vector<32x128xi1>, vector<32x128xi32>
      %320 = arith.minsi %316, %319 : vector<32x128xi32>
      %c127_i32_96 = arith.constant 127 : i32
      %321 = tpu.dynamic_rotate %308 by %c127_i32_96 dim 1 : vector<32x128xi32>, i32 -> vector<32x128xi32>
      %322 = vector.broadcast %c4624_i32_16 : i32 to vector<32x128xi32>
      %323 = arith.select %44, %321, %322 : vector<32x128xi1>, vector<32x128xi32>
      %324 = arith.minsi %320, %323 : vector<32x128xi32>
      %c1_i32_97 = arith.constant 1 : i32
      %325 = tpu.dynamic_rotate %324 by %c1_i32_97 dim 0 : vector<32x128xi32>, i32 -> vector<32x128xi32>
      %326 = vector.broadcast %c4624_i32_16 : i32 to vector<32x128xi32>
      %327 = arith.select %14, %325, %326 : vector<32x128xi1>, vector<32x128xi32>
      %328 = arith.minsi %324, %327 : vector<32x128xi32>
      %c31_i32_98 = arith.constant 31 : i32
      %329 = tpu.dynamic_rotate %324 by %c31_i32_98 dim 0 : vector<32x128xi32>, i32 -> vector<32x128xi32>
      %330 = vector.broadcast %c4624_i32_16 : i32 to vector<32x128xi32>
      %331 = arith.select %24, %329, %330 : vector<32x128xi1>, vector<32x128xi32>
      %332 = arith.minsi %328, %331 : vector<32x128xi32>
      %c1_i32_99 = arith.constant 1 : i32
      %333 = tpu.dynamic_rotate %324 by %c1_i32_99 dim 1 : vector<32x128xi32>, i32 -> vector<32x128xi32>
      %334 = vector.broadcast %c4624_i32_16 : i32 to vector<32x128xi32>
      %335 = arith.select %34, %333, %334 : vector<32x128xi1>, vector<32x128xi32>
      %336 = arith.minsi %332, %335 : vector<32x128xi32>
      %c127_i32_100 = arith.constant 127 : i32
      %337 = tpu.dynamic_rotate %324 by %c127_i32_100 dim 1 : vector<32x128xi32>, i32 -> vector<32x128xi32>
      %338 = vector.broadcast %c4624_i32_16 : i32 to vector<32x128xi32>
      %339 = arith.select %44, %337, %338 : vector<32x128xi1>, vector<32x128xi32>
      %340 = arith.minsi %336, %339 : vector<32x128xi32>
      %341 = arith.subi %340, %arg7 : vector<32x128xi32>
      %342 = vector.shape_cast %341 : vector<32x128xi32> to vector<1x32x128xi32>
      %cst_101 = arith.constant dense<2147483647> : vector<1xi32>
      %343 = vector.multi_reduction <minsi>, %342, %cst_101 [1, 2] : vector<1x32x128xi32> to vector<1xi32>
      %344 = vector.shape_cast %343 : vector<1xi32> to vector<1x1x1xi32>
      %345 = vector.extract %344[0, 0, 0] : i32 from vector<1x1x1xi32>
      scf.yield %340, %345 : vector<32x128xi32>, i32
    }
    %48 = arith.cmpi eq, %47#0, %4 : vector<32x128xi32>
    %49 = arith.andi %3, %48 : vector<32x128xi1>
    %cst_17 = arith.constant 1.000000e+00 : f32
    %cst_18 = arith.constant 0.000000e+00 : f32
    %50 = vector.broadcast %cst_17 : f32 to vector<32x128xf32>
    %51 = vector.broadcast %cst_18 : f32 to vector<32x128xf32>
    %52 = arith.select %49, %50, %51 : vector<32x128xi1>, vector<32x128xf32>
    %53 = arith.truncf %52 : vector<32x128xf32> to vector<32x128xbf16>
    %c0_19 = arith.constant 0 : index
    %c0_20 = arith.constant 0 : index
    %54 = vector.load %arg4[%c0_19, %c0_20] : memref<16x32xbf16, #tpu.memory_space<vmem>>, vector<16x32xbf16>
    %cst_21 = arith.constant dense<0.000000e+00> : vector<16x128xf32>
    %55 = tpu.matmul %54, %53, %cst_21 {dimension_numbers = #tpu.dot_dimension_numbers<[1], [0], [0], [1], [0, 0, 1, 1], [], []>} : vector<16x32xbf16>, vector<32x128xbf16>, vector<16x128xf32> -> vector<16x128xf32>
    %c0_22 = arith.constant 0 : index
    %c0_23 = arith.constant 0 : index
    %56 = vector.load %arg5[%c0_22, %c0_23] : memref<16x128xf32, #tpu.memory_space<vmem>>, vector<16x128xf32>
    %57 = arith.mulf %55, %56 : vector<16x128xf32>
    %cst_24 = arith.constant dense<0.000000e+00> : vector<16xf32>
    %58 = vector.multi_reduction <add>, %57, %cst_24 [1] : vector<16x128xf32> to vector<16xf32>
    %59 = vector.shape_cast %58 : vector<16xf32> to vector<16x1xf32>
    %60 = arith.fptosi %59 : vector<16x1xf32> to vector<16x1xi32>
    %c0_25 = arith.constant 0 : index
    %c0_26 = arith.constant 0 : index
    %c0_27 = arith.constant 0 : index
    %61 = vector.load %arg2[%c0_25, %c0_26, %c0_27] : memref<1x16x128xf32, #tpu.memory_space<vmem>>, vector<1x16x128xf32>
    %62 = vector.shape_cast %61 : vector<1x16x128xf32> to vector<16x128xf32>
    %63 = tpu.iota {dimensions = array<i32: 1>} : vector<16x128xi32>
    %cst_28 = arith.constant 0.000000e+00 : f32
    %64 = vector.broadcast %cst_28 : f32 to vector<16x128xf32>
    %65 = arith.cmpf ogt, %62, %64 : vector<16x128xf32>
    %66 = vector.broadcast %60 : vector<16x1xi32> to vector<16x128xi32>
    %67 = arith.cmpi slt, %63, %66 : vector<16x128xi32>
    %68 = arith.andi %65, %67 : vector<16x128xi1>
    %cst_29 = arith.constant 1.000000e+00 : f32
    %cst_30 = arith.constant 0.000000e+00 : f32
    %69 = vector.broadcast %cst_29 : f32 to vector<16x128xf32>
    %70 = vector.broadcast %cst_30 : f32 to vector<16x128xf32>
    %71 = arith.select %68, %69, %70 : vector<16x128xi1>, vector<16x128xf32>
    %72 = arith.subf %62, %71 : vector<16x128xf32>
    %73 = math.absf %72 : vector<16x128xf32>
    %cst_31 = arith.constant 0.000000e+00 : f32
    %74 = vector.broadcast %cst_31 : f32 to vector<16x128xf32>
    %75 = arith.select %65, %73, %74 : vector<16x128xi1>, vector<16x128xf32>
    %cst_32 = arith.constant dense<0.000000e+00> : vector<16xf32>
    %76 = vector.multi_reduction <add>, %75, %cst_32 [1] : vector<16x128xf32> to vector<16xf32>
    %77 = vector.shape_cast %76 : vector<16xf32> to vector<16x1xf32>
    %c0_i32 = arith.constant 0 : i32
    %78 = vector.broadcast %c0_i32 : i32 to vector<16x1xi32>
    %79 = arith.cmpi sgt, %60, %78 : vector<16x1xi32>
    %cst_33 = arith.constant 0.000000e+00 : f32
    %80 = vector.broadcast %cst_33 : f32 to vector<16x1xf32>
    %81 = arith.select %79, %77, %80 : vector<16x1xi1>, vector<16x1xf32>
    %c0_34 = arith.constant 0 : index
    %c0_35 = arith.constant 0 : index
    %c0_36 = arith.constant 0 : index
    %82 = vector.load %arg6[%c0_34, %c0_35, %c0_36] : memref<1x16x1xf32, #tpu.memory_space<vmem>>, vector<1x16x1xf32>
    %83 = vector.shape_cast %82 : vector<1x16x1xf32> to vector<16x1xf32>
    %84 = vector.shape_cast %81 : vector<16x1xf32> to vector<1x16x1xf32>
    tpu.vector_store %arg6[%c0_34, %c0_35, %c0_36], %84 {strides = array<i32>} : memref<1x16x1xf32, #tpu.memory_space<vmem>>, vector<1x16x1xf32>,
    return
  }
  func.func @transform_0(%arg0: i32) -> (i32, i32, i32) {
    %c0_i32 = arith.constant 0 : i32
    %c0_i32_0 = arith.constant 0 : i32
    %c0_i32_1 = arith.constant 0 : i32
    return %arg0, %c0_i32, %c0_i32_0 : i32, i32, i32
  }
  func.func @transform_1(%arg0: i32) -> (i32, i32, i32) {
    %c0_i32 = arith.constant 0 : i32
    %c0_i32_0 = arith.constant 0 : i32
    %c0_i32_1 = arith.constant 0 : i32
    return %arg0, %c0_i32, %c0_i32_0 : i32, i32, i32
  }
  func.func @transform_2(%arg0: i32) -> (i32, i32) {
    %c0_i32 = arith.constant 0 : i32
    %c0_i32_0 = arith.constant 0 : i32
    %c0_i32_1 = arith.constant 0 : i32
    return %c0_i32, %c0_i32_0 : i32, i32
  }
  func.func @transform_3(%arg0: i32) -> (i32, i32) {
    %c0_i32 = arith.constant 0 : i32
    %c0_i32_0 = arith.constant 0 : i32
    %c0_i32_1 = arith.constant 0 : i32
    return %c0_i32, %c0_i32_0 : i32, i32
  }
  func.func @transform_4(%arg0: i32) -> (i32, i32) {
    %c0_i32 = arith.constant 0 : i32
    %c0_i32_0 = arith.constant 0 : i32
    %c0_i32_1 = arith.constant 0 : i32
    return %c0_i32, %c0_i32_0 : i32, i32
  }
  func.func @transform_5(%arg0: i32) -> (i32, i32, i32) {
    %c0_i32 = arith.constant 0 : i32
    %c0_i32_0 = arith.constant 0 : i32
    %c0_i32_1 = arith.constant 0 : i32
    return %arg0, %c0_i32, %c0_i32_0 : i32, i32, i32
  }
}

</mosaic_0001>

<bundles_post_ra>
// kernel: tpu_custom_call.1
= control target key start
LH: loop header
LB: loop body
LE: loop exit
PB: predicated region body
PF: predicated region fallthrough
CT: control target
= control target key end

     0   :  { %s3922_s0 = inlined_call_operand.hbm [shape: f32[2,32,128], index: 0, kind: input, shape index: {}]   ;;  %s3923_s1 = inlined_call_operand.hbm [shape: f32[2,16,128], index: 1, kind: input, shape index: {}]   ;;  %s3924_s2 = inlined_call_operand.hbm [shape: s32[32,128], index: 2, kind: input, shape index: {}]   ;;  %s3925_s3 = inlined_call_operand.hbm [shape: bf16[16,32], index: 3, kind: input, shape index: {}]   ;;  %s3926_s4 = inlined_call_operand.hbm [shape: f32[16,128], index: 4, kind: input, shape index: {}]   ;;  %s3927_s5 = inlined_call_operand.vmem [shape: f32[2,16,1], index: 5, kind: output, shape index: {}]  }
   0x1   :  { %4005 = sst [smem:[#allocation14_spill]] %s3924_s2 }
   0x2   :  { %10 = vsyncpa [#allocation3], 0 }
   0x3   :  { %12 = vsyncpa [#allocation3 + $0x1], 0 }
   0x4   :  { %13 = vsyncpa [#allocation5], 0 }
   0x5   :  { %15 = vsyncpa [#allocation5 + $0x1], 0 }
   0x6   :  { %16 = vsyncpa [#allocation8], 0  ;;  %s2525_s18 = smov 0   ;;  %s2527_s19 = smov 0  }
   0x7   :  { %s2529_s20 = smov 0   ;;  %s2531_s21 = smov 0  }
   0x8 LB: > { %s2544_s22 = sadd.s32 4294967295, %s2464_s21   ;;  %p42_p0 = scmp.ne.s32.totalorder %s2456_s19, %s2452_s18  ;;  %s2464_s21 = sphi %s2531_s21, %s4293_s21   ;;  %s2460_s20 = sphi %s2529_s20, %s4292_s20   ;;  %s2456_s19 = sphi %s2527_s19, %s4291_s19   ;;  %s2452_s18 = sphi %s2525_s18, %s4290_s18  }
   0x9   : > { %p43_p1 = scmp.eq.s32.totalorder %s2544_s22, 0  ;;  %p2088_p2 = scmp.ge.s32.totalorder %s2464_s21, 1 }
   0xa   : > { %p168_p3 = scmp.lt.s32.totalorder %s2464_s21, 3  ;;  %s4007_s2 = sld [smem:[#allocation14_spill]] }
   0xb   : > { %p2552_p4 = por %p43_p1, %p42_p0  ;;  %s2482_s28 = smov [#allocation6]  }
   0xc   : > { %p2559_p5 = pnand %p2088_p2, %p168_p3  ;;  %s181_s29 = sshll.u32 %s2482_s28, 4  ;;  %s182_s29 = int_to_ptr.vmem [resolvable:$true] %s181_s29 }
   0xd   : > { %s193_s8 = sshll.u32 %s3925_s3, 4  ;;  %s2483_s9 = smov 128   ;;  %s194_s8 = int_to_ptr.hbm [resolvable:$true] %s193_s8 }
   0xe   : > { %p2151_p6 = pneg %p2559_p5  ;;  %s2484_s10 = smov 8  }
   0xf   : > { %s2485_s11 = smov [#allocation7]   ;;  %s2486_s13 = smov 64  }
  0x10   : > { %s179_s26 = sshll.u32 %s4007_s2, 4  ;;  %p2567_p7 = pnand %p2151_p6, %p43_p1  ;;  %s180_s26 = int_to_ptr.hbm [resolvable:$true] %s179_s26 }
  0x11   : > { %s195_s12 = sshll.u32 %s2485_s11, 4  ;;  %s2487_s14 = smov 4   ;;  %s196_s12 = int_to_ptr.vmem [resolvable:$true] %s195_s12 }
  0x12   : > { %2154 = dma.hbm_to_vmem [thread:$0]  (!%p2567_p7), %s180_s26, 512, %s182_s29, [#allocation5], %s2483_s9, %s2483_s9, %s2484_s10  }
  0x13   : > { %2157 = dma.hbm_to_vmem [thread:$0]  (!%p2567_p7), %s194_s8, 128, %s196_s12, [#allocation8], %s2486_s13, %s2486_s13, %s2487_s14  }
  0x14   : > { %s207_s17 = sshll.u32 %s3926_s4, 4  ;;  %s2488_s18 = smov [#allocation9]   ;;  %s208_s17 = int_to_ptr.hbm [resolvable:$true] %s207_s17 }
  0x15   : > { %s209_s24 = sshll.u32 %s2488_s18, 4  ;;  %s2590_s25 = sadd.s32 1, %s2464_s21   ;;  %s210_s24 = int_to_ptr.vmem [resolvable:$true] %s209_s24 }
  0x16   : > { %2160 = dma.hbm_to_vmem [thread:$0]  (!%p2567_p7), %s208_s17, 256, %s210_s24, [#allocation8], %s2483_s9, %s2483_s9, %s2484_s10  }
  0x17   : > { %s26_s26 = ssub.s32 %s2464_s21, %s2590_s25  ;;  %s29_s28 = sadd.s32 1, %s2460_s20 }
  0x18   : > { %p27_p8 = scmp.eq.s32.totalorder %s26_s26, 0  ;;  %p36_p9 = scmp.ne.s32.totalorder %s2460_s20, %s2456_s19 }
  0x19   : > { %p37_p10 = scmp.eq.s32.totalorder %s2464_s21, 0  ;;  %p2171_p11 = scmp.lt.s32.totalorder %s2464_s21, 2 }
  0x1a   : > { %s2600_s29 = scalar_select %p27_p8, %s2460_s20, %s29_s28  }
  0x1b   : > { %p38_p12 = por %p37_p10, %p36_p9  ;;  %s2603_s6 = sand.u32 1, %s2460_s20  }
  0x1c   : > { %s2093_s30 = sshll.u32 %s2603_s6, 5  ;;  %s2119_s7 = sshll.u32 %s2464_s21, 5 }
  0x1d   : > { %s232_s12 = scalar_lea.hbm %s3922_s0, %s2119_s7  ;;  %s227_s13 = scalar_lea.vmem [#allocation2], %s2093_s30 }
  0x1e   : > { %s235_s14 = sshll.u32 %s227_s13, 4  ;;  %s233_s15 = sshll.u32 %s232_s12, 4  ;;  %s236_s14 = int_to_ptr.vmem [resolvable:$true] %s235_s14  ;;  %s234_s15 = int_to_ptr.hbm [resolvable:$true] %s233_s15 }
  0x1f   : > { %p2610_p13 = pnand %p2171_p11, %p38_p12  ;;  %s245_s17 = sand.u32 1, %s2464_s21  }
  0x20   : > { %s2096_s18 = sshll.u32 %s2603_s6, 4  ;;  %s224_s24 = scalar_lea.sflag [#allocation3], %s2603_s6 }
  0x21   : > { %s2342_s26 = sshra.s32 %s234_s15, 4  ;;  %p2346_p2 = pneg %p2610_p13  ;;  %s2343_s26 = int_to_ptr.hbm [resolvable:$true] %s2342_s26 }
  0x22   : > { %s2344_s28 = scalar_lea.hbm %s2343_s26, 32  ;;  %s2349_s8 = scalar_lea.hbm %s3922_s0, 64 }
  0x23   : > { %p2345_p0 = scmp.ne.s32.totalorder %s2343_s26, %s2344_s28  ;;  %p2350_p7 = scmp.lt.s32.totalorder %s2343_s26, %s3922_s0 }
  0x24   : > { %p2351_p8 = scmp.lt.s32.totalorder %s2349_s8, %s2344_s28 }
  0x25   : > { %p2347_p3 = pnand %p2346_p2, %p2345_p0 }
  0x26   : > { %p2352_p9 = por %p2351_p8, %p2350_p7 }
  0x27   : > { %p2348_p6 = pneg %p2347_p3 }
  0x29   : > { %p2353_p10 = pnand %p2352_p9, %p2348_p6 }
  0x2b   : > { %2356 = shalt.err (!%p2353_p10)
}
  0x2c   : > { %2164 = dma.hbm_to_vmem [thread:$0]  (!%p2610_p13), %s234_s15, 512, %s236_s14, %s224_s24, %s2483_s9, %s2483_s9, %s2484_s10  }
  0x2d   : > { %s2120_s6 = sshll.u32 %s2464_s21, 4  ;;  %s249_s2 = scalar_lea.vmem [#allocation4], %s2096_s18 }
  0x2e   : > { %s254_s7 = scalar_lea.hbm %s3923_s1, %s2120_s6  ;;  %s257_s11 = sshll.u32 %s249_s2, 4  ;;  %s258_s11 = int_to_ptr.vmem [resolvable:$true] %s257_s11 }
  0x2f   : > { %s255_s26 = sshll.u32 %s254_s7, 4  ;;  %s246_s28 = scalar_lea.sflag [#allocation5], %s245_s17  ;;  %s256_s26 = int_to_ptr.hbm [resolvable:$true] %s255_s26 }
  0x30   : > { %s2372_s8 = sshra.s32 %s256_s26, 4  ;;  %s2379_s15 = scalar_lea.hbm %s3923_s1, 32  ;;  %s2373_s8 = int_to_ptr.hbm [resolvable:$true] %s2372_s8 }
  0x31   : > { %s2374_s12 = scalar_lea.hbm %s2373_s8, 16  ;;  %p2380_p3 = scmp.lt.s32.totalorder %s2373_s8, %s3923_s1 }
  0x32   : > { %p2375_p11 = scmp.ne.s32.totalorder %s2373_s8, %s2374_s12  ;;  %p2381_p6 = scmp.lt.s32.totalorder %s2379_s15, %s2374_s12 }
  0x34   : > { %p2377_p12 = pnand %p2375_p11, %p2346_p2  ;;  %p2382_p7 = por %p2381_p6, %p2380_p3 }
  0x36   : > { %p2378_p0 = pneg %p2377_p12 }
  0x38   : > { %p2383_p8 = pnand %p2382_p7, %p2378_p0 }
  0x3a   : > { %2386 = shalt.err (!%p2383_p8)
}
  0x3b   : > { %2167 = dma.hbm_to_vmem [thread:$0]  (!%p2610_p13), %s256_s26, 256, %s258_s11, %s246_s28, %s2483_s9, %s2483_s9, %s2484_s10  }
  0x3c   : > { %269 = sbr.rel (%p2559_p5) target bundleno = 2944 (0xb80), region = 40  ;;  %s271_s2 = sand.u32 (!%p2559_p5), 1, %s2456_s19  }
  0x3d   : > { %s2100_s17 = sshll.u32 (!%p2559_p5), %s271_s2, 5  ;;  %s272_s18 = scalar_lea.sflag (!%p2559_p5), [#allocation3], %s271_s2 }
  0x3e   : > { %s2654_s13 = scalar_lea.vmem (!%p2559_p5), [#allocation2], %s2100_s17 }
  0x41   : > { %2435 = dma.done.wait (%p2552_p4), %s272_s18, 512  }
  0x42   : > { %2437 = vsyncadd (%p2552_p4), %s272_s18, 4294966784  ;;  %s281_s16 = sand.u32 1, %s2544_s22   ;;  %s2101_s30 = sshll.u32 %s271_s2, 4 }
  0x43   : > { %s282_s9 = scalar_lea.sflag [#allocation5], %s281_s16  ;;  %s2661_s10 = scalar_lea.vmem [#allocation4], %s2101_s30 }
  0x44   : > { %2439 = dma.done.wait (%p2552_p4), %s282_s9, 256  }
  0x45   : > { %2441 = vsyncadd (%p2552_p4), %s282_s9, 4294967040 }
  0x46   : > { %2443 = dma.done.wait (%p43_p1), [#allocation5], 512  }
  0x47   : > { %2445 = vsyncadd (%p43_p1), [#allocation5], 4294966784 }
  0x48   : > { %2447 = dma.done.wait (%p43_p1), [#allocation8], 384  }
  0x49   : > { %2449 = vsyncadd (%p43_p1), [#allocation8], 4294966912  ;;  %v2675_v0 = vld [vmem:[#allocation6 + $0x10] sm:$0xff]  ;;  %v2677_v1 = vld [vmem:[#allocation6] sm:$0xff]  ;;  %s2489_s23 = smov 1   ;;  %s2490_s27 = smov 127   ;;  %v355_v8 = vlaneseq }
  0x4a   : > { %455 = vrot.lane.b32.xlu1 %v2675_v0, %s2489_s23  ;;  %451 = vrot.lane.b32.xlu0 %v2677_v1, %s2489_s23  ;;  %v2682_v2 = vld [vmem:[#allocation6 + $0x18] sm:$0xff]  ;;  %v2684_v3 = vld [vmem:[#allocation6 + $0x8] sm:$0xff]  ;;  %v2690_v4 = vld [vmem:[%s2654_s13] sm:$0xff]  ;;  %p333_p1 = scmp.lt.s32.totalorder %s2544_s22, 1  ;;  %v351_v12 = vrot.slane %v2677_v1, 7  ;;  %v402_v14 = vrot.slane %v2677_v1, 1 }
  0x4b   : > { %499 = vrot.lane.b32.xlu2 %v2677_v1, %s2490_s27  ;;  %v2696_v5 = vld [vmem:[%s2654_s13 + $0x10] sm:$0xff]  ;;  %v2699_v6 = vld [vmem:[%s2654_s13 + $0x8] sm:$0xff]  ;;  %v2702_v7 = vld [vmem:[%s2654_s13 + $0x18] sm:$0xff]  ;;  %v2719_v9 = vshrl.u32 %v355_v8, 7  ;;  %v382_v10 = vrot.slane %v2690_v4, 7  ;;  %v354_v13 = vrot.slane %v2682_v2, 7 }
  0x4c   : > { %s4295_s22 = smov (!%p333_p1, %s2544_s22), 1  ;;  %v385_v11 = vrot.slane %v2702_v7, 7  ;;  %v403_v15 = vrot.slane %v2684_v3, 1  ;;  %v432_v16 = vrot.slane %v2699_v6, 1  ;;  %v431_v17 = vrot.slane %v2690_v4, 1 }
  0x4d   : > { %s2121_s7 = sshll.u32 %s4295_s22, 4  ;;  %vm3935_vm0 = vcmp.lt.s32.totalorder %v2719_v9, 7  ;;  %vm3931_vm1 = vcmp.lt.s32.totalorder %v2719_v9, 1  ;;  %vm3929_vm2 = vcmp.gt.f32.partialorder %v2690_v4, 0.0  ;;  %v384_v30 = vrot.slane %v2696_v5, 7 }
  0x4e   : > { %s2712_s28 = scalar_lea.vmem %s3927_s5, %s2121_s7  ;;  %v361_v18 = vsel %vm3931_vm1, %v354_v13, %v351_v12  ;;  %v409_v19 = vsel %vm3935_vm0, %v402_v14, %v403_v15  ;;  %v389_v22 = vsel %vm3931_vm1, %v385_v11, %v382_v10  ;;  %v437_v25 = vsel %vm3935_vm0, %v431_v17, %v432_v16 }
  0x4f   : > { %v362_v20 = vsub.s32 %v361_v18, %v2677_v1  ;;  %v411_v21 = vsub.s32 %v409_v19, %v2677_v1  ;;  %v2755_v27 = vsel %vm3929_vm2, %v2677_v1, 4624   ;;  %vm390_vm5 = vcmp.gt.f32.partialorder %v389_v22, 0.0 }
  0x50   : > { %v353_v31 = vrot.slane %v2675_v0, 7  ;;  %vm439_vm8 = vcmp.gt.f32.partialorder %v437_v25, 0.0  ;;  %v405_v32 = vrot.slane %v2682_v2, 1  ;;  %v434_v33 = vrot.slane %v2702_v7, 1 }
  0x51   : > { %vm366_vm3 = vcmp.lt.s32.totalorder %v362_v20, 0  ;;  %v367_v23 = vsub.s32 0, %v362_v20  ;;  %vm415_vm4 = vcmp.lt.s32.totalorder %v411_v21, 0  ;;  %v416_v24 = vsub.s32 0, %v411_v21 }
  0x52   : > { %457 = vrot.lane.b32.xlu1 %v2682_v2, %s2489_s23  ;;  %453 = vrot.lane.b32.xlu0 %v2684_v3, %s2489_s23  ;;  %v4011_v34 = vmov 0  ;;  %v358_v35 = vsel %vm3931_vm1, %v353_v31, %v354_v13  ;;  %vm3928_vm12 = vcmp.gt.f32.partialorder %v2702_v7, 0.0  ;;  %v410_v37 = vsel %vm3935_vm0, %v405_v32, %v402_v14 }
  0x53   : > { %501 = vrot.lane.b32.xlu2 %v2684_v3, %s2490_s27  ;;  %v368_v28 = vsel %vm366_vm3, %v367_v23, %v362_v20  ;;  %v417_v29 = vsel %vm415_vm4, %v416_v24, %v411_v21  ;;  %v365_v36 = vsub.s32 %v358_v35, %v2682_v2  ;;  %v386_v38 = vsel %vm3931_vm1, %v384_v30, %v385_v11 }
  0x54   : > { %vm378_vm6 = vcmp.eq.s32.totalorder %v368_v28, 136  ;;  %vm427_vm7 = vcmp.eq.s32.totalorder %v417_v29, 136  ;;  %v4013_v39 = vmov 0  ;;  %v414_v40 = vsub.s32 %v410_v37, %v2682_v2 }
  0x55   : > { %vm394_vm9 = vmand %vm378_vm6, %vm3929_vm2  ;;  %v2785_v41 = vsel %vm3928_vm12, %v2682_v2, 4624   ;;  %vm375_vm14 = vcmp.lt.s32.totalorder %v365_v36, 0  ;;  %v376_v42 = vsub.s32 0, %v365_v36  ;;  %v438_v43 = vsel %vm3935_vm0, %v434_v33, %v431_v17 }
  0x56   : > { %vm2763_vm10 = vmand %vm394_vm9, %vm390_vm5  ;;  %vm424_vm15 = vcmp.lt.s32.totalorder %v414_v40, 0  ;;  %v425_v44 = vsub.s32 0, %v414_v40  ;;  %vm393_vm3 = vcmp.gt.f32.partialorder %v386_v38, 0.0  ;;  %v383_v46 = vrot.slane %v2699_v6, 7 }
  0x57   : > { %v4012_v34 = vsel %vm2763_vm10, 4294967295, %v4011_v34  ;;  %vm443_vm11 = vmand %vm427_vm7, %vm3929_vm2  ;;  %v377_v45 = vsel %vm375_vm14, %v376_v42, %v365_v36  ;;  %v352_v49 = vrot.slane %v2684_v3, 7  ;;  %vm442_vm5 = vcmp.gt.f32.partialorder %v438_v43, 0.0 }
  0x58   : > { %vm2777_vm13 = vmand %vm443_vm11, %vm439_vm8  ;;  %vm381_vm4 = vcmp.eq.s32.totalorder %v377_v45, 136  ;;  %v426_v48 = vsel %vm424_vm15, %v425_v44, %v414_v40  ;;  %v433_v50 = vrot.slane %v2696_v5, 1  ;;  %v4015_v51 = vmov 0 }
  0x59   : > { %v4014_v39 = vsel %vm2777_vm13, 4294967295, %v4013_v39  ;;  %vm397_vm6 = vmand %vm381_vm4, %vm3928_vm12  ;;  %vm430_vm7 = vcmp.eq.s32.totalorder %v426_v48, 136  ;;  %v359_v52 = vsel %vm3931_vm1, %v352_v49, %v353_v31  ;;  %v404_v53 = vrot.slane %v2675_v0, 1 }
  0x5a   : > { %505 = vrot.lane.b32.xlu1 %v2682_v2, %s2490_s27  ;;  %503 = vrot.lane.b32.xlu0 %v2675_v0, %s2490_s27  ;;  %vm2796_vm8 = vmand %vm397_vm6, %vm393_vm3  ;;  %vm3932_vm11 = vcmp.gt.f32.partialorder %v2696_v5, 0.0  ;;  %v364_v54 = vsub.s32 %v359_v52, %v2675_v0  ;;  %v4017_v55 = vmov 0  ;;  %v387_v56 = vsel %vm3931_vm1, %v383_v46, %v384_v30 }
  0x5b   : > { %479 = vrot.lane.b32.xlu2 %v2690_v4, %s2489_s23  ;;  %v4016_v51 = vsel %vm2796_vm8, 4294967295, %v4015_v51  ;;  %vm446_vm9 = vmand %vm430_vm7, %vm3928_vm12  ;;  %v407_v57 = vsel %vm3935_vm0, %v404_v53, %v405_v32  ;;  %v2818_v58 = vsel %vm3932_vm11, %v2675_v0, 4624   ;;  %v435_v61 = vsel %vm3935_vm0, %v433_v50, %v434_v33 }
  0x5c   : > { %vm2807_vm14 = vmand %vm446_vm9, %vm442_vm5  ;;  %vm372_vm15 = vcmp.lt.s32.totalorder %v364_v54, 0  ;;  %v373_v59 = vsub.s32 0, %v364_v54  ;;  %v413_v60 = vsub.s32 %v407_v57, %v2675_v0  ;;  %vm3930_vm3 = vcmp.gt.f32.partialorder %v2699_v6, 0.0 }
  0x5d   : > { %v4018_v55 = vsel %vm2807_vm14, 4294967295, %v4017_v55  ;;  %vm392_vm4 = vcmp.gt.f32.partialorder %v387_v56, 0.0  ;;  %v360_v11 = vsel %vm3931_vm1, %v351_v12, %v352_v49  ;;  %v408_v13 = vsel %vm3935_vm0, %v403_v15, %v404_v53 }
  0x5e   : > { %v374_v62 = vsel %vm372_vm15, %v373_v59, %v364_v54  ;;  %vm421_vm5 = vcmp.lt.s32.totalorder %v413_v60, 0  ;;  %v422_v63 = vsub.s32 0, %v413_v60  ;;  %v2835_v14 = vsel %vm3930_vm3, %v2684_v3, 4624  }
  0x5f   : > { %vm380_vm6 = vcmp.eq.s32.totalorder %v374_v62, 136  ;;  %vm441_vm9 = vcmp.gt.f32.partialorder %v435_v61, 0.0  ;;  %v363_v18 = vsub.s32 %v360_v11, %v2684_v3  ;;  %v412_v19 = vsub.s32 %v408_v13, %v2684_v3 }
  0x60   : > { %vm396_vm7 = vmand %vm380_vm6, %vm3932_vm11  ;;  %v423_v17 = vsel %vm421_vm5, %v422_v63, %v413_v60  ;;  %v388_v12 = vsel %vm3931_vm1, %v382_v10, %v383_v46  ;;  %v4019_v20 = vmov 0  ;;  %v436_v23 = vsel %vm3935_vm0, %v432_v16, %v433_v50 }
  0x61   : > { %vm2845_vm15 = vmand %vm396_vm7, %vm392_vm4  ;;  %vm429_vm12 = vcmp.eq.s32.totalorder %v423_v17, 136  ;;  %vm369_vm5 = vcmp.lt.s32.totalorder %v363_v18, 0  ;;  %v370_v21 = vsub.s32 0, %v363_v18  ;;  %vm418_vm2 = vcmp.lt.s32.totalorder %v412_v19, 0 }
  0x62   : > { %483 = vrot.lane.b32.xlu1 %v2696_v5, %s2489_s23  ;;  %481 = vrot.lane.b32.xlu0 %v2699_v6, %s2489_s23  ;;  %v4020_v20 = vsel %vm2845_vm15, 4294967295, %v4019_v20  ;;  %vm445_vm6 = vmand %vm429_vm12, %vm3932_vm11  ;;  %v419_v22 = vsub.s32 0, %v412_v19  ;;  %v4021_v10 = vmov 0  ;;  %vm391_vm4 = vcmp.gt.f32.partialorder %v388_v12, 0.0 }
  0x63   : > { %485 = vrot.lane.b32.xlu2 %v2702_v7, %s2489_s23  ;;  %vm2855_vm3 = vmand %vm445_vm6, %vm441_vm9  ;;  %v371_v28 = vsel %vm369_vm5, %v370_v21, %v363_v18  ;;  %vm440_vm1 = vcmp.gt.f32.partialorder %v436_v23, 0.0  ;;  %vm4023_vm11 = vcmp.gt.f32.partialorder %v2699_v6, 0.0  ;;  %v4024_v16 = vmov 0 }
  0x64   : > { %v4022_v10 = vsel %vm2855_vm3, 4294967295, %v4021_v10  ;;  %v420_v29 = vsel %vm418_vm2, %v419_v22, %v412_v19  ;;  %vm379_vm12 = vcmp.eq.s32.totalorder %v371_v28, 136  ;;  %vm4026_vm9 = vmmov %vm4023_vm11  ;;  %v4027_v33 = vmov 0 }
  0x65   : > { %vm428_vm7 = vcmp.eq.s32.totalorder %v420_v29, 136  ;;  %vm395_vm14 = vmand %vm379_vm12, %vm4023_vm11  ;;  %vm4029_vm15 = vcmp.gt.f32.partialorder %v2690_v4, 0.0  ;;  %v4030_v37 = vmov 0  ;;  %v4033_v49 = vmov 0 }
  0x66   : > { %vm2862_vm0 = vmand %vm395_vm14, %vm391_vm4  ;;  %v4040_v17 = vmov 0  ;;  %v4042_v12 = vmov 0 }
  0x67   : > { %v4025_v16 = vsel %vm2862_vm0, 4294967295, %v4024_v16  ;;  %vm444_vm6 = vmand %vm428_vm7, %vm4026_vm9 }
  0x68   : > { %vm2868_vm2 = vmand %vm444_vm6, %vm440_vm1 }
  0x69   : > { %v4028_v33 = vsel %vm2868_vm2, 4294967295, %v4027_v33 }
  0x6a   : > { %529 = vrot.lane.b32.xlu1 %v2699_v6, %s2490_s27  ;;  %527 = vrot.lane.b32.xlu0 %v2690_v4, %s2490_s27 }
  0x6b   : > { %531 = vrot.lane.b32.xlu2 %v2696_v5, %s2490_s27 }
  0x72   : > { %533 = vrot.lane.b32.xlu0 %v2702_v7, %s2490_s27 }
  0xa5   : > { %v2750_v26 = vpop.permute.xlu2 %499 }
  0xa6   : > { %v507_v56 = vsub.s32 %v2750_v26, %v2677_v1  ;;  %v4037_v26 = vmov 0 }
  0xa8   : > { %v512_v63 = vsub.s32 0, %v507_v56 }
  0xad   : > { %v2790_v47 = vpop.permute.xlu2 %501 }
  0xae   : > { %v508_v57 = vsub.s32 %v2790_v47, %v2684_v3 }
  0xb0   : > { %v515_v11 = vsub.s32 0, %v508_v57 }
  0xb5   : > { %v480_v15 = vpop.permute.xlu2 %479 }
  0xb6   : > { %vm487_vm5 = vcmp.gt.f32.partialorder %v480_v15, 0.0 }
  0xbc   : > { %v456_v24 = vpop.permute.xlu1 %455  ;;  %v452_v25 = vpop.permute.xlu0 %451 }
  0xbd   : > { %v459_v30 = vsub.s32 %v452_v25, %v2677_v1  ;;  %v486_v35 = vpop.permute.xlu2 %485  ;;  %v461_v36 = vsub.s32 %v456_v24, %v2675_v0  ;;  %v4046_v24 = vmov 0  ;;  %v4048_v25 = vmov 0 }
  0xbe   : > { %vm490_vm14 = vcmp.gt.f32.partialorder %v486_v35, 0.0 }
  0xbf   : > { %vm463_vm8 = vcmp.lt.s32.totalorder %v459_v30, 0  ;;  %v464_v31 = vsub.s32 0, %v459_v30  ;;  %v470_v45 = vsub.s32 0, %v461_v36  ;;  %vm469_vm1 = vcmp.lt.s32.totalorder %v461_v36, 0 }
  0xc1   : > { %v465_v32 = vsel %vm463_vm8, %v464_v31, %v459_v30  ;;  %v471_v53 = vsel %vm469_vm1, %v470_v45, %v461_v36  ;;  %v4051_v30 = vmov 0 }
  0xc2   : > { %vm475_vm3 = vcmp.eq.s32.totalorder %v465_v32, 1  ;;  %vm477_vm9 = vcmp.eq.s32.totalorder %v471_v53, 1 }
  0xc3   : > { %vm491_vm13 = vmand %vm475_vm3, %vm4029_vm15  ;;  %vm4032_vm15 = vcmp.gt.f32.partialorder %v2702_v7, 0.0 }
  0xc4   : > { %vm2875_vm11 = vmand %vm491_vm13, %vm487_vm5  ;;  %v458_v38 = vpop.permute.xlu1 %457  ;;  %v454_v40 = vpop.permute.xlu0 %453 }
  0xc5   : > { %v4031_v37 = vsel %vm2875_vm11, 4294967295, %v4030_v37  ;;  %v462_v42 = vsub.s32 %v458_v38, %v2682_v2  ;;  %v460_v44 = vsub.s32 %v454_v40, %v2684_v3  ;;  %v532_v59 = vpop.permute.xlu2 %531  ;;  %vm4039_vm11 = vcmp.gt.f32.partialorder %v2699_v6, 0.0 }
  0xc6   : > { %vm537_vm6 = vcmp.gt.f32.partialorder %v532_v59, 0.0 }
  0xc7   : > { %vm472_vm8 = vcmp.lt.s32.totalorder %v462_v42, 0  ;;  %v473_v43 = vsub.s32 0, %v462_v42  ;;  %v467_v48 = vsub.s32 0, %v460_v44  ;;  %vm466_vm4 = vcmp.lt.s32.totalorder %v460_v44, 0 }
  0xc9   : > { %v474_v46 = vsel %vm472_vm8, %v473_v43, %v462_v42  ;;  %v468_v61 = vsel %vm466_vm4, %v467_v48, %v460_v44  ;;  %vm4035_vm8 = vcmp.gt.f32.partialorder %v2696_v5, 0.0 }
  0xca   : > { %vm478_vm3 = vcmp.eq.s32.totalorder %v474_v46, 1  ;;  %vm493_vm1 = vmand %vm477_vm9, %vm4035_vm8 }
  0xcb   : > { %vm494_vm13 = vmand %vm478_vm3, %vm4032_vm15  ;;  %vm511_vm3 = vcmp.lt.s32.totalorder %v507_v56, 0 }
  0xcc   : > { %vm2883_vm12 = vmand %vm494_vm13, %vm490_vm14  ;;  %v506_v50 = vpop.permute.xlu1 %505  ;;  %v504_v52 = vpop.permute.xlu0 %503  ;;  %vm476_vm14 = vcmp.eq.s32.totalorder %v468_v61, 1  ;;  %v513_v18 = vsel %vm511_vm3, %v512_v63, %v507_v56 }
  0xcd   : > { %v4034_v49 = vsel %vm2883_vm12, 4294967295, %v4033_v49  ;;  %v509_v54 = vsub.s32 %v504_v52, %v2675_v0  ;;  %vm4036_vm15 = vmmov %vm4035_vm8  ;;  %vm514_vm12 = vcmp.lt.s32.totalorder %v508_v57, 0  ;;  %v510_v19 = vsub.s32 %v506_v50, %v2682_v2 }
  0xce   : > { %vm492_vm0 = vmand %vm476_vm14, %vm4039_vm11  ;;  %v516_v15 = vsel %vm514_vm12, %v515_v11, %v508_v57  ;;  %vm4044_vm11 = vcmp.gt.f32.partialorder %v2690_v4, 0.0 }
  0xcf   : > { %vm517_vm7 = vcmp.lt.s32.totalorder %v509_v54, 0  ;;  %v518_v60 = vsub.s32 0, %v509_v54  ;;  %v521_v21 = vsub.s32 0, %v510_v19  ;;  %vm520_vm8 = vcmp.lt.s32.totalorder %v510_v19, 0 }
  0xd1   : > { %v519_v62 = vsel %vm517_vm7, %v518_v60, %v509_v54  ;;  %v522_v28 = vsel %vm520_vm8, %v521_v21, %v510_v19 }
  0xd2   : > { %vm525_vm5 = vcmp.eq.s32.totalorder %v519_v62, 1  ;;  %vm526_vm12 = vcmp.eq.s32.totalorder %v522_v28, 1 }
  0xd3   : > { %vm541_vm13 = vmand %vm525_vm5, %vm4036_vm15  ;;  %vm524_vm5 = vcmp.eq.s32.totalorder %v516_v15, 1  ;;  %vm4045_vm15 = vcmp.gt.f32.partialorder %v2699_v6, 0.0 }
  0xd4   : > { %vm2896_vm2 = vmand %vm541_vm13, %vm537_vm6  ;;  %v484_v47 = vpop.permute.xlu1 %483  ;;  %v482_v13 = vpop.permute.xlu0 %481  ;;  %vm523_vm6 = vcmp.eq.s32.totalorder %v513_v18, 1 }
  0xd5   : > { %v4038_v26 = vsel %vm2896_vm2, 4294967295, %v4037_v26  ;;  %vm489_vm4 = vcmp.gt.f32.partialorder %v484_v47, 0.0  ;;  %vm488_vm7 = vcmp.gt.f32.partialorder %v482_v13, 0.0  ;;  %vm540_vm3 = vmand %vm524_vm5, %vm4045_vm15 }
  0xd6   : > { %vm2902_vm10 = vmand %vm493_vm1, %vm489_vm4 }
  0xd7   : > { %v4041_v17 = vsel %vm2902_vm10, 4294967295, %v4040_v17  ;;  %vm2907_vm9 = vmand %vm492_vm0, %vm488_vm7  ;;  %vm4050_vm7 = vcmp.gt.f32.partialorder %v2702_v7, 0.0 }
  0xd8   : > { %v4043_v12 = vsel %vm2907_vm9, 4294967295, %v4042_v12  ;;  %vm539_vm1 = vmand %vm523_vm6, %vm4044_vm11 }
  0xd9   : > { %vm542_vm2 = vmand %vm526_vm12, %vm4050_vm7 }
  0xdc   : > { %v530_v22 = vpop.permute.xlu1 %529  ;;  %v528_v23 = vpop.permute.xlu0 %527 }
  0xdd   : > { %vm536_vm14 = vcmp.gt.f32.partialorder %v530_v22, 0.0  ;;  %vm535_vm13 = vcmp.gt.f32.partialorder %v528_v23, 0.0 }
  0xde   : > { %vm2915_vm4 = vmand %vm540_vm3, %vm536_vm14 }
  0xdf   : > { %v4047_v24 = vsel %vm2915_vm4, 4294967295, %v4046_v24  ;;  %vm2919_vm0 = vmand %vm539_vm1, %vm535_vm13 }
  0xe0   : > { %v4049_v25 = vsel %vm2919_vm0, 4294967295, %v4048_v25 }
  0xe4   : > { %v534_v29 = vpop.permute.xlu0 %533 }
  0xe5   : > { %vm538_vm6 = vcmp.gt.f32.partialorder %v534_v29, 0.0 }
  0xe6   : > { %vm2925_vm11 = vmand %vm542_vm2, %vm538_vm6 }
  0xe7   : > { %v4052_v30 = vsel %vm2925_vm11, 4294967295, %v4051_v30 }
  0xe8 LB: >> { %s2491_s22 = smov 1   ;;  %s2492_s8 = smov 127   ;;  %v561_v31 = vrot.slane %v2480_v27, 7  ;;  %v564_v32 = vrot.slane %v2468_v41, 7  ;;  %vm4053_vm2 = vcmp.lt.s32.totalorder %v2719_v9, 1  ;;  %vm4054_vm5 = vnez %v4012_v34  ;;  %v2480_v27 = vphi %v2755_v27, %v4285_v27   ;;  %v2476_v14 = vphi %v2835_v14, %v4284_v14   ;;  %v2472_v58 = vphi %v2818_v58, %v4283_v58   ;;  %v2468_v41 = vphi %v2785_v41, %v4282_v41  }
  0xe9   : >> { %601 = vrot.lane.b32.xlu0 %v2480_v27, %s2491_s22  ;;  %605 = vrot.lane.b32.xlu1 %v2472_v58, %s2491_s22  ;;  %v581_v38 = vrot.slane %v2480_v27, 1  ;;  %v582_v40 = vrot.slane %v2476_v14, 1  ;;  %v562_v42 = vrot.slane %v2476_v14, 7  ;;  %v563_v43 = vrot.slane %v2472_v58, 7  ;;  %vm4056_vm14 = vmmov %vm4053_vm2 }
  0xea   : >> { %621 = vrot.lane.b32.xlu2 %v2480_v27, %s2492_s8  ;;  %v568_v35 = vsel %vm4053_vm2, %v564_v32, %v561_v31  ;;  %vm4055_vm1 = vcmp.lt.s32.totalorder %v2719_v9, 7  ;;  %vm4057_vm15 = vnez %v4014_v39  ;;  %vm4058_vm3 = vmmov %vm4053_vm2  ;;  %v584_v52 = vrot.slane %v2468_v41, 1 }
  0xeb   : >> { %v569_v36 = vsel %vm4054_vm5, %v568_v35, 4624  ;;  %v587_v44 = vsel %vm4055_vm1, %v581_v38, %v582_v40  ;;  %v567_v46 = vsel %vm4056_vm14, %v561_v31, %v562_v42  ;;  %v566_v50 = vsel %vm4058_vm3, %v562_v42, %v563_v43  ;;  %vm4059_vm13 = vmmov %vm4053_vm2 }
  0xec   : >> { %vm573_vm8 = vcmp.lt.s32.totalorder %v2480_v27, %v569_v36  ;;  %v589_v48 = vsel %vm4057_vm15, %v587_v44, 4624  ;;  %v565_v53 = vsel %vm4059_vm13, %v563_v43, %v564_v32  ;;  %v583_v54 = vrot.slane %v2472_v58, 1 }
  0xed   : >> { %v574_v45 = vsel %vm573_vm8, %v2480_v27, %v569_v36  ;;  %vm4060_vm12 = vnez %v4025_v16  ;;  %vm4061_vm6 = vnez %v4020_v20  ;;  %vm4062_vm2 = vnez %v4016_v51  ;;  %vm4063_vm8 = vmmov %vm4055_vm1 }
  0xee   : >> { %v570_v56 = vsel %vm4060_vm12, %v567_v46, 4624  ;;  %vm593_vm7 = vcmp.lt.s32.totalorder %v574_v45, %v589_v48  ;;  %v571_v57 = vsel %vm4061_vm6, %v566_v50, 4624  ;;  %v572_v60 = vsel %vm4062_vm2, %v565_v53, 4624  ;;  %vm4064_vm14 = vmmov %vm4063_vm8 }
  0xef   : >> { %v585_v61 = vsel %vm4063_vm8, %v583_v54, %v584_v52  ;;  %vm575_vm1 = vcmp.lt.s32.totalorder %v2476_v14, %v570_v56  ;;  %v586_v62 = vsel %vm4064_vm14, %v582_v40, %v583_v54  ;;  %v594_v63 = vsel %vm593_vm7, %v574_v45, %v589_v48  ;;  %vm4065_vm5 = vmmov %vm4063_vm8 }
  0xf0   : >> { %vm577_vm3 = vcmp.lt.s32.totalorder %v2472_v58, %v571_v57  ;;  %vm579_vm13 = vcmp.lt.s32.totalorder %v2468_v41, %v572_v60  ;;  %v588_v11 = vsel %vm4065_vm5, %v584_v52, %v581_v38  ;;  %vm4066_vm6 = vnez %v4022_v10 }
  0xf1   : >> { %603 = vrot.lane.b32.xlu0 %v2476_v14, %s2491_s22  ;;  %607 = vrot.lane.b32.xlu1 %v2468_v41, %s2491_s22  ;;  %v591_v18 = vsel %vm4066_vm6, %v585_v61, 4624  ;;  %vm4067_vm8 = vnez %v4031_v37  ;;  %vm4068_vm0 = vnez %v4049_v25  ;;  %v576_v21 = vsel %vm575_vm1, %v2476_v14, %v570_v56 }
  0xf2   : >> { %623 = vrot.lane.b32.xlu2 %v2476_v14, %s2492_s8  ;;  %vm4069_vm7 = vnez %v4028_v33  ;;  %v578_v23 = vsel %vm577_vm3, %v2472_v58, %v571_v57  ;;  %v580_v28 = vsel %vm579_vm13, %v2468_v41, %v572_v60  ;;  %vm4070_vm5 = vnez %v4018_v55 }
  0xf3   : >> { %v590_v22 = vsel %vm4069_vm7, %v586_v62, 4624  ;;  %v592_v29 = vsel %vm4070_vm5, %v588_v11, 4624  ;;  %vm4071_vm10 = vnez %v4041_v17  ;;  %vm4072_vm9 = vnez %v4043_v12 }
  0xf4   : >> { %vm595_vm2 = vcmp.lt.s32.totalorder %v576_v21, %v590_v22  ;;  %vm599_vm15 = vcmp.lt.s32.totalorder %v580_v28, %v592_v29  ;;  %vm4073_vm1 = vnez %v4034_v49  ;;  %vm4074_vm4 = vnez %v4047_v24 }
  0xf5   : >> { %v596_v36 = vsel %vm595_vm2, %v576_v21, %v590_v22  ;;  %v600_v43 = vsel %vm599_vm15, %v580_v28, %v592_v29  ;;  %vm4075_vm15 = vcmp.lt.s32.totalorder %v2719_v9, 7  ;;  %vm4078_vm11 = vnez %v4052_v30 }
  0xf9   : >> { %625 = vrot.lane.b32.xlu0 %v2472_v58, %s2492_s8  ;;  %627 = vrot.lane.b32.xlu1 %v2468_v41, %s2492_s8 }
 0x144   : >> { %v622_v59 = vpop.permute.xlu2 %621 }
 0x145   : >> { %v629_v15 = vsel %vm4068_vm0, %v622_v59, 4624 }
 0x14c   : >> { %v624_v35 = vpop.permute.xlu2 %623 }
 0x14d   : >> { %v630_v48 = vsel %vm4074_vm4, %v624_v35, 4624 }
 0x15b   : >> { %v602_v47 = vpop.permute.xlu0 %601  ;;  %v606_v13 = vpop.permute.xlu1 %605 }
 0x15c   : >> { %v609_v19 = vsel %vm4067_vm8, %v602_v47, 4624  ;;  %vm597_vm8 = vcmp.lt.s32.totalorder %v578_v23, %v591_v18  ;;  %v611_v44 = vsel %vm4071_vm10, %v606_v13, 4624 }
 0x15d   : >> { %vm613_vm14 = vcmp.lt.s32.totalorder %v594_v63, %v609_v19  ;;  %v598_v38 = vsel %vm597_vm8, %v578_v23, %v591_v18  ;;  %vm4076_vm8 = vcmp.lt.s32.totalorder %v2719_v9, 1 }
 0x15e   : >> { %v614_v31 = vsel %vm613_vm14, %v594_v63, %v609_v19  ;;  %vm617_vm3 = vcmp.lt.s32.totalorder %v598_v38, %v611_v44  ;;  %vm4077_vm14 = vnez %v4038_v26 }
 0x15f   : >> { %vm633_vm6 = vcmp.lt.s32.totalorder %v614_v31, %v629_v15  ;;  %v618_v59 = vsel %vm617_vm3, %v598_v38, %v611_v44 }
 0x160   : >> { %v634_v32 = vsel %vm633_vm6, %v614_v31, %v629_v15 }
 0x161   : >> { %681 = vrot.lane.b32.xlu2 %v634_v32, %s2491_s22  ;;  %v641_v54 = vrot.slane %v634_v32, 7  ;;  %v661_v56 = vrot.slane %v634_v32, 1 }
 0x163   : >> { %v604_v40 = vpop.permute.xlu0 %603  ;;  %v608_v42 = vpop.permute.xlu1 %607 }
 0x164   : >> { %v610_v45 = vsel %vm4072_vm9, %v604_v40, 4624  ;;  %v612_v46 = vsel %vm4073_vm1, %v608_v42, 4624 }
 0x165   : >> { %vm615_vm6 = vcmp.lt.s32.totalorder %v596_v36, %v610_v45  ;;  %vm619_vm2 = vcmp.lt.s32.totalorder %v600_v43, %v612_v46 }
 0x166   : >> { %v616_v50 = vsel %vm615_vm6, %v596_v36, %v610_v45  ;;  %v620_v60 = vsel %vm619_vm2, %v600_v43, %v612_v46 }
 0x167   : >> { %vm635_vm13 = vcmp.lt.s32.totalorder %v616_v50, %v630_v48 }
 0x168   : >> { %v636_v52 = vsel %vm635_vm13, %v616_v50, %v630_v48  ;;  %vm4079_vm13 = vnez %v4014_v39 }
 0x169   : >> { %683 = vrot.lane.b32.xlu0 %v636_v52, %s2491_s22  ;;  %v662_v53 = vrot.slane %v636_v52, 1  ;;  %v642_v57 = vrot.slane %v636_v52, 7 }
 0x16b   : >> { %v626_v61 = vpop.permute.xlu0 %625  ;;  %v628_v62 = vpop.permute.xlu1 %627  ;;  %v667_v63 = vsel %vm4075_vm15, %v661_v56, %v662_v53  ;;  %v647_v11 = vsel %vm4076_vm8, %v641_v54, %v642_v57  ;;  %vm4080_vm15 = vmmov %vm4076_vm8 }
 0x16c   : >> { %v631_v47 = vsel %vm4077_vm14, %v626_v61, 4624  ;;  %v632_v13 = vsel %vm4078_vm11, %v628_v62, 4624  ;;  %v650_v18 = vsel %vm4060_vm12, %v647_v11, 4624  ;;  %v669_v31 = vsel %vm4079_vm13, %v667_v63, 4624 }
 0x16d   : >> { %vm637_vm6 = vcmp.lt.s32.totalorder %v618_v59, %v631_v47  ;;  %vm639_vm3 = vcmp.lt.s32.totalorder %v620_v60, %v632_v13  ;;  %vm655_vm2 = vcmp.lt.s32.totalorder %v636_v52, %v650_v18  ;;  %vm4084_vm12 = vnez %v4016_v51 }
 0x16e   : >> { %v638_v19 = vsel %vm637_vm6, %v618_v59, %v631_v47  ;;  %v640_v15 = vsel %vm639_vm3, %v620_v60, %v632_v13  ;;  %v656_v21 = vsel %vm655_vm2, %v636_v52, %v650_v18  ;;  %vm4081_vm6 = vcmp.lt.s32.totalorder %v2719_v9, 7 }
 0x16f   : >> { %685 = vrot.lane.b32.xlu1 %v638_v19, %s2491_s22  ;;  %687 = vrot.lane.b32.xlu2 %v640_v15, %s2491_s22  ;;  %v644_v22 = vrot.slane %v640_v15, 7  ;;  %v643_v23 = vrot.slane %v638_v19, 7  ;;  %v664_v28 = vrot.slane %v640_v15, 1  ;;  %v663_v29 = vrot.slane %v638_v19, 1  ;;  %vm4082_vm3 = vmmov %vm4081_vm6 }
 0x170   : >> { %vm4083_vm2 = vnez %v4012_v34 }
 0x171   : >> { %701 = vrot.lane.b32.xlu0 %v634_v32, %s2492_s8  ;;  %v648_v35 = vsel %vm4080_vm15, %v644_v22, %v641_v54  ;;  %v645_v36 = vsel %vm4076_vm8, %v643_v23, %v644_v22  ;;  %v668_v38 = vsel %vm4081_vm6, %v664_v28, %v661_v56  ;;  %v666_v40 = vsel %vm4082_vm3, %v662_v53, %v663_v29 }
 0x172   : >> { %v649_v42 = vsel %vm4083_vm2, %v648_v35, 4624  ;;  %v652_v43 = vsel %vm4084_vm12, %v645_v36, 4624  ;;  %v672_v44 = vsel %vm4070_vm5, %v668_v38, 4624  ;;  %v670_v45 = vsel %vm4069_vm7, %v666_v40, 4624 }
 0x173   : >> { %vm653_vm15 = vcmp.lt.s32.totalorder %v634_v32, %v649_v42  ;;  %vm659_vm8 = vcmp.lt.s32.totalorder %v640_v15, %v652_v43  ;;  %vm675_vm13 = vcmp.lt.s32.totalorder %v656_v21, %v670_v45  ;;  %vm4085_vm6 = vcmp.lt.s32.totalorder %v2719_v9, 1 }
 0x174   : >> { %v646_v46 = vsel %vm4085_vm6, %v642_v57, %v643_v23  ;;  %v654_v48 = vsel %vm653_vm15, %v634_v32, %v649_v42  ;;  %v660_v50 = vsel %vm659_vm8, %v640_v15, %v652_v43  ;;  %v676_v53 = vsel %vm675_vm13, %v656_v21, %v670_v45 }
 0x175   : >> { %vm4086_vm3 = vnez %v4020_v20  ;;  %vm673_vm2 = vcmp.lt.s32.totalorder %v654_v48, %v669_v31  ;;  %vm679_vm12 = vcmp.lt.s32.totalorder %v660_v50, %v672_v44  ;;  %vm4087_vm5 = vcmp.lt.s32.totalorder %v2719_v9, 7 }
 0x176   : >> { %v651_v54 = vsel %vm4086_vm3, %v646_v46, 4624  ;;  %v665_v56 = vsel %vm4087_vm5, %v663_v29, %v664_v28  ;;  %v674_v59 = vsel %vm673_vm2, %v654_v48, %v669_v31  ;;  %v680_v60 = vsel %vm679_vm12, %v660_v50, %v672_v44 }
 0x177   : >> { %vm657_vm11 = vcmp.lt.s32.totalorder %v638_v19, %v651_v54  ;;  %vm4088_vm7 = vnez %v4022_v10  ;;  %703 = vrot.lane.b32.xlu1 %v636_v52, %s2492_s8  ;;  %705 = vrot.lane.b32.xlu2 %v638_v19, %s2492_s8  ;;  %vm4089_vm15 = vnez %v4031_v37 }
 0x178   : >> { %v658_v61 = vsel %vm657_vm11, %v638_v19, %v651_v54  ;;  %v671_v62 = vsel %vm4088_vm7, %v665_v56, 4624 }
 0x179   : >> { %vm677_vm13 = vcmp.lt.s32.totalorder %v658_v61, %v671_v62  ;;  %707 = vrot.lane.b32.xlu0 %v640_v15, %s2492_s8 }
 0x17a   : >> { %v678_v32 = vsel %vm677_vm13, %v658_v61, %v671_v62 }
 0x1bb   : >> { %v682_v57 = vpop.permute.xlu2 %681 }
 0x1bc   : >> { %v689_v47 = vsel %vm4089_vm15, %v682_v57, 4624 }
 0x1bd   : >> { %vm693_vm5 = vcmp.lt.s32.totalorder %v674_v59, %v689_v47 }
 0x1be   : >> { %v694_v22 = vsel %vm693_vm5, %v674_v59, %v689_v47  ;;  %vm4090_vm5 = vnez %v4052_v30 }
 0x1c9   : >> { %v688_v63 = vpop.permute.xlu2 %687 }
 0x1ca   : >> { %v692_v29 = vsel %vm4073_vm1, %v688_v63, 4624 }
 0x1cb   : >> { %vm699_vm6 = vcmp.lt.s32.totalorder %v680_v60, %v692_v29 }
 0x1cc   : >> { %v700_v43 = vsel %vm699_vm6, %v680_v60, %v692_v29  ;;  %vm4094_vm6 = vnez %v4025_v16 }
 0x1d1   : >> { %v706_v13 = vpop.permute.xlu2 %705 }
 0x1d2   : >> { %v711_v19 = vsel %vm4077_vm14, %v706_v13, 4624 }
 0x1db   : >> { %v684_v11 = vpop.permute.xlu0 %683 }
 0x1dc   : >> { %v690_v15 = vsel %vm4072_vm9, %v684_v11, 4624 }
 0x1dd   : >> { %vm695_vm8 = vcmp.lt.s32.totalorder %v676_v53, %v690_v15 }
 0x1de   : >> { %v696_v38 = vsel %vm695_vm8, %v676_v53, %v690_v15 }
 0x1e1   : >> { %v686_v18 = vpop.permute.xlu1 %685 }
 0x1e2   : >> { %v691_v21 = vsel %vm4071_vm10, %v686_v18, 4624 }
 0x1e3   : >> { %vm697_vm11 = vcmp.lt.s32.totalorder %v678_v32, %v691_v21  ;;  %v702_v52 = vpop.permute.xlu0 %701 }
 0x1e4   : >> { %v698_v23 = vsel %vm697_vm11, %v678_v32, %v691_v21  ;;  %v709_v28 = vsel %vm4068_vm0, %v702_v52, 4624 }
 0x1e5   : >> { %vm717_vm12 = vcmp.lt.s32.totalorder %v698_v23, %v711_v19  ;;  %vm713_vm2 = vcmp.lt.s32.totalorder %v694_v22, %v709_v28 }
 0x1e6   : >> { %v718_v31 = vsel %vm717_vm12, %v698_v23, %v711_v19  ;;  %v714_v35 = vsel %vm713_vm2, %v694_v22, %v709_v28  ;;  %vm4091_vm12 = vcmp.lt.s32.totalorder %v2719_v9, 1  ;;  %vm4092_vm2 = vcmp.lt.s32.totalorder %v2719_v9, 7 }
 0x1e7   : >> { %765 = vrot.lane.b32.xlu0 %v718_v31, %s2491_s22  ;;  %761 = vrot.lane.b32.xlu1 %v714_v35, %s2491_s22  ;;  %v721_v46 = vrot.slane %v714_v35, 7  ;;  %v743_v48 = vrot.slane %v718_v31, 1  ;;  %v723_v56 = vrot.slane %v718_v31, 7  ;;  %v741_v53 = vrot.slane %v714_v35, 1  ;;  %vm4093_vm8 = vmmov %vm4091_vm12 }
 0x1e9   : >> { %v704_v36 = vpop.permute.xlu1 %703 }
 0x1ea   : >> { %v710_v40 = vsel %vm4074_vm4, %v704_v36, 4624 }
 0x1eb   : >> { %vm715_vm13 = vcmp.lt.s32.totalorder %v696_v38, %v710_v40  ;;  %v708_v42 = vpop.permute.xlu0 %707 }
 0x1ec   : >> { %v716_v44 = vsel %vm715_vm13, %v696_v38, %v710_v40  ;;  %v712_v45 = vsel %vm4090_vm5, %v708_v42, 4624  ;;  %vm4095_vm13 = vnez %v4028_v33 }
 0x1ed   : >> { %vm719_vm11 = vcmp.lt.s32.totalorder %v700_v43, %v712_v45  ;;  %763 = vrot.lane.b32.xlu2 %v716_v44, %s2491_s22  ;;  %v722_v50 = vrot.slane %v716_v44, 7  ;;  %v742_v54 = vrot.slane %v716_v44, 1 }
 0x1ee   : >> { %v720_v59 = vsel %vm719_vm11, %v700_v43, %v712_v45 }
 0x1ef   : >> { %783 = vrot.lane.b32.xlu0 %v716_v44, %s2492_s8  ;;  %767 = vrot.lane.b32.xlu1 %v720_v59, %s2491_s22  ;;  %v727_v60 = vsel %vm4091_vm12, %v721_v46, %v722_v50  ;;  %v746_v61 = vsel %vm4092_vm2, %v742_v54, %v743_v48  ;;  %v726_v62 = vsel %vm4093_vm8, %v722_v50, %v723_v56  ;;  %v744_v32 = vrot.slane %v720_v59, 1  ;;  %vm4096_vm12 = vmmov %vm4092_vm2 }
 0x1f0   : >> { %v730_v57 = vsel %vm4094_vm6, %v727_v60, 4624  ;;  %v750_v63 = vsel %vm4095_vm13, %v746_v61, 4624  ;;  %v731_v11 = vsel %vm4086_vm3, %v726_v62, 4624  ;;  %v724_v47 = vrot.slane %v720_v59, 7 }
 0x1f1   : >> { %vm735_vm11 = vcmp.lt.s32.totalorder %v716_v44, %v730_v57  ;;  %vm737_vm14 = vcmp.lt.s32.totalorder %v718_v31, %v731_v11  ;;  %v745_v13 = vsel %vm4096_vm12, %v743_v48, %v744_v32  ;;  %v747_v18 = vsel %vm4092_vm2, %v741_v53, %v742_v54  ;;  %vm4098_vm12 = vmmov %vm4093_vm8 }
 0x1f2   : >> { %v736_v21 = vsel %vm735_vm11, %v716_v44, %v730_v57  ;;  %v738_v52 = vsel %vm737_vm14, %v718_v31, %v731_v11  ;;  %v751_v22 = vsel %vm4088_vm7, %v745_v13, 4624  ;;  %v728_v19 = vsel %vm4093_vm8, %v724_v47, %v721_v46 }
 0x1f3   : >> { %vm755_vm13 = vcmp.lt.s32.totalorder %v736_v21, %v750_v63  ;;  %vm757_vm6 = vcmp.lt.s32.totalorder %v738_v52, %v751_v22  ;;  %vm4097_vm3 = vnez %v4012_v34  ;;  %v725_v29 = vsel %vm4098_vm12, %v723_v56, %v724_v47 }
 0x1f4   : >> { %v729_v15 = vsel %vm4097_vm3, %v728_v19, 4624  ;;  %v756_v23 = vsel %vm755_vm13, %v736_v21, %v750_v63  ;;  %v758_v28 = vsel %vm757_vm6, %v738_v52, %v751_v22  ;;  %vm4099_vm14 = vnez %v4014_v39 }
 0x1f5   : >> { %vm733_vm5 = vcmp.lt.s32.totalorder %v714_v35, %v729_v15  ;;  %781 = vrot.lane.b32.xlu2 %v714_v35, %s2492_s8  ;;  %v749_v38 = vsel %vm4099_vm14, %v747_v18, 4624  ;;  %vm4100_vm11 = vnez %v4016_v51  ;;  %v748_v42 = vsel %vm4092_vm2, %v744_v32, %v741_v53 }
 0x1f6   : >> { %v734_v36 = vsel %vm733_vm5, %v714_v35, %v729_v15  ;;  %v732_v40 = vsel %vm4100_vm11, %v725_v29, 4624  ;;  %vm4101_vm6 = vnez %v4018_v55 }
 0x1f7   : >> { %vm753_vm8 = vcmp.lt.s32.totalorder %v734_v36, %v749_v38  ;;  %vm739_vm7 = vcmp.lt.s32.totalorder %v720_v59, %v732_v40  ;;  %785 = vrot.lane.b32.xlu1 %v718_v31, %s2492_s8  ;;  %v752_v45 = vsel %vm4101_vm6, %v748_v42, 4624 }
 0x1f8   : >> { %v754_v43 = vsel %vm753_vm8, %v734_v36, %v749_v38  ;;  %v740_v44 = vsel %vm739_vm7, %v720_v59, %v732_v40 }
 0x1f9   : >> { %vm759_vm13 = vcmp.lt.s32.totalorder %v740_v44, %v752_v45 }
 0x1fa   : >> { %v760_v35 = vsel %vm759_vm13, %v740_v44, %v752_v45  ;;  %vm4102_vm13 = vnez %v4052_v30 }
 0x1fd   : >> { %787 = vrot.lane.b32.xlu2 %v720_v59, %s2492_s8 }
 0x247   : >> { %v764_v46 = vpop.permute.xlu2 %763 }
 0x248   : >> { %v770_v31 = vsel %vm4072_vm9, %v764_v46, 4624 }
 0x249   : >> { %vm775_vm12 = vcmp.lt.s32.totalorder %v756_v23, %v770_v31 }
 0x24a   : >> { %v776_v57 = vsel %vm775_vm12, %v756_v23, %v770_v31  ;;  %vm4103_vm12 = vcmp.lt.s32.totalorder %v2719_v9, 7 }
 0x24f   : >> { %v782_v48 = vpop.permute.xlu2 %781 }
 0x250   : >> { %v789_v53 = vsel %vm4068_vm0, %v782_v48, 4624  ;;  %vm4108_vm0 = vnez %v4038_v26 }
 0x257   : >> { %v788_v59 = vpop.permute.xlu2 %787 }
 0x258   : >> { %v792_v13 = vsel %vm4102_vm13, %v788_v59, 4624  ;;  %vm4104_vm13 = vcmp.lt.s32.totalorder %v2719_v9, 1 }
 0x259   : >> { %v766_v50 = vpop.permute.xlu0 %765  ;;  %v762_v54 = vpop.permute.xlu1 %761 }
 0x25a   : >> { %v769_v56 = vsel %vm4089_vm15, %v762_v54, 4624  ;;  %v771_v47 = vsel %vm4071_vm10, %v766_v50, 4624 }
 0x25b   : >> { %vm773_vm5 = vcmp.lt.s32.totalorder %v754_v43, %v769_v56 }
 0x25c   : >> { %v774_v60 = vsel %vm773_vm5, %v754_v43, %v769_v56 }
 0x25d   : >> { %vm793_vm7 = vcmp.lt.s32.totalorder %v774_v60, %v789_v53 }
 0x25e   : >> { %v794_v61 = vsel %vm793_vm7, %v774_v60, %v789_v53  ;;  %vm777_vm7 = vcmp.lt.s32.totalorder %v758_v28, %v771_v47 }
 0x25f   : >> { %841 = vrot.lane.b32.xlu0 %v794_v61, %s2491_s22  ;;  %v801_v52 = vrot.slane %v794_v61, 7  ;;  %v821_v15 = vrot.slane %v794_v61, 1 }
 0x261   : >> { %v784_v62 = vpop.permute.xlu0 %783  ;;  %v768_v32 = vpop.permute.xlu1 %767 }
 0x262   : >> { %v790_v63 = vsel %vm4074_vm4, %v784_v62, 4624  ;;  %v772_v11 = vsel %vm4073_vm1, %v768_v32, 4624 }
 0x263   : >> { %vm795_vm2 = vcmp.lt.s32.totalorder %v776_v57, %v790_v63  ;;  %vm779_vm8 = vcmp.lt.s32.totalorder %v760_v35, %v772_v11 }
 0x264   : >> { %v796_v18 = vsel %vm795_vm2, %v776_v57, %v790_v63  ;;  %v780_v21 = vsel %vm779_vm8, %v760_v35, %v772_v11  ;;  %vm4105_vm2 = vnez %v4025_v16  ;;  %vm4106_vm8 = vmmov %vm4104_vm13  ;;  %v778_v35 = vsel %vm777_vm7, %v758_v28, %v771_v47 }
 0x265   : >> { %vm799_vm5 = vcmp.lt.s32.totalorder %v780_v21, %v792_v13  ;;  %843 = vrot.lane.b32.xlu1 %v796_v18, %s2491_s22  ;;  %v802_v22 = vrot.slane %v796_v18, 7  ;;  %v822_v19 = vrot.slane %v796_v18, 1 }
 0x266   : >> { %v800_v23 = vsel %vm799_vm5, %v780_v21, %v792_v13  ;;  %vm4107_vm5 = vmmov %vm4103_vm12 }
 0x267   : >> { %847 = vrot.lane.b32.xlu0 %v800_v23, %s2491_s22  ;;  %v824_v29 = vrot.slane %v800_v23, 1  ;;  %v804_v36 = vrot.slane %v800_v23, 7  ;;  %v827_v38 = vsel %vm4103_vm12, %v821_v15, %v822_v19  ;;  %v807_v40 = vsel %vm4104_vm13, %v801_v52, %v802_v22 }
 0x268   : >> { %v810_v42 = vsel %vm4105_vm2, %v807_v40, 4624  ;;  %v829_v31 = vsel %vm4099_vm14, %v827_v38, 4624  ;;  %vm4113_vm14 = vnez %v4028_v33 }
 0x269   : >> { %v786_v43 = vpop.permute.xlu1 %785  ;;  %v808_v44 = vsel %vm4106_vm8, %v804_v36, %v801_v52  ;;  %vm815_vm1 = vcmp.lt.s32.totalorder %v796_v18, %v810_v42  ;;  %v828_v45 = vsel %vm4107_vm5, %v824_v29, %v821_v15 }
 0x26a   : >> { %v791_v46 = vsel %vm4108_vm0, %v786_v43, 4624  ;;  %v809_v48 = vsel %vm4097_vm3, %v808_v44, 4624  ;;  %v816_v50 = vsel %vm815_vm1, %v796_v18, %v810_v42  ;;  %vm4109_vm1 = vmmov %vm4107_vm5  ;;  %v832_v47 = vsel %vm4101_vm6, %v828_v45, 4624 }
 0x26b   : >> { %vm797_vm13 = vcmp.lt.s32.totalorder %v778_v35, %v791_v46  ;;  %vm813_vm12 = vcmp.lt.s32.totalorder %v794_v61, %v809_v48  ;;  %vm4110_vm5 = vmmov %vm4109_vm1 }
 0x26c   : >> { %v798_v54 = vsel %vm797_vm13, %v778_v35, %v791_v46  ;;  %v814_v56 = vsel %vm813_vm12, %v794_v61, %v809_v48  ;;  %vm4111_vm13 = vmmov %vm4106_vm8  ;;  %vm4112_vm12 = vnez %v4020_v20 }
 0x26d   : >> { %845 = vrot.lane.b32.xlu2 %v798_v54, %s2491_s22  ;;  %861 = vrot.lane.b32.xlu1 %v794_v61, %s2492_s8  ;;  %v803_v53 = vrot.slane %v798_v54, 7  ;;  %v823_v28 = vrot.slane %v798_v54, 1  ;;  %vm833_vm7 = vcmp.lt.s32.totalorder %v814_v56, %v829_v31 }
 0x26e   : >> { %v834_v60 = vsel %vm833_vm7, %v814_v56, %v829_v31 }
 0x26f   : >> { %865 = vrot.lane.b32.xlu0 %v798_v54, %s2492_s8  ;;  %v806_v59 = vsel %vm4106_vm8, %v802_v22, %v803_v53  ;;  %v825_v62 = vsel %vm4109_vm1, %v823_v28, %v824_v29  ;;  %v826_v32 = vsel %vm4110_vm5, %v822_v19, %v823_v28  ;;  %v805_v57 = vsel %vm4111_vm13, %v803_v53, %v804_v36 }
 0x270   : >> { %v811_v61 = vsel %vm4112_vm12, %v806_v59, 4624  ;;  %v830_v63 = vsel %vm4113_vm14, %v826_v32, 4624  ;;  %v812_v11 = vsel %vm4100_vm11, %v805_v57, 4624  ;;  %vm4114_vm1 = vnez %v4022_v10 }
 0x271   : >> { %vm817_vm7 = vcmp.lt.s32.totalorder %v798_v54, %v811_v61  ;;  %vm835_vm8 = vcmp.lt.s32.totalorder %v816_v50, %v830_v63  ;;  %vm819_vm3 = vcmp.lt.s32.totalorder %v800_v23, %v812_v11  ;;  %v831_v21 = vsel %vm4114_vm1, %v825_v62, 4624 }
 0x272   : >> { %v818_v13 = vsel %vm817_vm7, %v798_v54, %v811_v61  ;;  %v836_v52 = vsel %vm835_vm8, %v816_v50, %v830_v63  ;;  %v820_v22 = vsel %vm819_vm3, %v800_v23, %v812_v11 }
 0x273   : >> { %vm837_vm5 = vcmp.lt.s32.totalorder %v818_v13, %v831_v21  ;;  %vm839_vm13 = vcmp.lt.s32.totalorder %v820_v22, %v832_v47 }
 0x274   : >> { %v838_v19 = vsel %vm837_vm5, %v818_v13, %v831_v21  ;;  %v840_v15 = vsel %vm839_vm13, %v820_v22, %v832_v47  ;;  %vm4115_vm13 = vnez %v4049_v25 }
 0x275   : >> { %863 = vrot.lane.b32.xlu2 %v796_v18, %s2492_s8  ;;  %867 = vrot.lane.b32.xlu1 %v800_v23, %s2492_s8 }
 0x2c7   : >> { %v846_v29 = vpop.permute.xlu2 %845 }
 0x2c8   : >> { %v851_v18 = vsel %vm4071_vm10, %v846_v29, 4624 }
 0x2c9   : >> { %vm857_vm5 = vcmp.lt.s32.totalorder %v838_v19, %v851_v18 }
 0x2ca   : >> { %v858_v53 = vsel %vm857_vm5, %v838_v19, %v851_v18 }
 0x2cf   : >> { %v864_v38 = vpop.permute.xlu2 %863 }
 0x2d0   : >> { %v870_v44 = vsel %vm4074_vm4, %v864_v38, 4624  ;;  %vm4116_vm4 = vnez %v4034_v49 }
 0x2d1   : >> { %v842_v36 = vpop.permute.xlu0 %841 }
 0x2d2   : >> { %v849_v45 = vsel %vm4089_vm15, %v842_v36, 4624 }
 0x2d3   : >> { %vm853_vm8 = vcmp.lt.s32.totalorder %v834_v60, %v849_v45 }
 0x2d4   : >> { %v854_v48 = vsel %vm853_vm8, %v834_v60, %v849_v45  ;;  %vm4117_vm8 = vcmp.lt.s32.totalorder %v2719_v9, 7 }
 0x2d7   : >> { %v844_v40 = vpop.permute.xlu1 %843 }
 0x2d8   : >> { %v850_v42 = vsel %vm4072_vm9, %v844_v40, 4624 }
 0x2d9   : >> { %vm855_vm7 = vcmp.lt.s32.totalorder %v836_v52, %v850_v42  ;;  %v848_v43 = vpop.permute.xlu0 %847 }
 0x2da   : >> { %v856_v35 = vsel %vm855_vm7, %v836_v52, %v850_v42  ;;  %v852_v54 = vsel %vm4116_vm4, %v848_v43, 4624  ;;  %vm4121_vm4 = vnez %v4052_v30 }
 0x2db   : >> { %vm875_vm3 = vcmp.lt.s32.totalorder %v856_v35, %v870_v44 }
 0x2dc   : >> { %v876_v23 = vsel %vm875_vm3, %v856_v35, %v870_v44  ;;  %vm859_vm3 = vcmp.lt.s32.totalorder %v840_v15, %v852_v54 }
 0x2dd   : >> { %923 = vrot.lane.b32.xlu0 %v876_v23, %s2491_s22  ;;  %v902_v59 = vrot.slane %v876_v23, 1  ;;  %v882_v60 = vrot.slane %v876_v23, 7  ;;  %v860_v52 = vsel %vm859_vm3, %v840_v15, %v852_v54 }
 0x2df   : >> { %v862_v46 = vpop.permute.xlu1 %861 }
 0x2e0   : >> { %v869_v50 = vsel %vm4115_vm13, %v862_v46, 4624 }
 0x2e1   : >> { %vm873_vm9 = vcmp.lt.s32.totalorder %v854_v48, %v869_v50  ;;  %v866_v56 = vpop.permute.xlu0 %865 }
 0x2e2   : >> { %v874_v31 = vsel %vm873_vm9, %v854_v48, %v869_v50  ;;  %v871_v28 = vsel %vm4108_vm0, %v866_v56, 4624  ;;  %vm4118_vm9 = vcmp.lt.s32.totalorder %v2719_v9, 1 }
 0x2e3   : >> { %vm877_vm7 = vcmp.lt.s32.totalorder %v858_v53, %v871_v28  ;;  %921 = vrot.lane.b32.xlu2 %v874_v31, %s2491_s22  ;;  %v881_v62 = vrot.slane %v874_v31, 7  ;;  %v901_v32 = vrot.slane %v874_v31, 1  ;;  %vm4120_vm0 = vmmov %vm4118_vm9 }
 0x2e4   : >> { %v878_v57 = vsel %vm877_vm7, %v858_v53, %v871_v28  ;;  %vm4119_vm7 = vmmov %vm4117_vm8 }
 0x2e5   : >> { %925 = vrot.lane.b32.xlu1 %v878_v57, %s2491_s22  ;;  %941 = vrot.lane.b32.xlu0 %v874_v31, %s2492_s8  ;;  %v907_v61 = vsel %vm4117_vm8, %v901_v32, %v902_v59  ;;  %v883_v63 = vrot.slane %v878_v57, 7  ;;  %v887_v11 = vsel %vm4118_vm9, %v881_v62, %v882_v60  ;;  %v903_v47 = vrot.slane %v878_v57, 1 }
 0x2e6   : >> { %v890_v13 = vsel %vm4105_vm2, %v887_v11, 4624 }
 0x2e7   : >> { %v868_v21 = vpop.permute.xlu1 %867  ;;  %vm895_vm5 = vcmp.lt.s32.totalorder %v876_v23, %v890_v13  ;;  %v906_v22 = vsel %vm4119_vm7, %v902_v59, %v903_v47  ;;  %v886_v19 = vsel %vm4120_vm0, %v882_v60, %v883_v63 }
 0x2e8   : >> { %v872_v29 = vsel %vm4121_vm4, %v868_v21, 4624  ;;  %v896_v36 = vsel %vm895_vm5, %v876_v23, %v890_v13  ;;  %v910_v38 = vsel %vm4113_vm14, %v906_v22, 4624  ;;  %v891_v40 = vsel %vm4112_vm12, %v886_v19, 4624  ;;  %vm4122_vm5 = vmmov %vm4120_vm0 }
 0x2e9   : >> { %vm879_vm8 = vcmp.lt.s32.totalorder %v860_v52, %v872_v29  ;;  %vm915_vm9 = vcmp.lt.s32.totalorder %v896_v36, %v910_v38  ;;  %vm897_vm3 = vcmp.lt.s32.totalorder %v878_v57, %v891_v40  ;;  %vm4125_vm12 = vnez %v4014_v39 }
 0x2ea   : >> { %v880_v15 = vsel %vm879_vm8, %v860_v52, %v872_v29  ;;  %v916_v42 = vsel %vm915_vm9, %v896_v36, %v910_v38  ;;  %v898_v43 = vsel %vm897_vm3, %v878_v57, %v891_v40  ;;  %vm4123_vm8 = vnez %v4012_v34  ;;  %vm4124_vm9 = vmmov %vm4119_vm7 }
 0x2eb   : >> { %927 = vrot.lane.b32.xlu2 %v880_v15, %s2491_s22  ;;  %v884_v44 = vrot.slane %v880_v15, 7  ;;  %v904_v45 = vrot.slane %v880_v15, 1  ;;  %v909_v54 = vsel %vm4125_vm12, %v907_v61, 4624 }
 0x2ed   : >> { %943 = vrot.lane.b32.xlu1 %v876_v23, %s2492_s8  ;;  %947 = vrot.lane.b32.xlu0 %v880_v15, %s2492_s8  ;;  %v888_v35 = vsel %vm4120_vm0, %v884_v44, %v881_v62  ;;  %v885_v18 = vsel %vm4122_vm5, %v883_v63, %v884_v44  ;;  %v908_v46 = vsel %vm4119_vm7, %v904_v45, %v901_v32 }
 0x2ee   : >> { %v889_v48 = vsel %vm4123_vm8, %v888_v35, 4624  ;;  %v892_v50 = vsel %vm4100_vm11, %v885_v18, 4624  ;;  %v905_v23 = vsel %vm4124_vm9, %v903_v47, %v904_v45  ;;  %v912_v59 = vsel %vm4101_vm6, %v908_v46, 4624 }
 0x2ef   : >> { %vm893_vm3 = vcmp.lt.s32.totalorder %v874_v31, %v889_v48  ;;  %vm899_vm0 = vcmp.lt.s32.totalorder %v880_v15, %v892_v50  ;;  %v911_v56 = vsel %vm4114_vm1, %v905_v23, 4624 }
 0x2f0   : >> { %v894_v53 = vsel %vm893_vm3, %v874_v31, %v889_v48  ;;  %v900_v28 = vsel %vm899_vm0, %v880_v15, %v892_v50  ;;  %vm917_vm5 = vcmp.lt.s32.totalorder %v898_v43, %v911_v56 }
 0x2f1   : >> { %vm913_vm7 = vcmp.lt.s32.totalorder %v894_v53, %v909_v54  ;;  %vm919_vm8 = vcmp.lt.s32.totalorder %v900_v28, %v912_v59  ;;  %v918_v62 = vsel %vm917_vm5, %v898_v43, %v911_v56  ;;  %vm4127_vm5 = vnez %v4038_v26 }
 0x2f2   : >> { %v914_v32 = vsel %vm913_vm7, %v894_v53, %v909_v54  ;;  %v920_v60 = vsel %vm919_vm8, %v900_v28, %v912_v59  ;;  %vm4126_vm8 = vnez %v4034_v49  ;;  %vm4128_vm7 = vnez %v4043_v12 }
 0x2f3   : >> { %945 = vrot.lane.b32.xlu2 %v878_v57, %s2492_s8 }
 0x33d   : >> { %v922_v63 = vpop.permute.xlu2 %921 }
 0x33e   : >> { %v929_v47 = vsel %vm4089_vm15, %v922_v63, 4624 }
 0x33f   : >> { %vm933_vm9 = vcmp.lt.s32.totalorder %v914_v32, %v929_v47 }
 0x340   : >> { %v934_v22 = vsel %vm933_vm9, %v914_v32, %v929_v47 }
 0x345   : >> { %v928_v11 = vpop.permute.xlu2 %927 }
 0x346   : >> { %v932_v57 = vsel %vm4126_vm8, %v928_v11, 4624  ;;  %vm4129_vm8 = vnez %v4047_v24 }
 0x347   : >> { %vm939_vm9 = vcmp.lt.s32.totalorder %v920_v60, %v932_v57 }
 0x348   : >> { %v940_v18 = vsel %vm939_vm9, %v920_v60, %v932_v57 }
 0x34d   : >> { %v946_v31 = vpop.permute.xlu2 %945 }
 0x34e   : >> { %v951_v29 = vsel %vm4127_vm5, %v946_v31, 4624 }
 0x34f   : >> { %v924_v61 = vpop.permute.xlu0 %923 }
 0x350   : >> { %v930_v36 = vsel %vm4128_vm7, %v924_v61, 4624 }
 0x357   : >> { %v926_v13 = vpop.permute.xlu1 %925  ;;  %v942_v21 = vpop.permute.xlu0 %941 }
 0x358   : >> { %v931_v52 = vsel %vm4071_vm10, %v926_v13, 4624  ;;  %v949_v19 = vsel %vm4115_vm13, %v942_v21, 4624  ;;  %vm935_vm10 = vcmp.lt.s32.totalorder %v916_v42, %v930_v36 }
 0x359   : >> { %vm937_vm3 = vcmp.lt.s32.totalorder %v918_v62, %v931_v52  ;;  %vm953_vm0 = vcmp.lt.s32.totalorder %v934_v22, %v949_v19  ;;  %v936_v45 = vsel %vm935_vm10, %v916_v42, %v930_v36  ;;  %vm4130_vm10 = vcmp.lt.s32.totalorder %v2719_v9, 1 }
 0x35a   : >> { %v938_v38 = vsel %vm937_vm3, %v918_v62, %v931_v52  ;;  %v954_v40 = vsel %vm953_vm0, %v934_v22, %v949_v19  ;;  %vm4132_vm9 = vmmov %vm4130_vm10 }
 0x35b   : >> { %vm957_vm15 = vcmp.lt.s32.totalorder %v938_v38, %v951_v29  ;;  %1001 = vrot.lane.b32.xlu1 %v954_v40, %s2491_s22  ;;  %v961_v48 = vrot.slane %v954_v40, 7  ;;  %v981_v56 = vrot.slane %v954_v40, 1  ;;  %vm4135_vm5 = vmmov %vm4132_vm9 }
 0x35c   : >> { %v958_v15 = vsel %vm957_vm15, %v938_v38, %v951_v29  ;;  %vm4131_vm15 = vcmp.lt.s32.totalorder %v2719_v9, 7 }
 0x35d   : >> { %1005 = vrot.lane.b32.xlu0 %v958_v15, %s2491_s22  ;;  %v983_v54 = vrot.slane %v958_v15, 1  ;;  %v963_v62 = vrot.slane %v958_v15, 7 }
 0x35f   : >> { %v944_v43 = vpop.permute.xlu1 %943  ;;  %v948_v44 = vpop.permute.xlu0 %947 }
 0x360   : >> { %v950_v35 = vsel %vm4129_vm8, %v944_v43, 4624  ;;  %v952_v46 = vsel %vm4121_vm4, %v948_v44, 4624 }
 0x361   : >> { %vm955_vm3 = vcmp.lt.s32.totalorder %v936_v45, %v950_v35  ;;  %vm959_vm0 = vcmp.lt.s32.totalorder %v940_v18, %v952_v46 }
 0x362   : >> { %v956_v50 = vsel %vm955_vm3, %v936_v45, %v950_v35  ;;  %v960_v23 = vsel %vm959_vm0, %v940_v18, %v952_v46  ;;  %vm4133_vm3 = vmmov %vm4131_vm15  ;;  %vm4134_vm0 = vnez %v4012_v34 }
 0x363   : >> { %1003 = vrot.lane.b32.xlu2 %v956_v50, %s2491_s22  ;;  %1007 = vrot.lane.b32.xlu1 %v960_v23, %s2491_s22  ;;  %v962_v53 = vrot.slane %v956_v50, 7  ;;  %v982_v42 = vrot.slane %v956_v50, 1  ;;  %v964_v28 = vrot.slane %v960_v23, 7  ;;  %v984_v59 = vrot.slane %v960_v23, 1 }
 0x365   : >> { %1023 = vrot.lane.b32.xlu0 %v956_v50, %s2492_s8  ;;  %v967_v32 = vsel %vm4130_vm10, %v961_v48, %v962_v53  ;;  %v986_v60 = vsel %vm4131_vm15, %v982_v42, %v983_v54  ;;  %v968_v63 = vsel %vm4132_vm9, %v964_v28, %v961_v48  ;;  %v987_v11 = vsel %vm4133_vm3, %v981_v56, %v982_v42  ;;  %vm4136_vm9 = vmmov %vm4133_vm3 }
 0x366   : >> { %v970_v61 = vsel %vm4105_vm2, %v967_v32, 4624  ;;  %v990_v47 = vsel %vm4113_vm14, %v986_v60, 4624  ;;  %v969_v31 = vsel %vm4134_vm0, %v968_v63, 4624  ;;  %v989_v13 = vsel %vm4125_vm12, %v987_v11, 4624  ;;  %vm4138_vm12 = vmmov %vm4135_vm5 }
 0x367   : >> { %vm975_vm10 = vcmp.lt.s32.totalorder %v956_v50, %v970_v61  ;;  %vm973_vm15 = vcmp.lt.s32.totalorder %v954_v40, %v969_v31  ;;  %v966_v21 = vsel %vm4135_vm5, %v962_v53, %v963_v62  ;;  %v985_v52 = vsel %vm4136_vm9, %v983_v54, %v984_v59 }
 0x368   : >> { %v976_v22 = vsel %vm975_vm10, %v956_v50, %v970_v61  ;;  %v974_v19 = vsel %vm973_vm15, %v954_v40, %v969_v31  ;;  %vm4137_vm3 = vnez %v4020_v20  ;;  %v991_v29 = vsel %vm4114_vm1, %v985_v52, 4624  ;;  %vm4139_vm15 = vmmov %vm4136_vm9 }
 0x369   : >> { %v971_v57 = vsel %vm4137_vm3, %v966_v21, 4624  ;;  %vm995_vm14 = vcmp.lt.s32.totalorder %v976_v22, %v990_v47  ;;  %vm993_vm2 = vcmp.lt.s32.totalorder %v974_v19, %v989_v13  ;;  %v965_v36 = vsel %vm4138_vm12, %v963_v62, %v964_v28 }
 0x36a   : >> { %vm977_vm0 = vcmp.lt.s32.totalorder %v958_v15, %v971_v57  ;;  %v996_v38 = vsel %vm995_vm14, %v976_v22, %v990_v47  ;;  %v994_v43 = vsel %vm993_vm2, %v974_v19, %v989_v13  ;;  %v972_v45 = vsel %vm4100_vm11, %v965_v36, 4624 }
 0x36b   : >> { %v978_v44 = vsel %vm977_vm0, %v958_v15, %v971_v57  ;;  %1021 = vrot.lane.b32.xlu2 %v954_v40, %s2492_s8  ;;  %1025 = vrot.lane.b32.xlu1 %v958_v15, %s2492_s8  ;;  %vm979_vm10 = vcmp.lt.s32.totalorder %v960_v23, %v972_v45  ;;  %v988_v35 = vsel %vm4139_vm15, %v984_v59, %v981_v56 }
 0x36c   : >> { %vm997_vm5 = vcmp.lt.s32.totalorder %v978_v44, %v991_v29  ;;  %v980_v46 = vsel %vm979_vm10, %v960_v23, %v972_v45  ;;  %v992_v48 = vsel %vm4101_vm6, %v988_v35, 4624  ;;  %vm4140_vm2 = vnez %v4031_v37 }
 0x36d   : >> { %v998_v18 = vsel %vm997_vm5, %v978_v44, %v991_v29  ;;  %vm999_vm14 = vcmp.lt.s32.totalorder %v980_v46, %v992_v48  ;;  %vm4141_vm5 = vnez %v4041_v17  ;;  %vm4142_vm10 = vnez %v4034_v49 }
 0x36e   : >> { %v1000_v50 = vsel %vm999_vm14, %v980_v46, %v992_v48 }
 0x373   : >> { %1027 = vrot.lane.b32.xlu2 %v960_v23, %s2492_s8 }
 0x3bd   : >> { %v1004_v54 = vpop.permute.xlu2 %1003 }
 0x3be   : >> { %v1010_v59 = vsel %vm4128_vm7, %v1004_v54, 4624 }
 0x3bf   : >> { %vm1015_vm9 = vcmp.lt.s32.totalorder %v996_v38, %v1010_v59 }
 0x3c0   : >> { %v1016_v31 = vsel %vm1015_vm9, %v996_v38, %v1010_v59  ;;  %vm4143_vm9 = vcmp.lt.s32.totalorder %v2719_v9, 1 }
 0x3c5   : >> { %v1022_v53 = vpop.permute.xlu2 %1021 }
 0x3c6   : >> { %v1029_v56 = vsel %vm4115_vm13, %v1022_v53, 4624  ;;  %vm4149_vm13 = vnez %v4025_v16 }
 0x3cd   : >> { %v1002_v42 = vpop.permute.xlu1 %1001  ;;  %v1028_v23 = vpop.permute.xlu2 %1027 }
 0x3ce   : >> { %v1009_v40 = vsel %vm4140_vm2, %v1002_v42, 4624  ;;  %v1032_v61 = vsel %vm4121_vm4, %v1028_v23, 4624  ;;  %vm4147_vm4 = vnez %v4038_v26 }
 0x3cf   : >> { %vm1013_vm12 = vcmp.lt.s32.totalorder %v994_v43, %v1009_v40  ;;  %v1006_v15 = vpop.permute.xlu0 %1005 }
 0x3d0   : >> { %v1014_v28 = vsel %vm1013_vm12, %v994_v43, %v1009_v40  ;;  %v1011_v60 = vsel %vm4141_vm5, %v1006_v15, 4624 }
 0x3d1   : >> { %vm1033_vm0 = vcmp.lt.s32.totalorder %v1014_v28, %v1029_v56  ;;  %vm1017_vm14 = vcmp.lt.s32.totalorder %v998_v18, %v1011_v60 }
 0x3d2   : >> { %v1034_v62 = vsel %vm1033_vm0, %v1014_v28, %v1029_v56  ;;  %v1018_v48 = vsel %vm1017_vm14, %v998_v18, %v1011_v60 }
 0x3d3   : >> { %1081 = vrot.lane.b32.xlu0 %v1034_v62, %s2491_s22  ;;  %v1041_v22 = vrot.slane %v1034_v62, 7  ;;  %v1061_v19 = vrot.slane %v1034_v62, 1 }
 0x3d5   : >> { %v1008_v32 = vpop.permute.xlu1 %1007 }
 0x3d6   : >> { %v1012_v63 = vsel %vm4142_vm10, %v1008_v32, 4624  ;;  %vm4148_vm10 = vnez %v4012_v34 }
 0x3d7   : >> { %vm1019_vm15 = vcmp.lt.s32.totalorder %v1000_v50, %v1012_v63  ;;  %v1024_v11 = vpop.permute.xlu0 %1023 }
 0x3d8   : >> { %v1020_v47 = vsel %vm1019_vm15, %v1000_v50, %v1012_v63  ;;  %v1030_v13 = vsel %vm4129_vm8, %v1024_v11, 4624  ;;  %vm4144_vm15 = vcmp.lt.s32.totalorder %v2719_v9, 7 }
 0x3d9   : >> { %vm1039_vm12 = vcmp.lt.s32.totalorder %v1020_v47, %v1032_v61  ;;  %vm1035_vm0 = vcmp.lt.s32.totalorder %v1016_v31, %v1030_v13 }
 0x3da   : >> { %v1040_v21 = vsel %vm1039_vm12, %v1020_v47, %v1032_v61  ;;  %v1036_v52 = vsel %vm1035_vm0, %v1016_v31, %v1030_v13  ;;  %vm4145_vm12 = vmmov %vm4143_vm9 }
 0x3db   : >> { %1083 = vrot.lane.b32.xlu1 %v1036_v52, %s2491_s22  ;;  %1087 = vrot.lane.b32.xlu0 %v1040_v21, %s2491_s22  ;;  %v1042_v57 = vrot.slane %v1036_v52, 7  ;;  %v1064_v29 = vrot.slane %v1040_v21, 1  ;;  %v1062_v36 = vrot.slane %v1036_v52, 1  ;;  %v1044_v43 = vrot.slane %v1040_v21, 7  ;;  %vm4146_vm0 = vmmov %vm4144_vm15 }
 0x3dd   : >> { %v1026_v44 = vpop.permute.xlu1 %1025  ;;  %v1048_v38 = vsel %vm4143_vm9, %v1044_v43, %v1041_v22  ;;  %v1067_v45 = vsel %vm4144_vm15, %v1061_v19, %v1062_v36  ;;  %v1047_v35 = vsel %vm4145_vm12, %v1041_v22, %v1042_v57  ;;  %v1068_v46 = vsel %vm4146_vm0, %v1064_v29, %v1061_v19 }
 0x3de   : >> { %v1031_v50 = vsel %vm4147_vm4, %v1026_v44, 4624  ;;  %v1049_v54 = vsel %vm4148_vm10, %v1048_v38, 4624  ;;  %v1050_v53 = vsel %vm4149_vm13, %v1047_v35, 4624  ;;  %vm4150_vm12 = vnez %v4014_v39 }
 0x3df   : >> { %vm1037_vm9 = vcmp.lt.s32.totalorder %v1018_v48, %v1031_v50  ;;  %vm1053_vm2 = vcmp.lt.s32.totalorder %v1034_v62, %v1049_v54  ;;  %vm1055_vm15 = vcmp.lt.s32.totalorder %v1036_v52, %v1050_v53  ;;  %v1069_v15 = vsel %vm4150_vm12, %v1067_v45, 4624 }
 0x3e0   : >> { %v1038_v42 = vsel %vm1037_vm9, %v1018_v48, %v1031_v50  ;;  %v1054_v40 = vsel %vm1053_vm2, %v1034_v62, %v1049_v54  ;;  %v1056_v56 = vsel %vm1055_vm15, %v1036_v52, %v1050_v53  ;;  %vm4151_vm0 = vcmp.lt.s32.totalorder %v2719_v9, 1 }
 0x3e1   : >> { %1085 = vrot.lane.b32.xlu2 %v1038_v42, %s2491_s22  ;;  %v1043_v18 = vrot.slane %v1038_v42, 7  ;;  %v1063_v28 = vrot.slane %v1038_v42, 1  ;;  %vm1073_vm14 = vcmp.lt.s32.totalorder %v1054_v40, %v1069_v15  ;;  %vm4152_vm9 = vcmp.lt.s32.totalorder %v2719_v9, 7 }
 0x3e2   : >> { %v1074_v59 = vsel %vm1073_vm14, %v1054_v40, %v1069_v15  ;;  %vm4153_vm2 = vmmov %vm4152_vm9  ;;  %vm4154_vm15 = vnez %v4028_v33  ;;  %v1072_v19 = vsel %vm4101_vm6, %v1068_v46, 4624 }
 0x3e3   : >> { %1101 = vrot.lane.b32.xlu1 %v1034_v62, %s2492_s8  ;;  %1105 = vrot.lane.b32.xlu0 %v1038_v42, %s2492_s8  ;;  %v1046_v23 = vsel %vm4151_vm0, %v1042_v57, %v1043_v18  ;;  %v1065_v32 = vsel %vm4152_vm9, %v1063_v28, %v1064_v29  ;;  %v1066_v60 = vsel %vm4153_vm2, %v1062_v36, %v1063_v28  ;;  %vm4155_vm14 = vmmov %vm4151_vm0 }
 0x3e4   : >> { %v1051_v63 = vsel %vm4137_vm3, %v1046_v23, 4624  ;;  %v1070_v11 = vsel %vm4154_vm15, %v1066_v60, 4624  ;;  %v1045_v62 = vsel %vm4155_vm14, %v1043_v18, %v1044_v43  ;;  %v1071_v31 = vsel %vm4114_vm1, %v1065_v32, 4624 }
 0x3e5   : >> { %vm1057_vm12 = vcmp.lt.s32.totalorder %v1038_v42, %v1051_v63  ;;  %vm1075_vm10 = vcmp.lt.s32.totalorder %v1056_v56, %v1070_v11  ;;  %v1052_v61 = vsel %vm4100_vm11, %v1045_v62, 4624 }
 0x3e6   : >> { %v1058_v47 = vsel %vm1057_vm12, %v1038_v42, %v1051_v63  ;;  %v1076_v13 = vsel %vm1075_vm10, %v1056_v56, %v1070_v11  ;;  %vm1059_vm0 = vcmp.lt.s32.totalorder %v1040_v21, %v1052_v61  ;;  %vm4156_vm12 = vnez %v4031_v37 }
 0x3e7   : >> { %vm1077_vm9 = vcmp.lt.s32.totalorder %v1058_v47, %v1071_v31  ;;  %v1060_v22 = vsel %vm1059_vm0, %v1040_v21, %v1052_v61 }
 0x3e8   : >> { %v1078_v57 = vsel %vm1077_vm9, %v1058_v47, %v1071_v31  ;;  %vm1079_vm2 = vcmp.lt.s32.totalorder %v1060_v22, %v1072_v19 }
 0x3e9   : >> { %1103 = vrot.lane.b32.xlu2 %v1036_v52, %s2492_s8  ;;  %v1080_v29 = vsel %vm1079_vm2, %v1060_v22, %v1072_v19  ;;  %vm4157_vm2 = vnez %v4049_v25 }
 0x3eb   : >> { %1107 = vrot.lane.b32.xlu1 %v1040_v21, %s2492_s8 }
 0x43b   : >> { %v1086_v36 = vpop.permute.xlu2 %1085 }
 0x43c   : >> { %v1091_v48 = vsel %vm4141_vm5, %v1086_v36, 4624 }
 0x43d   : >> { %vm1097_vm0 = vcmp.lt.s32.totalorder %v1078_v57, %v1091_v48 }
 0x43e   : >> { %v1098_v15 = vsel %vm1097_vm0, %v1078_v57, %v1091_v48  ;;  %vm4159_vm0 = vcmp.lt.s32.totalorder %v2719_v9, 7 }
 0x443   : >> { %v1104_v44 = vpop.permute.xlu2 %1103 }
 0x444   : >> { %v1110_v46 = vsel %vm4129_vm8, %v1104_v44, 4624  ;;  %vm4158_vm8 = vnez %v4034_v49 }
 0x445   : >> { %v1082_v43 = vpop.permute.xlu0 %1081 }
 0x446   : >> { %v1089_v52 = vsel %vm4156_vm12, %v1082_v43, 4624 }
 0x447   : >> { %vm1093_vm9 = vcmp.lt.s32.totalorder %v1074_v59, %v1089_v52 }
 0x448   : >> { %v1094_v42 = vsel %vm1093_vm9, %v1074_v59, %v1089_v52  ;;  %vm4160_vm9 = vcmp.lt.s32.totalorder %v2719_v9, 1 }
 0x44d   : >> { %v1084_v38 = vpop.permute.xlu1 %1083  ;;  %v1088_v45 = vpop.permute.xlu0 %1087 }
 0x44e   : >> { %v1090_v35 = vsel %vm4128_vm7, %v1084_v38, 4624  ;;  %v1092_v18 = vsel %vm4158_vm8, %v1088_v45, 4624 }
 0x44f   : >> { %vm1095_vm10 = vcmp.lt.s32.totalorder %v1076_v13, %v1090_v35 }
 0x450   : >> { %v1096_v50 = vsel %vm1095_vm10, %v1076_v13, %v1090_v35 }
 0x451   : >> { %vm1115_vm14 = vcmp.lt.s32.totalorder %v1096_v50, %v1110_v46 }
 0x452   : >> { %v1116_v21 = vsel %vm1115_vm14, %v1096_v50, %v1110_v46  ;;  %vm1099_vm14 = vcmp.lt.s32.totalorder %v1080_v29, %v1092_v18 }
 0x453   : >> { %1163 = vrot.lane.b32.xlu0 %v1116_v21, %s2491_s22  ;;  %v1142_v32 = vrot.slane %v1116_v21, 1  ;;  %v1122_v60 = vrot.slane %v1116_v21, 7  ;;  %v1100_v36 = vsel %vm1099_vm14, %v1080_v29, %v1092_v18 }
 0x455   : >> { %v1102_v54 = vpop.permute.xlu1 %1101  ;;  %v1106_v53 = vpop.permute.xlu0 %1105 }
 0x456   : >> { %v1109_v40 = vsel %vm4157_vm2, %v1102_v54, 4624  ;;  %v1111_v56 = vsel %vm4147_vm4, %v1106_v53, 4624 }
 0x457   : >> { %vm1113_vm10 = vcmp.lt.s32.totalorder %v1094_v42, %v1109_v40  ;;  %vm1117_vm7 = vcmp.lt.s32.totalorder %v1098_v15, %v1111_v56 }
 0x458   : >> { %v1114_v28 = vsel %vm1113_vm10, %v1094_v42, %v1109_v40  ;;  %v1118_v23 = vsel %vm1117_vm7, %v1098_v15, %v1111_v56  ;;  %vm4161_vm7 = vmmov %vm4159_vm0 }
 0x459   : >> { %1165 = vrot.lane.b32.xlu1 %v1118_v23, %s2491_s22  ;;  %1161 = vrot.lane.b32.xlu2 %v1114_v28, %s2491_s22  ;;  %v1121_v59 = vrot.slane %v1114_v28, 7  ;;  %v1141_v63 = vrot.slane %v1114_v28, 1  ;;  %v1123_v11 = vrot.slane %v1118_v23, 7  ;;  %v1143_v62 = vrot.slane %v1118_v23, 1  ;;  %vm4162_vm10 = vmmov %vm4160_vm9 }
 0x45a   : >> { %vm4164_vm14 = vmmov %vm4162_vm10 }
 0x45b   : >> { %1181 = vrot.lane.b32.xlu0 %v1114_v28, %s2492_s8  ;;  %v1147_v61 = vsel %vm4159_vm0, %v1141_v63, %v1142_v32  ;;  %v1127_v47 = vsel %vm4160_vm9, %v1121_v59, %v1122_v60  ;;  %v1146_v31 = vsel %vm4161_vm7, %v1142_v32, %v1143_v62  ;;  %v1126_v13 = vsel %vm4162_vm10, %v1122_v60, %v1123_v11 }
 0x45c   : >> { %v1130_v22 = vsel %vm4149_vm13, %v1127_v47, 4624  ;;  %v1131_v19 = vsel %vm4137_vm3, %v1126_v13, 4624  ;;  %vm4163_vm0 = vnez %v4052_v30  ;;  %v1150_v38 = vsel %vm4154_vm15, %v1146_v31, 4624 }
 0x45d   : >> { %v1108_v57 = vpop.permute.xlu1 %1107  ;;  %vm1135_vm8 = vcmp.lt.s32.totalorder %v1116_v21, %v1130_v22  ;;  %vm1137_vm2 = vcmp.lt.s32.totalorder %v1118_v23, %v1131_v19 }
 0x45e   : >> { %v1112_v43 = vsel %vm4163_vm0, %v1108_v57, 4624  ;;  %v1136_v44 = vsel %vm1135_vm8, %v1116_v21, %v1130_v22  ;;  %v1138_v45 = vsel %vm1137_vm2, %v1118_v23, %v1131_v19  ;;  %vm4165_vm8 = vmmov %vm4162_vm10  ;;  %vm4166_vm2 = vcmp.lt.s32.totalorder %v2719_v9, 7 }
 0x45f   : >> { %vm1119_vm9 = vcmp.lt.s32.totalorder %v1100_v36, %v1112_v43  ;;  %vm1155_vm7 = vcmp.lt.s32.totalorder %v1136_v44, %v1150_v38  ;;  %vm4167_vm10 = vmmov %vm4166_vm2 }
 0x460   : >> { %v1120_v35 = vsel %vm1119_vm9, %v1100_v36, %v1112_v43  ;;  %v1156_v48 = vsel %vm1155_vm7, %v1136_v44, %v1150_v38  ;;  %vm4168_vm9 = vnez %v4012_v34 }
 0x461   : >> { %1183 = vrot.lane.b32.xlu1 %v1116_v21, %s2492_s8  ;;  %1167 = vrot.lane.b32.xlu2 %v1120_v35, %s2491_s22  ;;  %v1124_v46 = vrot.slane %v1120_v35, 7  ;;  %v1144_v29 = vrot.slane %v1120_v35, 1 }
 0x463   : >> { %1187 = vrot.lane.b32.xlu0 %v1120_v35, %s2492_s8  ;;  %v1128_v52 = vsel %vm4164_vm14, %v1124_v46, %v1121_v59  ;;  %v1125_v50 = vsel %vm4165_vm8, %v1123_v11, %v1124_v46  ;;  %v1148_v54 = vsel %vm4166_vm2, %v1144_v29, %v1141_v63  ;;  %v1145_v53 = vsel %vm4167_vm10, %v1143_v62, %v1144_v29 }
 0x464   : >> { %v1129_v21 = vsel %vm4168_vm9, %v1128_v52, 4624  ;;  %v1132_v42 = vsel %vm4100_vm11, %v1125_v50, 4624  ;;  %v1151_v40 = vsel %vm4114_vm1, %v1145_v53, 4624  ;;  %vm4169_vm14 = vnez %v4014_v39 }
 0x465   : >> { %vm1133_vm7 = vcmp.lt.s32.totalorder %v1114_v28, %v1129_v21  ;;  %v1149_v15 = vsel %vm4169_vm14, %v1147_v61, 4624  ;;  %vm1139_vm8 = vcmp.lt.s32.totalorder %v1120_v35, %v1132_v42  ;;  %vm1157_vm3 = vcmp.lt.s32.totalorder %v1138_v45, %v1151_v40 }
 0x466   : >> { %v1134_v56 = vsel %vm1133_vm7, %v1114_v28, %v1129_v21  ;;  %v1140_v18 = vsel %vm1139_vm8, %v1120_v35, %v1132_v42  ;;  %v1152_v32 = vsel %vm4101_vm6, %v1148_v54, 4624  ;;  %v1158_v60 = vsel %vm1157_vm3, %v1138_v45, %v1151_v40 }
 0x467   : >> { %vm1153_vm2 = vcmp.lt.s32.totalorder %v1134_v56, %v1149_v15  ;;  %vm1159_vm10 = vcmp.lt.s32.totalorder %v1140_v18, %v1152_v32  ;;  %vm4170_vm3 = vnez %v4043_v12  ;;  %vm4171_vm8 = vnez %v4049_v25 }
 0x468   : >> { %v1154_v59 = vsel %vm1153_vm2, %v1134_v56, %v1149_v15  ;;  %v1160_v63 = vsel %vm1159_vm10, %v1140_v18, %v1152_v32  ;;  %vm4172_vm2 = vnez %v4034_v49 }
 0x469   : >> { %1185 = vrot.lane.b32.xlu2 %v1118_v23, %s2492_s8 }
 0x4b3   : >> { %v1162_v11 = vpop.permute.xlu2 %1161 }
 0x4b4   : >> { %v1169_v61 = vsel %vm4156_vm12, %v1162_v11, 4624 }
 0x4b5   : >> { %vm1173_vm11 = vcmp.lt.s32.totalorder %v1154_v59, %v1169_v61 }
 0x4b6   : >> { %v1174_v19 = vsel %vm1173_vm11, %v1154_v59, %v1169_v61 }
 0x4bb   : >> { %v1168_v62 = vpop.permute.xlu2 %1167 }
 0x4bc   : >> { %v1172_v44 = vsel %vm4172_vm2, %v1168_v62, 4624 }
 0x4bd   : >> { %vm1179_vm11 = vcmp.lt.s32.totalorder %v1160_v63, %v1172_v44 }
 0x4be   : >> { %v1180_v50 = vsel %vm1179_vm11, %v1160_v63, %v1172_v44  ;;  %vm4177_vm11 = vnez %v4020_v20 }
 0x4c3   : >> { %v1186_v31 = vpop.permute.xlu2 %1185 }
 0x4c4   : >> { %v1191_v57 = vsel %vm4147_vm4, %v1186_v31, 4624 }
 0x4c5   : >> { %v1164_v47 = vpop.permute.xlu0 %1163 }
 0x4c6   : >> { %v1170_v23 = vsel %vm4170_vm3, %v1164_v47, 4624 }
 0x4cb   : >> { %v1166_v28 = vpop.permute.xlu1 %1165 }
 0x4cc   : >> { %v1171_v13 = vsel %vm4141_vm5, %v1166_v28, 4624  ;;  %vm1175_vm5 = vcmp.lt.s32.totalorder %v1156_v48, %v1170_v23 }
 0x4cd   : >> { %vm1177_vm7 = vcmp.lt.s32.totalorder %v1158_v60, %v1171_v13  ;;  %v1182_v22 = vpop.permute.xlu0 %1181  ;;  %v1176_v46 = vsel %vm1175_vm5, %v1156_v48, %v1170_v23  ;;  %vm4174_vm5 = vcmp.lt.s32.totalorder %v2719_v9, 1 }
 0x4ce   : >> { %v1178_v36 = vsel %vm1177_vm7, %v1158_v60, %v1171_v13  ;;  %v1189_v43 = vsel %vm4171_vm8, %v1182_v22, 4624  ;;  %vm4173_vm7 = vnez %v4047_v24 }
 0x4cf   : >> { %vm1197_vm10 = vcmp.lt.s32.totalorder %v1178_v36, %v1191_v57  ;;  %vm1193_vm12 = vcmp.lt.s32.totalorder %v1174_v19, %v1189_v43 }
 0x4d0   : >> { %v1198_v38 = vsel %vm1197_vm10, %v1178_v36, %v1191_v57  ;;  %v1194_v45 = vsel %vm1193_vm12, %v1174_v19, %v1189_v43  ;;  %vm4176_vm10 = vmmov %vm4174_vm5 }
 0x4d1   : >> { %1245 = vrot.lane.b32.xlu0 %v1198_v38, %s2491_s22  ;;  %1241 = vrot.lane.b32.xlu1 %v1194_v45, %s2491_s22  ;;  %v1201_v21 = vrot.slane %v1194_v45, 7  ;;  %v1223_v42 = vrot.slane %v1198_v38, 1  ;;  %v1203_v56 = vrot.slane %v1198_v38, 7  ;;  %v1221_v48 = vrot.slane %v1194_v45, 1 }
 0x4d3   : >> { %v1184_v35 = vpop.permute.xlu1 %1183 }
 0x4d4   : >> { %v1190_v29 = vsel %vm4173_vm7, %v1184_v35, 4624 }
 0x4d5   : >> { %vm1195_vm4 = vcmp.lt.s32.totalorder %v1176_v46, %v1190_v29  ;;  %v1188_v52 = vpop.permute.xlu0 %1187 }
 0x4d6   : >> { %v1196_v54 = vsel %vm1195_vm4, %v1176_v46, %v1190_v29  ;;  %v1192_v53 = vsel %vm4163_vm0, %v1188_v52, 4624  ;;  %vm4175_vm4 = vcmp.lt.s32.totalorder %v2719_v9, 7 }
 0x4d7   : >> { %vm1199_vm12 = vcmp.lt.s32.totalorder %v1180_v50, %v1192_v53  ;;  %1243 = vrot.lane.b32.xlu2 %v1196_v54, %s2491_s22  ;;  %v1202_v40 = vrot.slane %v1196_v54, 7  ;;  %v1222_v15 = vrot.slane %v1196_v54, 1 }
 0x4d8   : >> { %v1200_v18 = vsel %vm1199_vm12, %v1180_v50, %v1192_v53 }
 0x4d9   : >> { %1263 = vrot.lane.b32.xlu0 %v1196_v54, %s2492_s8  ;;  %1247 = vrot.lane.b32.xlu1 %v1200_v18, %s2491_s22  ;;  %v1207_v32 = vsel %vm4174_vm5, %v1201_v21, %v1202_v40  ;;  %v1226_v60 = vsel %vm4175_vm4, %v1222_v15, %v1223_v42  ;;  %v1206_v59 = vsel %vm4176_vm10, %v1202_v40, %v1203_v56  ;;  %v1224_v63 = vrot.slane %v1200_v18, 1  ;;  %vm4178_vm5 = vmmov %vm4175_vm4 }
 0x4da   : >> { %v1210_v11 = vsel %vm4149_vm13, %v1207_v32, 4624  ;;  %v1230_v62 = vsel %vm4154_vm15, %v1226_v60, 4624  ;;  %v1211_v47 = vsel %vm4177_vm11, %v1206_v59, 4624  ;;  %v1204_v61 = vrot.slane %v1200_v18, 7 }
 0x4db   : >> { %vm1215_vm12 = vcmp.lt.s32.totalorder %v1196_v54, %v1210_v11  ;;  %vm1217_vm0 = vcmp.lt.s32.totalorder %v1198_v38, %v1211_v47  ;;  %v1225_v31 = vsel %vm4178_vm5, %v1223_v42, %v1224_v63  ;;  %v1227_v28 = vsel %vm4175_vm4, %v1221_v48, %v1222_v15  ;;  %vm4179_vm5 = vmmov %vm4176_vm10 }
 0x4dc   : >> { %v1216_v13 = vsel %vm1215_vm12, %v1196_v54, %v1210_v11  ;;  %v1218_v22 = vsel %vm1217_vm0, %v1198_v38, %v1211_v47  ;;  %v1231_v19 = vsel %vm4114_vm1, %v1225_v31, 4624  ;;  %v1208_v57 = vsel %vm4176_vm10, %v1204_v61, %v1201_v21  ;;  %vm4181_vm12 = vmmov %vm4175_vm4 }
 0x4dd   : >> { %vm1235_vm15 = vcmp.lt.s32.totalorder %v1216_v13, %v1230_v62  ;;  %vm1237_vm13 = vcmp.lt.s32.totalorder %v1218_v22, %v1231_v19  ;;  %v1209_v23 = vsel %vm4168_vm9, %v1208_v57, 4624  ;;  %v1205_v44 = vsel %vm4179_vm5, %v1203_v56, %v1204_v61 }
 0x4de   : >> { %v1236_v36 = vsel %vm1235_vm15, %v1216_v13, %v1230_v62  ;;  %v1238_v43 = vsel %vm1237_vm13, %v1218_v22, %v1231_v19  ;;  %vm1213_vm11 = vcmp.lt.s32.totalorder %v1194_v45, %v1209_v23  ;;  %v1229_v46 = vsel %vm4169_vm14, %v1227_v28, 4624 }
 0x4df   : >> { %1261 = vrot.lane.b32.xlu2 %v1194_v45, %s2492_s8  ;;  %v1214_v35 = vsel %vm1213_vm11, %v1194_v45, %v1209_v23  ;;  %vm4180_vm0 = vnez %v4016_v51  ;;  %v1228_v52 = vsel %vm4181_vm12, %v1224_v63, %v1221_v48  ;;  %vm4182_vm15 = vnez %v4031_v37 }
 0x4e0   : >> { %v1212_v29 = vsel %vm4180_vm0, %v1205_v44, 4624  ;;  %vm1233_vm4 = vcmp.lt.s32.totalorder %v1214_v35, %v1229_v46  ;;  %v1232_v53 = vsel %vm4101_vm6, %v1228_v52, 4624 }
 0x4e1   : >> { %vm1219_vm10 = vcmp.lt.s32.totalorder %v1200_v18, %v1212_v29  ;;  %1265 = vrot.lane.b32.xlu1 %v1198_v38, %s2492_s8  ;;  %v1234_v50 = vsel %vm1233_vm4, %v1214_v35, %v1229_v46  ;;  %vm4183_vm4 = vnez %v4041_v17 }
 0x4e2   : >> { %v1220_v54 = vsel %vm1219_vm10, %v1200_v18, %v1212_v29 }
 0x4e3   : >> { %vm1239_vm13 = vcmp.lt.s32.totalorder %v1220_v54, %v1232_v53 }
 0x4e4   : >> { %v1240_v45 = vsel %vm1239_vm13, %v1220_v54, %v1232_v53 }
 0x4e7   : >> { %1267 = vrot.lane.b32.xlu2 %v1200_v18, %s2492_s8 }
 0x531   : >> { %v1244_v21 = vpop.permute.xlu2 %1243 }
 0x532   : >> { %v1250_v38 = vsel %vm4170_vm3, %v1244_v21, 4624 }
 0x533   : >> { %vm1255_vm12 = vcmp.lt.s32.totalorder %v1236_v36, %v1250_v38 }
 0x534   : >> { %v1256_v11 = vsel %vm1255_vm12, %v1236_v36, %v1250_v38 }
 0x539   : >> { %v1262_v42 = vpop.permute.xlu2 %1261 }
 0x53a   : >> { %v1269_v48 = vsel %vm4171_vm8, %v1262_v42, 4624 }
 0x541   : >> { %v1268_v18 = vpop.permute.xlu2 %1267 }
 0x543   : >> { %v1246_v40 = vpop.permute.xlu0 %1245  ;;  %v1242_v15 = vpop.permute.xlu1 %1241 }
 0x544   : >> { %v1249_v56 = vsel %vm4182_vm15, %v1242_v15, 4624  ;;  %v1251_v61 = vsel %vm4183_vm4, %v1246_v40, 4624  ;;  %vm4190_vm4 = vnez %v4038_v26 }
 0x545   : >> { %vm1253_vm11 = vcmp.lt.s32.totalorder %v1234_v50, %v1249_v56  ;;  %vm1257_vm12 = vcmp.lt.s32.totalorder %v1238_v43, %v1251_v61 }
 0x546   : >> { %v1254_v32 = vsel %vm1253_vm11, %v1234_v50, %v1249_v56  ;;  %vm4184_vm11 = vnez %v4052_v30 }
 0x547   : >> { %vm1273_vm5 = vcmp.lt.s32.totalorder %v1254_v32, %v1269_v48  ;;  %v1272_v31 = vsel %vm4184_vm11, %v1268_v18, 4624  ;;  %vm4186_vm11 = vcmp.lt.s32.totalorder %v2719_v9, 1 }
 0x548   : >> { %v1274_v60 = vsel %vm1273_vm5, %v1254_v32, %v1269_v48 }
 0x549   : >> { %1321 = vrot.lane.b32.xlu0 %v1274_v60, %s2491_s22  ;;  %v1281_v22 = vrot.slane %v1274_v60, 7  ;;  %v1301_v23 = vrot.slane %v1274_v60, 1 }
 0x54b   : >> { %v1264_v59 = vpop.permute.xlu0 %1263  ;;  %v1248_v63 = vpop.permute.xlu1 %1247 }
 0x54c   : >> { %v1270_v62 = vsel %vm4173_vm7, %v1264_v59, 4624  ;;  %v1252_v47 = vsel %vm4172_vm2, %v1248_v63, 4624  ;;  %vm4185_vm2 = vcmp.lt.s32.totalorder %v2719_v9, 7 }
 0x54d   : >> { %vm1275_vm10 = vcmp.lt.s32.totalorder %v1256_v11, %v1270_v62  ;;  %vm1259_vm13 = vcmp.lt.s32.totalorder %v1240_v45, %v1252_v47 }
 0x54e   : >> { %v1276_v28 = vsel %vm1275_vm10, %v1256_v11, %v1270_v62  ;;  %v1260_v13 = vsel %vm1259_vm13, %v1240_v45, %v1252_v47  ;;  %vm4187_vm10 = vnez %v4025_v16  ;;  %vm4188_vm13 = vmmov %vm4186_vm11  ;;  %v1258_v45 = vsel %vm1257_vm12, %v1238_v43, %v1251_v61 }
 0x54f   : >> { %vm1279_vm5 = vcmp.lt.s32.totalorder %v1260_v13, %v1272_v31  ;;  %1323 = vrot.lane.b32.xlu1 %v1276_v28, %s2491_s22  ;;  %v1282_v19 = vrot.slane %v1276_v28, 7  ;;  %v1302_v57 = vrot.slane %v1276_v28, 1 }
 0x550   : >> { %v1280_v36 = vsel %vm1279_vm5, %v1260_v13, %v1272_v31  ;;  %vm4189_vm5 = vmmov %vm4185_vm2 }
 0x551   : >> { %1327 = vrot.lane.b32.xlu0 %v1280_v36, %s2491_s22  ;;  %v1304_v44 = vrot.slane %v1280_v36, 1  ;;  %v1284_v35 = vrot.slane %v1280_v36, 7  ;;  %v1307_v46 = vsel %vm4185_vm2, %v1301_v23, %v1302_v57  ;;  %v1287_v29 = vsel %vm4186_vm11, %v1281_v22, %v1282_v19 }
 0x552   : >> { %v1290_v52 = vsel %vm4187_vm10, %v1287_v29, 4624  ;;  %v1309_v38 = vsel %vm4169_vm14, %v1307_v46, 4624  ;;  %vm4194_vm14 = vnez %v4028_v33 }
 0x553   : >> { %v1266_v50 = vpop.permute.xlu1 %1265  ;;  %v1288_v54 = vsel %vm4188_vm13, %v1284_v35, %v1281_v22  ;;  %vm1295_vm8 = vcmp.lt.s32.totalorder %v1276_v28, %v1290_v52  ;;  %v1308_v53 = vsel %vm4189_vm5, %v1304_v44, %v1301_v23 }
 0x554   : >> { %v1271_v21 = vsel %vm4190_vm4, %v1266_v50, 4624  ;;  %v1289_v42 = vsel %vm4168_vm9, %v1288_v54, 4624  ;;  %v1296_v40 = vsel %vm1295_vm8, %v1276_v28, %v1290_v52  ;;  %vm4191_vm8 = vmmov %vm4189_vm5  ;;  %v1312_v61 = vsel %vm4101_vm6, %v1308_v53, 4624 }
 0x555   : >> { %vm1277_vm2 = vcmp.lt.s32.totalorder %v1258_v45, %v1271_v21  ;;  %vm1293_vm11 = vcmp.lt.s32.totalorder %v1274_v60, %v1289_v42 }
 0x556   : >> { %v1278_v15 = vsel %vm1277_vm2, %v1258_v45, %v1271_v21  ;;  %v1294_v56 = vsel %vm1293_vm11, %v1274_v60, %v1289_v42  ;;  %vm4192_vm2 = vmmov %vm4188_vm13  ;;  %vm4193_vm11 = vnez %v4020_v20 }
 0x557   : >> { %1325 = vrot.lane.b32.xlu2 %v1278_v15, %s2491_s22  ;;  %1341 = vrot.lane.b32.xlu1 %v1274_v60, %s2492_s8  ;;  %v1283_v48 = vrot.slane %v1278_v15, 7  ;;  %v1303_v43 = vrot.slane %v1278_v15, 1  ;;  %vm1313_vm12 = vcmp.lt.s32.totalorder %v1294_v56, %v1309_v38 }
 0x558   : >> { %v1314_v32 = vsel %vm1313_vm12, %v1294_v56, %v1309_v38 }
 0x559   : >> { %1345 = vrot.lane.b32.xlu0 %v1278_v15, %s2492_s8  ;;  %v1286_v18 = vsel %vm4188_vm13, %v1282_v19, %v1283_v48  ;;  %v1305_v59 = vsel %vm4191_vm8, %v1303_v43, %v1304_v44  ;;  %v1306_v63 = vsel %vm4189_vm5, %v1302_v57, %v1303_v43  ;;  %v1285_v11 = vsel %vm4192_vm2, %v1283_v48, %v1284_v35 }
 0x55a   : >> { %v1291_v60 = vsel %vm4193_vm11, %v1286_v18, 4624  ;;  %v1310_v62 = vsel %vm4194_vm14, %v1306_v63, 4624  ;;  %v1292_v47 = vsel %vm4180_vm0, %v1285_v11, 4624  ;;  %v1311_v13 = vsel %vm4114_vm1, %v1305_v59, 4624 }
 0x55b   : >> { %vm1297_vm12 = vcmp.lt.s32.totalorder %v1278_v15, %v1291_v60  ;;  %vm1315_vm13 = vcmp.lt.s32.totalorder %v1296_v40, %v1310_v62  ;;  %vm1299_vm9 = vcmp.lt.s32.totalorder %v1280_v36, %v1292_v47 }
 0x55c   : >> { %v1298_v31 = vsel %vm1297_vm12, %v1278_v15, %v1291_v60  ;;  %v1316_v22 = vsel %vm1315_vm13, %v1296_v40, %v1310_v62  ;;  %v1300_v19 = vsel %vm1299_vm9, %v1280_v36, %v1292_v47  ;;  %vm4195_vm12 = vnez %v4041_v17 }
 0x55d   : >> { %vm1317_vm8 = vcmp.lt.s32.totalorder %v1298_v31, %v1311_v13  ;;  %vm1319_vm5 = vcmp.lt.s32.totalorder %v1300_v19, %v1312_v61 }
 0x55e   : >> { %v1318_v57 = vsel %vm1317_vm8, %v1298_v31, %v1311_v13  ;;  %v1320_v23 = vsel %vm1319_vm5, %v1300_v19, %v1312_v61  ;;  %vm4196_vm5 = vnez %v4049_v25 }
 0x55f   : >> { %1343 = vrot.lane.b32.xlu2 %v1276_v28, %s2492_s8  ;;  %1347 = vrot.lane.b32.xlu1 %v1280_v36, %s2492_s8 }
 0x5b1   : >> { %v1326_v44 = vpop.permute.xlu2 %1325 }
 0x5b2   : >> { %v1331_v28 = vsel %vm4195_vm12, %v1326_v44, 4624 }
 0x5b3   : >> { %vm1337_vm8 = vcmp.lt.s32.totalorder %v1318_v57, %v1331_v28 }
 0x5b4   : >> { %v1338_v48 = vsel %vm1337_vm8, %v1318_v57, %v1331_v28 }
 0x5b9   : >> { %v1344_v46 = vpop.permute.xlu2 %1343 }
 0x5ba   : >> { %v1350_v54 = vsel %vm4173_vm7, %v1344_v46, 4624  ;;  %vm4197_vm7 = vnez %v4034_v49 }
 0x5bb   : >> { %v1322_v35 = vpop.permute.xlu0 %1321 }
 0x5bc   : >> { %v1329_v53 = vsel %vm4182_vm15, %v1322_v35, 4624 }
 0x5bd   : >> { %vm1333_vm13 = vcmp.lt.s32.totalorder %v1314_v32, %v1329_v53 }
 0x5be   : >> { %v1334_v42 = vsel %vm1333_vm13, %v1314_v32, %v1329_v53  ;;  %vm4198_vm13 = vcmp.lt.s32.totalorder %v2719_v9, 7 }
 0x5c1   : >> { %v1324_v29 = vpop.permute.xlu1 %1323 }
 0x5c2   : >> { %v1330_v52 = vsel %vm4170_vm3, %v1324_v29, 4624 }
 0x5c3   : >> { %vm1335_vm2 = vcmp.lt.s32.totalorder %v1316_v22, %v1330_v52  ;;  %v1328_v50 = vpop.permute.xlu0 %1327 }
 0x5c4   : >> { %v1336_v45 = vsel %vm1335_vm2, %v1316_v22, %v1330_v52  ;;  %v1332_v15 = vsel %vm4197_vm7, %v1328_v50, 4624  ;;  %vm4202_vm7 = vnez %v4052_v30 }
 0x5c5   : >> { %vm1355_vm9 = vcmp.lt.s32.totalorder %v1336_v45, %v1350_v54 }
 0x5c6   : >> { %v1356_v36 = vsel %vm1355_vm9, %v1336_v45, %v1350_v54  ;;  %vm1339_vm9 = vcmp.lt.s32.totalorder %v1320_v23, %v1332_v15 }
 0x5c7   : >> { %1403 = vrot.lane.b32.xlu0 %v1356_v36, %s2491_s22  ;;  %v1382_v18 = vrot.slane %v1356_v36, 1  ;;  %v1362_v32 = vrot.slane %v1356_v36, 7  ;;  %v1340_v22 = vsel %vm1339_vm9, %v1320_v23, %v1332_v15 }
 0x5c9   : >> { %v1342_v21 = vpop.permute.xlu1 %1341 }
 0x5ca   : >> { %v1349_v40 = vsel %vm4196_vm5, %v1342_v21, 4624 }
 0x5cb   : >> { %vm1353_vm3 = vcmp.lt.s32.totalorder %v1334_v42, %v1349_v40  ;;  %v1346_v56 = vpop.permute.xlu0 %1345 }
 0x5cc   : >> { %v1354_v38 = vsel %vm1353_vm3, %v1334_v42, %v1349_v40  ;;  %v1351_v43 = vsel %vm4190_vm4, %v1346_v56, 4624  ;;  %vm4199_vm3 = vcmp.lt.s32.totalorder %v2719_v9, 1 }
 0x5cd   : >> { %vm1357_vm2 = vcmp.lt.s32.totalorder %v1338_v48, %v1351_v43  ;;  %1401 = vrot.lane.b32.xlu2 %v1354_v38, %s2491_s22  ;;  %v1361_v59 = vrot.slane %v1354_v38, 7  ;;  %v1381_v63 = vrot.slane %v1354_v38, 1  ;;  %vm4201_vm4 = vmmov %vm4199_vm3 }
 0x5ce   : >> { %v1358_v11 = vsel %vm1357_vm2, %v1338_v48, %v1351_v43  ;;  %vm4200_vm2 = vmmov %vm4198_vm13 }
 0x5cf   : >> { %1405 = vrot.lane.b32.xlu1 %v1358_v11, %s2491_s22  ;;  %1421 = vrot.lane.b32.xlu0 %v1354_v38, %s2492_s8  ;;  %v1387_v60 = vsel %vm4198_vm13, %v1381_v63, %v1382_v18  ;;  %v1363_v62 = vrot.slane %v1358_v11, 7  ;;  %v1367_v47 = vsel %vm4199_vm3, %v1361_v59, %v1362_v32  ;;  %v1383_v61 = vrot.slane %v1358_v11, 1 }
 0x5d0   : >> { %v1370_v31 = vsel %vm4187_vm10, %v1367_v47, 4624 }
 0x5d1   : >> { %v1348_v13 = vpop.permute.xlu1 %1347  ;;  %vm1375_vm8 = vcmp.lt.s32.totalorder %v1356_v36, %v1370_v31  ;;  %v1386_v19 = vsel %vm4200_vm2, %v1382_v18, %v1383_v61  ;;  %v1366_v57 = vsel %vm4201_vm4, %v1362_v32, %v1363_v62 }
 0x5d2   : >> { %v1352_v44 = vsel %vm4202_vm7, %v1348_v13, 4624  ;;  %v1376_v35 = vsel %vm1375_vm8, %v1356_v36, %v1370_v31  ;;  %v1390_v46 = vsel %vm4194_vm14, %v1386_v19, 4624  ;;  %v1371_v29 = vsel %vm4193_vm11, %v1366_v57, 4624  ;;  %vm4203_vm8 = vmmov %vm4201_vm4 }
 0x5d3   : >> { %vm1359_vm13 = vcmp.lt.s32.totalorder %v1340_v22, %v1352_v44  ;;  %vm1395_vm3 = vcmp.lt.s32.totalorder %v1376_v35, %v1390_v46  ;;  %vm1377_vm9 = vcmp.lt.s32.totalorder %v1358_v11, %v1371_v29  ;;  %vm4206_vm11 = vnez %v4014_v39 }
 0x5d4   : >> { %v1360_v23 = vsel %vm1359_vm13, %v1340_v22, %v1352_v44  ;;  %v1396_v52 = vsel %vm1395_vm3, %v1376_v35, %v1390_v46  ;;  %v1378_v50 = vsel %vm1377_vm9, %v1358_v11, %v1371_v29  ;;  %vm4204_vm13 = vnez %v4012_v34  ;;  %vm4205_vm3 = vmmov %vm4200_vm2 }
 0x5d5   : >> { %1407 = vrot.lane.b32.xlu2 %v1360_v23, %s2491_s22  ;;  %v1364_v54 = vrot.slane %v1360_v23, 7  ;;  %v1384_v53 = vrot.slane %v1360_v23, 1  ;;  %v1389_v15 = vsel %vm4206_vm11, %v1387_v60, 4624 }
 0x5d7   : >> { %1423 = vrot.lane.b32.xlu1 %v1356_v36, %s2492_s8  ;;  %1427 = vrot.lane.b32.xlu0 %v1360_v23, %s2492_s8  ;;  %v1368_v45 = vsel %vm4201_vm4, %v1364_v54, %v1361_v59  ;;  %v1365_v28 = vsel %vm4203_vm8, %v1363_v62, %v1364_v54  ;;  %v1388_v21 = vsel %vm4200_vm2, %v1384_v53, %v1381_v63 }
 0x5d8   : >> { %v1369_v42 = vsel %vm4204_vm13, %v1368_v45, 4624  ;;  %v1372_v40 = vsel %vm4180_vm0, %v1365_v28, 4624  ;;  %v1385_v36 = vsel %vm4205_vm3, %v1383_v61, %v1384_v53  ;;  %v1392_v18 = vsel %vm4101_vm6, %v1388_v21, 4624 }
 0x5d9   : >> { %vm1373_vm9 = vcmp.lt.s32.totalorder %v1354_v38, %v1369_v42  ;;  %vm1379_vm4 = vcmp.lt.s32.totalorder %v1360_v23, %v1372_v40  ;;  %v1391_v56 = vsel %vm4114_vm1, %v1385_v36, 4624 }
 0x5da   : >> { %v1374_v48 = vsel %vm1373_vm9, %v1354_v38, %v1369_v42  ;;  %v1380_v43 = vsel %vm1379_vm4, %v1360_v23, %v1372_v40  ;;  %vm1397_vm8 = vcmp.lt.s32.totalorder %v1378_v50, %v1391_v56 }
 0x5db   : >> { %vm1393_vm2 = vcmp.lt.s32.totalorder %v1374_v48, %v1389_v15  ;;  %vm1399_vm13 = vcmp.lt.s32.totalorder %v1380_v43, %v1392_v18  ;;  %v1398_v59 = vsel %vm1397_vm8, %v1378_v50, %v1391_v56  ;;  %vm4208_vm8 = vnez %v4038_v26 }
 0x5dc   : >> { %v1394_v63 = vsel %vm1393_vm2, %v1374_v48, %v1389_v15  ;;  %v1400_v32 = vsel %vm1399_vm13, %v1380_v43, %v1392_v18  ;;  %vm4207_vm13 = vnez %v4034_v49  ;;  %vm4209_vm2 = vnez %v4043_v12 }
 0x5dd   : >> { %1425 = vrot.lane.b32.xlu2 %v1358_v11, %s2492_s8 }
 0x627   : >> { %v1402_v62 = vpop.permute.xlu2 %1401 }
 0x628   : >> { %v1409_v61 = vsel %vm4182_vm15, %v1402_v62, 4624 }
 0x629   : >> { %vm1413_vm3 = vcmp.lt.s32.totalorder %v1394_v63, %v1409_v61 }
 0x62a   : >> { %v1414_v19 = vsel %vm1413_vm3, %v1394_v63, %v1409_v61 }
 0x62f   : >> { %v1408_v47 = vpop.permute.xlu2 %1407 }
 0x630   : >> { %v1412_v11 = vsel %vm4207_vm13, %v1408_v47, 4624  ;;  %vm4210_vm13 = vnez %v4047_v24 }
 0x631   : >> { %vm1419_vm3 = vcmp.lt.s32.totalorder %v1400_v32, %v1412_v11 }
 0x632   : >> { %v1420_v28 = vsel %vm1419_vm3, %v1400_v32, %v1412_v11 }
 0x637   : >> { %v1426_v38 = vpop.permute.xlu2 %1425 }
 0x638   : >> { %v1431_v44 = vsel %vm4208_vm8, %v1426_v38, 4624 }
 0x639   : >> { %v1404_v60 = vpop.permute.xlu0 %1403 }
 0x63a   : >> { %v1410_v35 = vsel %vm4209_vm2, %v1404_v60, 4624 }
 0x641   : >> { %v1406_v31 = vpop.permute.xlu1 %1405  ;;  %v1422_v13 = vpop.permute.xlu0 %1421 }
 0x642   : >> { %v1411_v22 = vsel %vm4195_vm12, %v1406_v31, 4624  ;;  %v1429_v57 = vsel %vm4196_vm5, %v1422_v13, 4624  ;;  %vm1415_vm12 = vcmp.lt.s32.totalorder %v1396_v52, %v1410_v35 }
 0x643   : >> { %vm1417_vm9 = vcmp.lt.s32.totalorder %v1398_v59, %v1411_v22  ;;  %vm1433_vm4 = vcmp.lt.s32.totalorder %v1414_v19, %v1429_v57  ;;  %v1416_v53 = vsel %vm1415_vm12, %v1396_v52, %v1410_v35  ;;  %vm4212_vm12 = vcmp.lt.s32.totalorder %v2719_v9, 7 }
 0x644   : >> { %v1418_v46 = vsel %vm1417_vm9, %v1398_v59, %v1411_v22  ;;  %v1434_v29 = vsel %vm1433_vm4, %v1414_v19, %v1429_v57 }
 0x645   : >> { %vm1437_vm15 = vcmp.lt.s32.totalorder %v1418_v46, %v1431_v44  ;;  %1481 = vrot.lane.b32.xlu1 %v1434_v29, %s2491_s22  ;;  %v1441_v42 = vrot.slane %v1434_v29, 7  ;;  %v1461_v56 = vrot.slane %v1434_v29, 1 }
 0x646   : >> { %v1438_v23 = vsel %vm1437_vm15, %v1418_v46, %v1431_v44  ;;  %vm4211_vm15 = vcmp.lt.s32.totalorder %v2719_v9, 1 }
 0x647   : >> { %1485 = vrot.lane.b32.xlu0 %v1438_v23, %s2491_s22  ;;  %v1463_v15 = vrot.slane %v1438_v23, 1  ;;  %v1443_v59 = vrot.slane %v1438_v23, 7  ;;  %vm4213_vm3 = vmmov %vm4211_vm15 }
 0x648   : >> { %vm4216_vm8 = vmmov %vm4213_vm3 }
 0x649   : >> { %v1424_v50 = vpop.permute.xlu1 %1423  ;;  %v1428_v54 = vpop.permute.xlu0 %1427 }
 0x64a   : >> { %v1430_v45 = vsel %vm4210_vm13, %v1424_v50, 4624  ;;  %v1432_v21 = vsel %vm4202_vm7, %v1428_v54, 4624 }
 0x64b   : >> { %vm1435_vm9 = vcmp.lt.s32.totalorder %v1416_v53, %v1430_v45  ;;  %vm1439_vm4 = vcmp.lt.s32.totalorder %v1420_v28, %v1432_v21 }
 0x64c   : >> { %v1436_v40 = vsel %vm1435_vm9, %v1416_v53, %v1430_v45  ;;  %v1440_v36 = vsel %vm1439_vm4, %v1420_v28, %v1432_v21  ;;  %vm4214_vm9 = vmmov %vm4212_vm12  ;;  %vm4215_vm4 = vnez %v4012_v34 }
 0x64d   : >> { %1483 = vrot.lane.b32.xlu2 %v1436_v40, %s2491_s22  ;;  %1487 = vrot.lane.b32.xlu1 %v1440_v36, %s2491_s22  ;;  %v1442_v48 = vrot.slane %v1436_v40, 7  ;;  %v1462_v52 = vrot.slane %v1436_v40, 1  ;;  %v1444_v43 = vrot.slane %v1440_v36, 7  ;;  %v1464_v18 = vrot.slane %v1440_v36, 1 }
 0x64f   : >> { %1503 = vrot.lane.b32.xlu0 %v1436_v40, %s2492_s8  ;;  %v1447_v63 = vsel %vm4211_vm15, %v1441_v42, %v1442_v48  ;;  %v1466_v32 = vsel %vm4212_vm12, %v1462_v52, %v1463_v15  ;;  %v1448_v62 = vsel %vm4213_vm3, %v1444_v43, %v1441_v42  ;;  %v1467_v47 = vsel %vm4214_vm9, %v1461_v56, %v1462_v52  ;;  %vm4217_vm3 = vmmov %vm4214_vm9 }
 0x650   : >> { %v1450_v60 = vsel %vm4187_vm10, %v1447_v63, 4624  ;;  %v1470_v61 = vsel %vm4194_vm14, %v1466_v32, 4624  ;;  %v1449_v38 = vsel %vm4215_vm4, %v1448_v62, 4624  ;;  %v1469_v31 = vsel %vm4206_vm11, %v1467_v47, 4624  ;;  %vm4219_vm11 = vmmov %vm4216_vm8 }
 0x651   : >> { %vm1455_vm15 = vcmp.lt.s32.totalorder %v1436_v40, %v1450_v60  ;;  %vm1453_vm12 = vcmp.lt.s32.totalorder %v1434_v29, %v1449_v38  ;;  %v1446_v13 = vsel %vm4216_vm8, %v1442_v48, %v1443_v59  ;;  %v1465_v22 = vsel %vm4217_vm3, %v1463_v15, %v1464_v18 }
 0x652   : >> { %v1456_v19 = vsel %vm1455_vm15, %v1436_v40, %v1450_v60  ;;  %v1454_v57 = vsel %vm1453_vm12, %v1434_v29, %v1449_v38  ;;  %vm4218_vm9 = vnez %v4020_v20  ;;  %v1471_v44 = vsel %vm4114_vm1, %v1465_v22, 4624  ;;  %vm4220_vm12 = vmmov %vm4217_vm3 }
 0x653   : >> { %v1451_v11 = vsel %vm4218_vm9, %v1446_v13, 4624  ;;  %vm1475_vm14 = vcmp.lt.s32.totalorder %v1456_v19, %v1470_v61  ;;  %vm1473_vm10 = vcmp.lt.s32.totalorder %v1454_v57, %v1469_v31  ;;  %v1445_v35 = vsel %vm4219_vm11, %v1443_v59, %v1444_v43 }
 0x654   : >> { %vm1457_vm4 = vcmp.lt.s32.totalorder %v1438_v23, %v1451_v11  ;;  %v1476_v46 = vsel %vm1475_vm14, %v1456_v19, %v1470_v61  ;;  %v1474_v50 = vsel %vm1473_vm10, %v1454_v57, %v1469_v31  ;;  %v1452_v53 = vsel %vm4180_vm0, %v1445_v35, 4624 }
 0x655   : >> { %v1458_v54 = vsel %vm1457_vm4, %v1438_v23, %v1451_v11  ;;  %1501 = vrot.lane.b32.xlu2 %v1434_v29, %s2492_s8  ;;  %1505 = vrot.lane.b32.xlu1 %v1438_v23, %s2492_s8  ;;  %vm1459_vm15 = vcmp.lt.s32.totalorder %v1440_v36, %v1452_v53  ;;  %v1468_v45 = vsel %vm4220_vm12, %v1464_v18, %v1461_v56 }
 0x656   : >> { %vm1477_vm8 = vcmp.lt.s32.totalorder %v1458_v54, %v1471_v44  ;;  %v1460_v21 = vsel %vm1459_vm15, %v1440_v36, %v1452_v53  ;;  %v1472_v42 = vsel %vm4101_vm6, %v1468_v45, 4624  ;;  %vm4221_vm10 = vnez %v4031_v37 }
 0x657   : >> { %v1478_v28 = vsel %vm1477_vm8, %v1458_v54, %v1471_v44  ;;  %vm1479_vm14 = vcmp.lt.s32.totalorder %v1460_v21, %v1472_v42  ;;  %vm4222_vm8 = vnez %v4041_v17  ;;  %vm4223_vm15 = vnez %v4034_v49 }
 0x658   : >> { %v1480_v40 = vsel %vm1479_vm14, %v1460_v21, %v1472_v42 }
 0x65d   : >> { %1507 = vrot.lane.b32.xlu2 %v1440_v36, %s2492_s8 }
 0x6a7   : >> { %v1484_v15 = vpop.permute.xlu2 %1483 }
 0x6a8   : >> { %v1490_v18 = vsel %vm4209_vm2, %v1484_v15, 4624 }
 0x6a9   : >> { %vm1495_vm3 = vcmp.lt.s32.totalorder %v1476_v46, %v1490_v18 }
 0x6aa   : >> { %v1496_v38 = vsel %vm1495_vm3, %v1476_v46, %v1490_v18  ;;  %vm4224_vm3 = vcmp.lt.s32.totalorder %v2719_v9, 1 }
 0x6af   : >> { %v1502_v48 = vpop.permute.xlu2 %1501 }
 0x6b0   : >> { %v1509_v56 = vsel %vm4196_vm5, %v1502_v48, 4624  ;;  %vm4230_vm5 = vnez %v4025_v16 }
 0x6b7   : >> { %v1482_v52 = vpop.permute.xlu1 %1481  ;;  %v1508_v36 = vpop.permute.xlu2 %1507 }
 0x6b8   : >> { %v1489_v29 = vsel %vm4221_vm10, %v1482_v52, 4624  ;;  %v1512_v60 = vsel %vm4202_vm7, %v1508_v36, 4624  ;;  %vm4228_vm7 = vnez %v4038_v26 }
 0x6b9   : >> { %vm1493_vm11 = vcmp.lt.s32.totalorder %v1474_v50, %v1489_v29  ;;  %v1486_v23 = vpop.permute.xlu0 %1485 }
 0x6ba   : >> { %v1494_v43 = vsel %vm1493_vm11, %v1474_v50, %v1489_v29  ;;  %v1491_v32 = vsel %vm4222_vm8, %v1486_v23, 4624 }
 0x6bb   : >> { %vm1513_vm4 = vcmp.lt.s32.totalorder %v1494_v43, %v1509_v56  ;;  %vm1497_vm14 = vcmp.lt.s32.totalorder %v1478_v28, %v1491_v32 }
 0x6bc   : >> { %v1514_v59 = vsel %vm1513_vm4, %v1494_v43, %v1509_v56  ;;  %v1498_v42 = vsel %vm1497_vm14, %v1478_v28, %v1491_v32 }
 0x6bd   : >> { %1561 = vrot.lane.b32.xlu0 %v1514_v59, %s2491_s22  ;;  %v1521_v19 = vrot.slane %v1514_v59, 7  ;;  %v1541_v57 = vrot.slane %v1514_v59, 1 }
 0x6bf   : >> { %v1488_v63 = vpop.permute.xlu1 %1487 }
 0x6c0   : >> { %v1492_v62 = vsel %vm4223_vm15, %v1488_v63, 4624  ;;  %vm4229_vm15 = vnez %v4012_v34 }
 0x6c1   : >> { %vm1499_vm12 = vcmp.lt.s32.totalorder %v1480_v40, %v1492_v62  ;;  %v1504_v47 = vpop.permute.xlu0 %1503 }
 0x6c2   : >> { %v1500_v61 = vsel %vm1499_vm12, %v1480_v40, %v1492_v62  ;;  %v1510_v31 = vsel %vm4210_vm13, %v1504_v47, 4624  ;;  %vm4225_vm12 = vcmp.lt.s32.totalorder %v2719_v9, 7 }
 0x6c3   : >> { %vm1519_vm11 = vcmp.lt.s32.totalorder %v1500_v61, %v1512_v60  ;;  %vm1515_vm4 = vcmp.lt.s32.totalorder %v1496_v38, %v1510_v31 }
 0x6c4   : >> { %v1520_v13 = vsel %vm1519_vm11, %v1500_v61, %v1512_v60  ;;  %v1516_v22 = vsel %vm1515_vm4, %v1496_v38, %v1510_v31  ;;  %vm4226_vm11 = vmmov %vm4224_vm3 }
 0x6c5   : >> { %1563 = vrot.lane.b32.xlu1 %v1516_v22, %s2491_s22  ;;  %1567 = vrot.lane.b32.xlu0 %v1520_v13, %s2491_s22  ;;  %v1522_v11 = vrot.slane %v1516_v22, 7  ;;  %v1544_v44 = vrot.slane %v1520_v13, 1  ;;  %v1542_v35 = vrot.slane %v1516_v22, 1  ;;  %v1524_v50 = vrot.slane %v1520_v13, 7  ;;  %vm4227_vm4 = vmmov %vm4225_vm12 }
 0x6c7   : >> { %v1506_v54 = vpop.permute.xlu1 %1505  ;;  %v1528_v46 = vsel %vm4224_vm3, %v1524_v50, %v1521_v19  ;;  %v1547_v53 = vsel %vm4225_vm12, %v1541_v57, %v1542_v35  ;;  %v1527_v45 = vsel %vm4226_vm11, %v1521_v19, %v1522_v11  ;;  %v1548_v21 = vsel %vm4227_vm4, %v1544_v44, %v1541_v57 }
 0x6c8   : >> { %v1511_v40 = vsel %vm4228_vm7, %v1506_v54, 4624  ;;  %v1529_v15 = vsel %vm4229_vm15, %v1528_v46, 4624  ;;  %v1530_v48 = vsel %vm4230_vm5, %v1527_v45, 4624  ;;  %vm4231_vm11 = vnez %v4014_v39 }
 0x6c9   : >> { %vm1517_vm3 = vcmp.lt.s32.totalorder %v1498_v42, %v1511_v40  ;;  %vm1533_vm10 = vcmp.lt.s32.totalorder %v1514_v59, %v1529_v15  ;;  %vm1535_vm12 = vcmp.lt.s32.totalorder %v1516_v22, %v1530_v48  ;;  %v1549_v23 = vsel %vm4231_vm11, %v1547_v53, 4624 }
 0x6ca   : >> { %v1518_v52 = vsel %vm1517_vm3, %v1498_v42, %v1511_v40  ;;  %v1534_v29 = vsel %vm1533_vm10, %v1514_v59, %v1529_v15  ;;  %v1536_v56 = vsel %vm1535_vm12, %v1516_v22, %v1530_v48  ;;  %vm4232_vm4 = vcmp.lt.s32.totalorder %v2719_v9, 1 }
 0x6cb   : >> { %1565 = vrot.lane.b32.xlu2 %v1518_v52, %s2491_s22  ;;  %v1523_v28 = vrot.slane %v1518_v52, 7  ;;  %v1543_v43 = vrot.slane %v1518_v52, 1  ;;  %vm1553_vm14 = vcmp.lt.s32.totalorder %v1534_v29, %v1549_v23  ;;  %vm4233_vm3 = vcmp.lt.s32.totalorder %v2719_v9, 7 }
 0x6cc   : >> { %v1554_v18 = vsel %vm1553_vm14, %v1534_v29, %v1549_v23  ;;  %vm4234_vm10 = vmmov %vm4233_vm3  ;;  %vm4235_vm12 = vnez %v4028_v33  ;;  %v1552_v57 = vsel %vm4101_vm6, %v1548_v21, 4624 }
 0x6cd   : >> { %1581 = vrot.lane.b32.xlu1 %v1514_v59, %s2492_s8  ;;  %1585 = vrot.lane.b32.xlu0 %v1518_v52, %s2492_s8  ;;  %v1526_v36 = vsel %vm4232_vm4, %v1522_v11, %v1523_v28  ;;  %v1545_v63 = vsel %vm4233_vm3, %v1543_v43, %v1544_v44  ;;  %v1546_v32 = vsel %vm4234_vm10, %v1542_v35, %v1543_v43  ;;  %vm4236_vm14 = vmmov %vm4232_vm4 }
 0x6ce   : >> { %v1531_v62 = vsel %vm4218_vm9, %v1526_v36, 4624  ;;  %v1550_v47 = vsel %vm4235_vm12, %v1546_v32, 4624  ;;  %v1525_v59 = vsel %vm4236_vm14, %v1523_v28, %v1524_v50  ;;  %v1551_v38 = vsel %vm4114_vm1, %v1545_v63, 4624 }
 0x6cf   : >> { %vm1537_vm11 = vcmp.lt.s32.totalorder %v1518_v52, %v1531_v62  ;;  %vm1555_vm15 = vcmp.lt.s32.totalorder %v1536_v56, %v1550_v47  ;;  %v1532_v60 = vsel %vm4180_vm0, %v1525_v59, 4624 }
 0x6d0   : >> { %v1538_v61 = vsel %vm1537_vm11, %v1518_v52, %v1531_v62  ;;  %v1556_v31 = vsel %vm1555_vm15, %v1536_v56, %v1550_v47  ;;  %vm1539_vm4 = vcmp.lt.s32.totalorder %v1520_v13, %v1532_v60  ;;  %vm4237_vm11 = vnez %v4031_v37 }
 0x6d1   : >> { %vm1557_vm3 = vcmp.lt.s32.totalorder %v1538_v61, %v1551_v38  ;;  %v1540_v19 = vsel %vm1539_vm4, %v1520_v13, %v1532_v60 }
 0x6d2   : >> { %v1558_v11 = vsel %vm1557_vm3, %v1538_v61, %v1551_v38  ;;  %vm1559_vm10 = vcmp.lt.s32.totalorder %v1540_v19, %v1552_v57 }
 0x6d3   : >> { %1583 = vrot.lane.b32.xlu2 %v1516_v22, %s2492_s8  ;;  %v1560_v44 = vsel %vm1559_vm10, %v1540_v19, %v1552_v57  ;;  %vm4238_vm10 = vnez %v4049_v25 }
 0x6d5   : >> { %1587 = vrot.lane.b32.xlu1 %v1520_v13, %s2492_s8 }
 0x725   : >> { %v1566_v35 = vpop.permute.xlu2 %1565 }
 0x726   : >> { %v1571_v42 = vsel %vm4222_vm8, %v1566_v35, 4624 }
 0x727   : >> { %vm1577_vm4 = vcmp.lt.s32.totalorder %v1558_v11, %v1571_v42 }
 0x728   : >> { %v1578_v23 = vsel %vm1577_vm4, %v1558_v11, %v1571_v42  ;;  %vm4240_vm4 = vcmp.lt.s32.totalorder %v2719_v9, 7 }
 0x72d   : >> { %v1584_v54 = vpop.permute.xlu2 %1583 }
 0x72e   : >> { %v1590_v21 = vsel %vm4210_vm13, %v1584_v54, 4624  ;;  %vm4239_vm13 = vnez %v4034_v49 }
 0x72f   : >> { %v1562_v50 = vpop.permute.xlu0 %1561 }
 0x730   : >> { %v1569_v22 = vsel %vm4237_vm11, %v1562_v50, 4624 }
 0x731   : >> { %vm1573_vm3 = vcmp.lt.s32.totalorder %v1554_v18, %v1569_v22 }
 0x732   : >> { %v1574_v52 = vsel %vm1573_vm3, %v1554_v18, %v1569_v22  ;;  %vm4241_vm3 = vcmp.lt.s32.totalorder %v2719_v9, 1 }
 0x737   : >> { %v1564_v46 = vpop.permute.xlu1 %1563  ;;  %v1568_v53 = vpop.permute.xlu0 %1567 }
 0x738   : >> { %v1570_v45 = vsel %vm4209_vm2, %v1564_v46, 4624  ;;  %v1572_v28 = vsel %vm4239_vm13, %v1568_v53, 4624 }
 0x739   : >> { %vm1575_vm15 = vcmp.lt.s32.totalorder %v1556_v31, %v1570_v45 }
 0x73a   : >> { %v1576_v40 = vsel %vm1575_vm15, %v1556_v31, %v1570_v45 }
 0x73b   : >> { %vm1595_vm14 = vcmp.lt.s32.totalorder %v1576_v40, %v1590_v21 }
 0x73c   : >> { %v1596_v13 = vsel %vm1595_vm14, %v1576_v40, %v1590_v21  ;;  %vm1579_vm14 = vcmp.lt.s32.totalorder %v1560_v44, %v1572_v28 }
 0x73d   : >> { %1643 = vrot.lane.b32.xlu0 %v1596_v13, %s2491_s22  ;;  %v1622_v63 = vrot.slane %v1596_v13, 1  ;;  %v1602_v32 = vrot.slane %v1596_v13, 7  ;;  %v1580_v35 = vsel %vm1579_vm14, %v1560_v44, %v1572_v28 }
 0x73f   : >> { %v1582_v15 = vpop.permute.xlu1 %1581  ;;  %v1586_v48 = vpop.permute.xlu0 %1585 }
 0x740   : >> { %v1589_v29 = vsel %vm4238_vm10, %v1582_v15, 4624  ;;  %v1591_v56 = vsel %vm4228_vm7, %v1586_v48, 4624 }
 0x741   : >> { %vm1593_vm15 = vcmp.lt.s32.totalorder %v1574_v52, %v1589_v29  ;;  %vm1597_vm2 = vcmp.lt.s32.totalorder %v1578_v23, %v1591_v56 }
 0x742   : >> { %v1594_v43 = vsel %vm1593_vm15, %v1574_v52, %v1589_v29  ;;  %v1598_v36 = vsel %vm1597_vm2, %v1578_v23, %v1591_v56  ;;  %vm4242_vm2 = vmmov %vm4240_vm4 }
 0x743   : >> { %1645 = vrot.lane.b32.xlu1 %v1598_v36, %s2491_s22  ;;  %1641 = vrot.lane.b32.xlu2 %v1594_v43, %s2491_s22  ;;  %v1601_v18 = vrot.slane %v1594_v43, 7  ;;  %v1621_v62 = vrot.slane %v1594_v43, 1  ;;  %v1603_v47 = vrot.slane %v1598_v36, 7  ;;  %v1623_v59 = vrot.slane %v1598_v36, 1  ;;  %vm4243_vm15 = vmmov %vm4241_vm3 }
 0x744   : >> { %vm4245_vm14 = vmmov %vm4243_vm15 }
 0x745   : >> { %1661 = vrot.lane.b32.xlu0 %v1594_v43, %s2492_s8  ;;  %v1627_v60 = vsel %vm4240_vm4, %v1621_v62, %v1622_v63  ;;  %v1607_v61 = vsel %vm4241_vm3, %v1601_v18, %v1602_v32  ;;  %v1626_v38 = vsel %vm4242_vm2, %v1622_v63, %v1623_v59  ;;  %v1606_v31 = vsel %vm4243_vm15, %v1602_v32, %v1603_v47 }
 0x746   : >> { %v1610_v19 = vsel %vm4230_vm5, %v1607_v61, 4624  ;;  %v1611_v57 = vsel %vm4218_vm9, %v1606_v31, 4624  ;;  %vm4244_vm4 = vnez %v4052_v30  ;;  %v1630_v46 = vsel %vm4235_vm12, %v1626_v38, 4624 }
 0x747   : >> { %v1588_v11 = vpop.permute.xlu1 %1587  ;;  %vm1615_vm13 = vcmp.lt.s32.totalorder %v1596_v13, %v1610_v19  ;;  %vm1617_vm10 = vcmp.lt.s32.totalorder %v1598_v36, %v1611_v57 }
 0x748   : >> { %v1592_v50 = vsel %vm4244_vm4, %v1588_v11, 4624  ;;  %v1616_v54 = vsel %vm1615_vm13, %v1596_v13, %v1610_v19  ;;  %v1618_v53 = vsel %vm1617_vm10, %v1598_v36, %v1611_v57  ;;  %vm4246_vm13 = vmmov %vm4245_vm14  ;;  %vm4247_vm10 = vcmp.lt.s32.totalorder %v2719_v9, 7 }
 0x749   : >> { %vm1599_vm3 = vcmp.lt.s32.totalorder %v1580_v35, %v1592_v50  ;;  %vm1635_vm2 = vcmp.lt.s32.totalorder %v1616_v54, %v1630_v46  ;;  %vm4248_vm15 = vmmov %vm4247_vm10 }
 0x74a   : >> { %v1600_v45 = vsel %vm1599_vm3, %v1580_v35, %v1592_v50  ;;  %v1636_v42 = vsel %vm1635_vm2, %v1616_v54, %v1630_v46  ;;  %vm4249_vm3 = vnez %v4012_v34 }
 0x74b   : >> { %1663 = vrot.lane.b32.xlu1 %v1596_v13, %s2492_s8  ;;  %1647 = vrot.lane.b32.xlu2 %v1600_v45, %s2491_s22  ;;  %v1604_v21 = vrot.slane %v1600_v45, 7  ;;  %v1624_v44 = vrot.slane %v1600_v45, 1 }
 0x74d   : >> { %1667 = vrot.lane.b32.xlu0 %v1600_v45, %s2492_s8  ;;  %v1608_v22 = vsel %vm4245_vm14, %v1604_v21, %v1601_v18  ;;  %v1605_v40 = vsel %vm4246_vm13, %v1603_v47, %v1604_v21  ;;  %v1628_v15 = vsel %vm4247_vm10, %v1624_v44, %v1621_v62  ;;  %v1625_v48 = vsel %vm4248_vm15, %v1623_v59, %v1624_v44 }
 0x74e   : >> { %v1609_v13 = vsel %vm4249_vm3, %v1608_v22, 4624  ;;  %v1612_v52 = vsel %vm4180_vm0, %v1605_v40, 4624  ;;  %v1631_v29 = vsel %vm4114_vm1, %v1625_v48, 4624  ;;  %vm4250_vm14 = vnez %v4014_v39 }
 0x74f   : >> { %vm1613_vm2 = vcmp.lt.s32.totalorder %v1594_v43, %v1609_v13  ;;  %v1629_v23 = vsel %vm4250_vm14, %v1627_v60, 4624  ;;  %vm1619_vm13 = vcmp.lt.s32.totalorder %v1600_v45, %v1612_v52  ;;  %vm1637_vm9 = vcmp.lt.s32.totalorder %v1618_v53, %v1631_v29 }
 0x750   : >> { %v1614_v56 = vsel %vm1613_vm2, %v1594_v43, %v1609_v13  ;;  %v1620_v28 = vsel %vm1619_vm13, %v1600_v45, %v1612_v52  ;;  %v1632_v63 = vsel %vm4101_vm6, %v1628_v15, 4624  ;;  %v1638_v32 = vsel %vm1637_vm9, %v1618_v53, %v1631_v29 }
 0x751   : >> { %vm1633_vm10 = vcmp.lt.s32.totalorder %v1614_v56, %v1629_v23  ;;  %vm1639_vm15 = vcmp.lt.s32.totalorder %v1620_v28, %v1632_v63  ;;  %vm4251_vm9 = vnez %v4043_v12  ;;  %vm4252_vm13 = vnez %v4049_v25 }
 0x752   : >> { %v1634_v18 = vsel %vm1633_vm10, %v1614_v56, %v1629_v23  ;;  %v1640_v62 = vsel %vm1639_vm15, %v1620_v28, %v1632_v63  ;;  %vm4253_vm10 = vnez %v4034_v49 }
 0x753   : >> { %1665 = vrot.lane.b32.xlu2 %v1598_v36, %s2492_s8 }
 0x79d   : >> { %v1642_v47 = vpop.permute.xlu2 %1641 }
 0x79e   : >> { %v1649_v60 = vsel %vm4237_vm11, %v1642_v47, 4624 }
 0x79f   : >> { %vm1653_vm0 = vcmp.lt.s32.totalorder %v1634_v18, %v1649_v60 }
 0x7a0   : >> { %v1654_v57 = vsel %vm1653_vm0, %v1634_v18, %v1649_v60 }
 0x7a5   : >> { %v1648_v59 = vpop.permute.xlu2 %1647 }
 0x7a6   : >> { %v1652_v54 = vsel %vm4253_vm10, %v1648_v59, 4624 }
 0x7a7   : >> { %vm1659_vm0 = vcmp.lt.s32.totalorder %v1640_v62, %v1652_v54 }
 0x7a8   : >> { %v1660_v40 = vsel %vm1659_vm0, %v1640_v62, %v1652_v54  ;;  %vm4258_vm0 = vnez %v4020_v20 }
 0x7ad   : >> { %v1666_v38 = vpop.permute.xlu2 %1665 }
 0x7ae   : >> { %v1671_v11 = vsel %vm4228_vm7, %v1666_v38, 4624 }
 0x7af   : >> { %v1644_v61 = vpop.permute.xlu0 %1643 }
 0x7b0   : >> { %v1650_v36 = vsel %vm4251_vm9, %v1644_v61, 4624 }
 0x7b5   : >> { %v1646_v43 = vpop.permute.xlu1 %1645 }
 0x7b6   : >> { %v1651_v31 = vsel %vm4222_vm8, %v1646_v43, 4624  ;;  %vm1655_vm8 = vcmp.lt.s32.totalorder %v1636_v42, %v1650_v36 }
 0x7b7   : >> { %vm1657_vm2 = vcmp.lt.s32.totalorder %v1638_v32, %v1651_v31  ;;  %v1662_v19 = vpop.permute.xlu0 %1661  ;;  %v1656_v21 = vsel %vm1655_vm8, %v1636_v42, %v1650_v36  ;;  %vm4255_vm8 = vcmp.lt.s32.totalorder %v2719_v9, 1 }
 0x7b8   : >> { %v1658_v35 = vsel %vm1657_vm2, %v1638_v32, %v1651_v31  ;;  %v1669_v50 = vsel %vm4252_vm13, %v1662_v19, 4624  ;;  %vm4254_vm2 = vnez %v4047_v24 }
 0x7b9   : >> { %vm1677_vm15 = vcmp.lt.s32.totalorder %v1658_v35, %v1671_v11  ;;  %vm1673_vm11 = vcmp.lt.s32.totalorder %v1654_v57, %v1669_v50 }
 0x7ba   : >> { %v1678_v46 = vsel %vm1677_vm15, %v1658_v35, %v1671_v11  ;;  %v1674_v53 = vsel %vm1673_vm11, %v1654_v57, %v1669_v50  ;;  %vm4257_vm15 = vmmov %vm4255_vm8 }
 0x7bb   : >> { %1725 = vrot.lane.b32.xlu0 %v1678_v46, %s2491_s22  ;;  %1721 = vrot.lane.b32.xlu1 %v1674_v53, %s2491_s22  ;;  %v1681_v13 = vrot.slane %v1674_v53, 7  ;;  %v1703_v52 = vrot.slane %v1678_v46, 1  ;;  %v1683_v56 = vrot.slane %v1678_v46, 7  ;;  %v1701_v42 = vrot.slane %v1674_v53, 1 }
 0x7bd   : >> { %v1664_v45 = vpop.permute.xlu1 %1663 }
 0x7be   : >> { %v1670_v44 = vsel %vm4254_vm2, %v1664_v45, 4624 }
 0x7bf   : >> { %vm1675_vm7 = vcmp.lt.s32.totalorder %v1656_v21, %v1670_v44  ;;  %v1668_v22 = vpop.permute.xlu0 %1667 }
 0x7c0   : >> { %v1676_v15 = vsel %vm1675_vm7, %v1656_v21, %v1670_v44  ;;  %v1672_v48 = vsel %vm4244_vm4, %v1668_v22, 4624  ;;  %vm4256_vm7 = vcmp.lt.s32.totalorder %v2719_v9, 7 }
 0x7c1   : >> { %vm1679_vm11 = vcmp.lt.s32.totalorder %v1660_v40, %v1672_v48  ;;  %1723 = vrot.lane.b32.xlu2 %v1676_v15, %s2491_s22  ;;  %v1682_v29 = vrot.slane %v1676_v15, 7  ;;  %v1702_v23 = vrot.slane %v1676_v15, 1 }
 0x7c2   : >> { %v1680_v28 = vsel %vm1679_vm11, %v1660_v40, %v1672_v48 }
 0x7c3   : >> { %1743 = vrot.lane.b32.xlu0 %v1676_v15, %s2492_s8  ;;  %1727 = vrot.lane.b32.xlu1 %v1680_v28, %s2491_s22  ;;  %v1687_v63 = vsel %vm4255_vm8, %v1681_v13, %v1682_v29  ;;  %v1706_v32 = vsel %vm4256_vm7, %v1702_v23, %v1703_v52  ;;  %v1686_v18 = vsel %vm4257_vm15, %v1682_v29, %v1683_v56  ;;  %v1704_v62 = vrot.slane %v1680_v28, 1  ;;  %vm4259_vm8 = vmmov %vm4256_vm7 }
 0x7c4   : >> { %v1690_v47 = vsel %vm4230_vm5, %v1687_v63, 4624  ;;  %v1710_v59 = vsel %vm4235_vm12, %v1706_v32, 4624  ;;  %v1691_v61 = vsel %vm4258_vm0, %v1686_v18, 4624  ;;  %v1684_v60 = vrot.slane %v1680_v28, 7 }
 0x7c5   : >> { %vm1695_vm11 = vcmp.lt.s32.totalorder %v1676_v15, %v1690_v47  ;;  %vm1697_vm4 = vcmp.lt.s32.totalorder %v1678_v46, %v1691_v61  ;;  %v1705_v38 = vsel %vm4259_vm8, %v1703_v52, %v1704_v62  ;;  %v1707_v43 = vsel %vm4256_vm7, %v1701_v42, %v1702_v23  ;;  %vm4260_vm8 = vmmov %vm4257_vm15 }
 0x7c6   : >> { %v1696_v31 = vsel %vm1695_vm11, %v1676_v15, %v1690_v47  ;;  %v1698_v19 = vsel %vm1697_vm4, %v1678_v46, %v1691_v61  ;;  %v1711_v57 = vsel %vm4114_vm1, %v1705_v38, 4624  ;;  %v1688_v11 = vsel %vm4257_vm15, %v1684_v60, %v1681_v13  ;;  %vm4262_vm11 = vmmov %vm4256_vm7 }
 0x7c7   : >> { %vm1715_vm12 = vcmp.lt.s32.totalorder %v1696_v31, %v1710_v59  ;;  %vm1717_vm5 = vcmp.lt.s32.totalorder %v1698_v19, %v1711_v57  ;;  %v1689_v36 = vsel %vm4249_vm3, %v1688_v11, 4624  ;;  %v1685_v54 = vsel %vm4260_vm8, %v1683_v56, %v1684_v60 }
 0x7c8   : >> { %v1716_v35 = vsel %vm1715_vm12, %v1696_v31, %v1710_v59  ;;  %v1718_v50 = vsel %vm1717_vm5, %v1698_v19, %v1711_v57  ;;  %vm1693_vm0 = vcmp.lt.s32.totalorder %v1674_v53, %v1689_v36  ;;  %v1709_v21 = vsel %vm4250_vm14, %v1707_v43, 4624 }
 0x7c9   : >> { %1741 = vrot.lane.b32.xlu2 %v1674_v53, %s2492_s8  ;;  %v1694_v45 = vsel %vm1693_vm0, %v1674_v53, %v1689_v36  ;;  %vm4261_vm4 = vnez %v4016_v51  ;;  %v1708_v22 = vsel %vm4262_vm11, %v1704_v62, %v1701_v42  ;;  %vm4263_vm12 = vnez %v4031_v37 }
 0x7ca   : >> { %v1692_v44 = vsel %vm4261_vm4, %v1685_v54, 4624  ;;  %vm1713_vm7 = vcmp.lt.s32.totalorder %v1694_v45, %v1709_v21  ;;  %v1712_v48 = vsel %vm4101_vm6, %v1708_v22, 4624 }
 0x7cb   : >> { %vm1699_vm15 = vcmp.lt.s32.totalorder %v1680_v28, %v1692_v44  ;;  %1745 = vrot.lane.b32.xlu1 %v1678_v46, %s2492_s8  ;;  %v1714_v40 = vsel %vm1713_vm7, %v1694_v45, %v1709_v21  ;;  %vm4264_vm7 = vnez %v4041_v17 }
 0x7cc   : >> { %v1700_v15 = vsel %vm1699_vm15, %v1680_v28, %v1692_v44 }
 0x7cd   : >> { %vm1719_vm5 = vcmp.lt.s32.totalorder %v1700_v15, %v1712_v48 }
 0x7ce   : >> { %v1720_v53 = vsel %vm1719_vm5, %v1700_v15, %v1712_v48 }
 0x7d1   : >> { %1747 = vrot.lane.b32.xlu2 %v1680_v28, %s2492_s8 }
 0x81b   : >> { %v1724_v13 = vpop.permute.xlu2 %1723 }
 0x81c   : >> { %v1730_v46 = vsel %vm4251_vm9, %v1724_v13, 4624 }
 0x81d   : >> { %vm1735_vm11 = vcmp.lt.s32.totalorder %v1716_v35, %v1730_v46 }
 0x81e   : >> { %v1736_v47 = vsel %vm1735_vm11, %v1716_v35, %v1730_v46 }
 0x823   : >> { %v1742_v52 = vpop.permute.xlu2 %1741 }
 0x824   : >> { %v1749_v42 = vsel %vm4252_vm13, %v1742_v52, 4624 }
 0x82b   : >> { %v1748_v28 = vpop.permute.xlu2 %1747 }
 0x82d   : >> { %v1726_v29 = vpop.permute.xlu0 %1725  ;;  %v1722_v23 = vpop.permute.xlu1 %1721 }
 0x82e   : >> { %v1729_v56 = vsel %vm4263_vm12, %v1722_v23, 4624  ;;  %v1731_v60 = vsel %vm4264_vm7, %v1726_v29, 4624  ;;  %vm4271_vm7 = vnez %v4038_v26 }
 0x82f   : >> { %vm1733_vm0 = vcmp.lt.s32.totalorder %v1714_v40, %v1729_v56  ;;  %vm1737_vm11 = vcmp.lt.s32.totalorder %v1718_v50, %v1731_v60 }
 0x830   : >> { %v1734_v63 = vsel %vm1733_vm0, %v1714_v40, %v1729_v56  ;;  %vm4265_vm0 = vnez %v4052_v30 }
 0x831   : >> { %vm1753_vm8 = vcmp.lt.s32.totalorder %v1734_v63, %v1749_v42  ;;  %v1752_v38 = vsel %vm4265_vm0, %v1748_v28, 4624  ;;  %vm4267_vm0 = vcmp.lt.s32.totalorder %v2719_v9, 1 }
 0x832   : >> { %v1754_v32 = vsel %vm1753_vm8, %v1734_v63, %v1749_v42 }
 0x833   : >> { %1801 = vrot.lane.b32.xlu0 %v1754_v32, %s2491_s22  ;;  %v1761_v19 = vrot.slane %v1754_v32, 7  ;;  %v1781_v36 = vrot.slane %v1754_v32, 1 }
 0x835   : >> { %v1744_v18 = vpop.permute.xlu0 %1743  ;;  %v1728_v62 = vpop.permute.xlu1 %1727 }
 0x836   : >> { %v1750_v59 = vsel %vm4254_vm2, %v1744_v18, 4624  ;;  %v1732_v61 = vsel %vm4253_vm10, %v1728_v62, 4624  ;;  %vm4266_vm10 = vcmp.lt.s32.totalorder %v2719_v9, 7 }
 0x837   : >> { %vm1755_vm15 = vcmp.lt.s32.totalorder %v1736_v47, %v1750_v59  ;;  %vm1739_vm5 = vcmp.lt.s32.totalorder %v1720_v53, %v1732_v61 }
 0x838   : >> { %v1756_v43 = vsel %vm1755_vm15, %v1736_v47, %v1750_v59  ;;  %v1740_v31 = vsel %vm1739_vm5, %v1720_v53, %v1732_v61  ;;  %vm4268_vm15 = vnez %v4025_v16  ;;  %vm4269_vm5 = vmmov %vm4267_vm0  ;;  %v1738_v53 = vsel %vm1737_vm11, %v1718_v50, %v1731_v60 }
 0x839   : >> { %vm1759_vm8 = vcmp.lt.s32.totalorder %v1740_v31, %v1752_v38  ;;  %1803 = vrot.lane.b32.xlu1 %v1756_v43, %s2491_s22  ;;  %v1762_v57 = vrot.slane %v1756_v43, 7  ;;  %v1782_v11 = vrot.slane %v1756_v43, 1 }
 0x83a   : >> { %v1760_v35 = vsel %vm1759_vm8, %v1740_v31, %v1752_v38  ;;  %vm4270_vm8 = vmmov %vm4266_vm10 }
 0x83b   : >> { %1807 = vrot.lane.b32.xlu0 %v1760_v35, %s2491_s22  ;;  %v1784_v54 = vrot.slane %v1760_v35, 1  ;;  %v1764_v45 = vrot.slane %v1760_v35, 7  ;;  %v1787_v21 = vsel %vm4266_vm10, %v1781_v36, %v1782_v11  ;;  %v1767_v44 = vsel %vm4267_vm0, %v1761_v19, %v1762_v57 }
 0x83c   : >> { %v1770_v22 = vsel %vm4268_vm15, %v1767_v44, 4624  ;;  %v1789_v46 = vsel %vm4250_vm14, %v1787_v21, 4624  ;;  %vm4272_vm15 = vmmov %vm4269_vm5 }
 0x83d   : >> { %v1746_v40 = vpop.permute.xlu1 %1745  ;;  %v1768_v15 = vsel %vm4269_vm5, %v1764_v45, %v1761_v19  ;;  %vm1775_vm13 = vcmp.lt.s32.totalorder %v1756_v43, %v1770_v22  ;;  %v1788_v48 = vsel %vm4270_vm8, %v1784_v54, %v1781_v36  ;;  %vm4274_vm5 = vmmov %vm4270_vm8 }
 0x83e   : >> { %v1751_v13 = vsel %vm4271_vm7, %v1746_v40, 4624  ;;  %v1769_v52 = vsel %vm4249_vm3, %v1768_v15, 4624  ;;  %v1776_v29 = vsel %vm1775_vm13, %v1756_v43, %v1770_v22  ;;  %vm4273_vm13 = vmmov %vm4270_vm8  ;;  %v1792_v60 = vsel %vm4101_vm6, %v1788_v48, 4624 }
 0x83f   : >> { %vm1757_vm10 = vcmp.lt.s32.totalorder %v1738_v53, %v1751_v13  ;;  %vm1773_vm0 = vcmp.lt.s32.totalorder %v1754_v32, %v1769_v52  ;;  %vm4275_vm8 = vmmov %vm4272_vm15 }
 0x840   : >> { %v1758_v23 = vsel %vm1757_vm10, %v1738_v53, %v1751_v13  ;;  %v1774_v56 = vsel %vm1773_vm0, %v1754_v32, %v1769_v52  ;;  %vm4276_vm10 = vnez %v4020_v20  ;;  %vm4277_vm0 = vnez %v4028_v33 }
 0x841   : >> { %1805 = vrot.lane.b32.xlu2 %v1758_v23, %s2491_s22  ;;  %1821 = vrot.lane.b32.xlu1 %v1754_v32, %s2492_s8  ;;  %v1763_v42 = vrot.slane %v1758_v23, 7  ;;  %v1783_v50 = vrot.slane %v1758_v23, 1  ;;  %vm1793_vm11 = vcmp.lt.s32.totalorder %v1774_v56, %v1789_v46 }
 0x842   : >> { %v1794_v63 = vsel %vm1793_vm11, %v1774_v56, %v1789_v46 }
 0x843   : >> { %1825 = vrot.lane.b32.xlu0 %v1758_v23, %s2492_s8  ;;  %v1766_v28 = vsel %vm4272_vm15, %v1762_v57, %v1763_v42  ;;  %v1785_v18 = vsel %vm4273_vm13, %v1783_v50, %v1784_v54  ;;  %v1786_v62 = vsel %vm4274_vm5, %v1782_v11, %v1783_v50  ;;  %v1765_v47 = vsel %vm4275_vm8, %v1763_v42, %v1764_v45 }
 0x844   : >> { %v1771_v32 = vsel %vm4276_vm10, %v1766_v28, 4624  ;;  %v1790_v59 = vsel %vm4277_vm0, %v1786_v62, 4624  ;;  %v1772_v61 = vsel %vm4261_vm4, %v1765_v47, 4624  ;;  %v1791_v31 = vsel %vm4114_vm1, %v1785_v18, 4624 }
 0x845   : >> { %vm1777_vm11 = vcmp.lt.s32.totalorder %v1758_v23, %v1771_v32  ;;  %vm1795_vm15 = vcmp.lt.s32.totalorder %v1776_v29, %v1790_v59  ;;  %vm1779_vm3 = vcmp.lt.s32.totalorder %v1760_v35, %v1772_v61  ;;  %vm4278_vm0 = vnez %v4041_v17 }
 0x846   : >> { %v1778_v38 = vsel %vm1777_vm11, %v1758_v23, %v1771_v32  ;;  %v1796_v19 = vsel %vm1795_vm15, %v1776_v29, %v1790_v59  ;;  %v1780_v57 = vsel %vm1779_vm3, %v1760_v35, %v1772_v61 }
 0x847   : >> { %vm1797_vm13 = vcmp.lt.s32.totalorder %v1778_v38, %v1791_v31  ;;  %vm1799_vm5 = vcmp.lt.s32.totalorder %v1780_v57, %v1792_v60 }
 0x848   : >> { %v1798_v11 = vsel %vm1797_vm13, %v1778_v38, %v1791_v31  ;;  %v1800_v36 = vsel %vm1799_vm5, %v1780_v57, %v1792_v60  ;;  %vm4280_vm13 = vnez %v4034_v49 }
 0x849   : >> { %1823 = vrot.lane.b32.xlu2 %v1756_v43, %s2492_s8  ;;  %1827 = vrot.lane.b32.xlu1 %v1760_v35, %s2492_s8 }
 0x89b   : >> { %v1806_v54 = vpop.permute.xlu2 %1805 }
 0x89c   : >> { %v1811_v43 = vsel %vm4278_vm0, %v1806_v54, 4624 }
 0x89d   : >> { %vm1817_vm11 = vcmp.lt.s32.totalorder %v1798_v11, %v1811_v43 }
 0x89e   : >> { %v1818_v18 = vsel %vm1817_vm11, %v1798_v11, %v1811_v43 }
 0x8a3   : >> { %v1824_v22 = vpop.permute.xlu2 %1823 }
 0x8a4   : >> { %v1830_v53 = vsel %vm4254_vm2, %v1824_v22, 4624 }
 0x8a5   : >> { %v1802_v45 = vpop.permute.xlu0 %1801 }
 0x8a6   : >> { %v1809_v15 = vsel %vm4263_vm12, %v1802_v45, 4624 }
 0x8a7   : >> { %vm1813_vm3 = vcmp.lt.s32.totalorder %v1794_v63, %v1809_v15 }
 0x8a8   : >> { %v1814_v52 = vsel %vm1813_vm3, %v1794_v63, %v1809_v15  ;;  %vm4281_vm3 = vnez %v4052_v30 }
 0x8ab   : >> { %v1804_v21 = vpop.permute.xlu1 %1803 }
 0x8ac   : >> { %v1810_v44 = vsel %vm4251_vm9, %v1804_v21, 4624  ;;  %vm4279_vm9 = vnez %v4049_v25 }
 0x8ad   : >> { %vm1815_vm8 = vcmp.lt.s32.totalorder %v1796_v19, %v1810_v44  ;;  %v1808_v40 = vpop.permute.xlu0 %1807 }
 0x8ae   : >> { %v1816_v48 = vsel %vm1815_vm8, %v1796_v19, %v1810_v44  ;;  %v1812_v56 = vsel %vm4280_vm13, %v1808_v40, 4624 }
 0x8af   : >> { %vm1835_vm10 = vcmp.lt.s32.totalorder %v1816_v48, %v1830_v53  ;;  %vm1819_vm2 = vcmp.lt.s32.totalorder %v1800_v36, %v1812_v56 }
 0x8b0   : >> { %v3867_v13 = vsel %vm1835_vm10, %v1816_v48, %v1830_v53   ;;  %v1820_v32 = vsel %vm1819_vm2, %v1800_v36, %v1812_v56 }
 0x8b1   : >> { %v1842_v50 = vsub.s32 %v3867_v13, %v2476_v14 }
 0x8b3   : >> { %v1822_v35 = vpop.permute.xlu1 %1821 }
 0x8b4   : >> { %v1829_v29 = vsel %vm4279_vm9, %v1822_v35, 4624 }
 0x8b5   : >> { %vm1833_vm15 = vcmp.lt.s32.totalorder %v1814_v52, %v1829_v29  ;;  %v1826_v23 = vpop.permute.xlu0 %1825 }
 0x8b6   : >> { %v1834_v46 = vsel %vm1833_vm15, %v1814_v52, %v1829_v29   ;;  %v1831_v42 = vsel %vm4271_vm7, %v1826_v23, 4624 }
 0x8b7   : >> { %v1841_v28 = vsub.s32 %v1834_v46, %v2480_v27  ;;  %vm1837_vm8 = vcmp.lt.s32.totalorder %v1818_v18, %v1831_v42 }
 0x8b8   : >> { %v1838_v47 = vsel %vm1837_vm8, %v1818_v18, %v1831_v42  }
 0x8b9   : >> { %vm1845_vm5 = vcmp.lt.s32.totalorder %v1841_v28, %v1842_v50  ;;  %v1843_v60 = vsub.s32 %v1838_v47, %v2472_v58 }
 0x8ba   : >> { %v1846_v63 = vsel %vm1845_vm5, %v1841_v28, %v1842_v50 }
 0x8bb   : >> { %v1828_v62 = vpop.permute.xlu1 %1827 }
 0x8bc   : >> { %v1832_v59 = vsel %vm4281_vm3, %v1828_v62, 4624 }
 0x8bd   : >> { %vm1839_vm10 = vcmp.lt.s32.totalorder %v1820_v32, %v1832_v59 }
 0x8be   : >> { %v1840_v61 = vsel %vm1839_vm10, %v1820_v32, %v1832_v59  }
 0x8bf   : >> { %v1844_v38 = vsub.s32 %v1840_v61, %v2468_v41 }
 0x8c1   : >> { %vm1847_vm0 = vcmp.lt.s32.totalorder %v1843_v60, %v1844_v38 }
 0x8c2   : >> { %v1848_v14 = vsel %vm1847_vm0, %v1843_v60, %v1844_v38 }
 0x8c3   : >> { %vm1849_vm9 = vcmp.lt.s32.totalorder %v1846_v63, %v1848_v14 }
 0x8c4   : >> { %v1850_v27 = vsel %vm1849_vm9, %v1846_v63, %v1848_v14  ;;  %v4284_v14 = vmov %v3867_v13 }
 0x8c5   : >> { %v1852_v31 = vshra.s32 %v1850_v27, 16  ;;  %v1851_v57 = vand.u32 65535, %v1850_v27  ;;  %v4285_v27 = vmov %v1834_v46 }
 0x8c7   : >> { %v1854_v19 = vcvt.s32.f32 %v1852_v31  ;;  %v1853_v54 = vcvt.s32.f32 %v1851_v57 }
 0x8c9   : >> { %1855 = vmin.xlane.f32.xlu2 %v1854_v19 }
 0x93c   : >> { %v1856_v11 = vpop.xlane.xlu2 %1855 }
 0x93d   : >> { %vm1857_vm11 = vcmp.eq.f32.partialorder %v1854_v19, %v1856_v11  ;;  %v1862_v45 = vcvt.f32.s32 %v1856_v11 }
 0x93e   : >> { %v1858_v36 = vsel %vm1857_vm11, %v1853_v54, inf }
 0x93f   : >> { %1859 = vmin.xlane.f32.xlu0 %v1858_v36  ;;  %v1863_v44 = vshll.u32 %v1862_v45, 16 }
 0x9b2   : >> { %v1860_v21 = vpop.xlane.xlu0 %1859 }
 0x9b3   : >> { %v1861_v22 = vcvt.f32.s32 %v1860_v21 }
 0x9b5   : >> { %v1864_v58 = vadd.s32 %v1863_v44, %v1861_v22 }
 0x9b7   : >> { %v1865_v40 = vrot.slane %v1864_v58, 4 }
 0x9b9   : >> { %vm1866_vm15 = vcmp.lt.s32.totalorder %v1864_v58, %v1865_v40 }
 0x9ba   : >> { %v1867_v41 = vsel %vm1866_vm15, %v1864_v58, %v1865_v40  ;;  %v4283_v58 = vmov %v1838_v47 }
 0x9bb   : >> { %v1868_v15 = vrot.slane %v1867_v41, 2 }
 0x9bd   : >> { %vm1869_vm13 = vcmp.lt.s32.totalorder %v1867_v41, %v1868_v15 }
 0x9be   : >> { %v1870_v48 = vsel %vm1869_vm13, %v1867_v41, %v1868_v15  ;;  %v4282_v41 = vmov %v1840_v61 }
 0x9bf   : >> { %v1871_v53 = vrot.slane %v1870_v48, 1 }
 0x9c1   : >> { %vm1872_vm2 = vcmp.lt.s32.totalorder %v1870_v48, %v1871_v53 }
 0x9c2   : >> { %v1873_v43 = vsel %vm1872_vm2, %v1870_v48, %v1871_v53 }
 0x9c3   : >> { %2123 = vpush %v1873_v43 }
 0x9f4   : >> { %s2124_s12 = spop %2123 }
 0x9f5   : >> { %p2107_p4 = scmp.ge.s32.totalorder %s2124_s12, 0 }
 0x9f6   : > { %vm1877_vm5 = vcmp.eq.s32.totalorder (%p2107_p4), %v1838_v47, %v2675_v0  ;;  %vm1878_vm8 = vcmp.eq.s32.totalorder (%p2107_p4), %v1840_v61, %v2682_v2  ;;  %vm4286_vm3 = vcmp.gt.f32.partialorder (%p2107_p4), %v2696_v5, 0.0  ;;  %vm1875_vm0 = vcmp.eq.s32.totalorder (%p2107_p4), %v1834_v46, %v2677_v1  ;;  %v2122_v0 = vld [vmem:[#allocation7] sm:$0xff] (%p2107_p4)  ;;  %v1914_v1 = vld [vmem:[#allocation9] sm:$0xff] (%p2107_p4) }
 0x9f7   : > { %560 = sbr.rel (!%p2107_p4) target bundleno = 232 (0xe8), region = 112  ;;  %vm1881_vm10 = vmand (%p2107_p4), %vm4286_vm3, %vm1877_vm5  ;;  %vm4287_vm9 = vcmp.gt.f32.partialorder (%p2107_p4), %v2702_v7, 0.0  ;;  %vm1876_vm15 = vcmp.eq.s32.totalorder (%p2107_p4), %v3867_v13, %v2684_v3  ;;  %v2493_v35 = vmov (%p2107_p4), 1.0|1.0   ;;  %vm4288_vm2 = vcmp.gt.f32.partialorder (%p2107_p4), %v2690_v4, 0.0  ;;  %v1915_v3 = vld [vmem:[#allocation9 + $0x8] sm:$0xff] (%p2107_p4) }
 0x9f8   : > { %vm1882_vm11 = vmand (%p2107_p4), %vm4287_vm9, %vm1878_vm8  ;;  %vm4289_vm1 = vcmp.gt.f32.partialorder (%p2107_p4), %v2699_v6, 0.0  ;;  %vm1896_vm12 = vcmask (%p2107_p4), 261120   ;;  %v1924_v39 = vld [vmem:[%s2661_s10] sm:$0xff] (%p2107_p4)  ;;  %v1927_v51 = vand.u32 (%p2107_p4), 127, %v355_v8  ;;  %v2494_v16 = vmov (%p2107_p4), 0.0   ;;  %v1925_v17 = vld [vmem:[%s2661_s10 + $0x8] sm:$0xff] (%p2107_p4) }
 0x9f9   : > { %vm2112_vm13 = vmpackc.low (%p2107_p4), %vm1882_vm11, %vm1881_vm10  ;;  %vm1928_vm5 = vcmp.gt.f32.partialorder (%p2107_p4), %v1924_v39, 0.0 }
 0x9fa   : > { %2113 = vmatpush.bf16.msk.msra.mxu0 (%p2107_p4), %vm2112_vm13, %v2493_v35  ;;  %vm1879_vm6 = vmand (%p2107_p4), %vm4288_vm2, %vm1875_vm0  ;;  %vm1929_vm0 = vcmp.gt.f32.partialorder (%p2107_p4), %v1925_v17, 0.0 }
 0x9fb   : > { %vm1880_vm14 = vmand (%p2107_p4), %vm4289_vm1, %vm1876_vm15  ;;  %vm1950_vm15 = vcmask (%p2107_p4), 7168  }
 0x9fc   : > { %vm2114_vm4 = vmpackc.low %vm1880_vm14, %vm1879_vm6 }
 0x9fe   : > { %2115 = vmatpush.bf16.msk.msra.mxu0 %vm2114_vm4, %v2493_v35 }
 0xa01   : > { %2116 = vmatmul.msk.bf16.vlgmr.msra.gmra.mxu0 %vm1896_vm12, %v2122_v0 }
 0xa7e   : > { %v1909_v2 = vpop.f32.mrf.mxu0 }
 0xa7f   : > { %v1916_v5 = vmul.f32 %v1914_v1, %v1909_v2 }
 0xa81   : > { %1918 = vadd.xlane.f32.xlu0 %v1916_v5 }
 0xa86   : > { %v1911_v7 = vpop.f32.mrf.mxu0 }
 0xa87   : > { %v1917_v9 = vmul.f32 %v1915_v3, %v1911_v7 }
 0xa89   : > { %1920 = vadd.xlane.f32.xlu0 %v1917_v9 }
 0xaf4   : > { %v1919_v34 = vpop.xlane.xlu0 %1918 }
 0xaf5   : > { %vm2125_vm7 = vcmp.lt.s32.totalorder %v1919_v34, 0  ;;  %v2126_v4 = vceil.f32 %v1919_v34  ;;  %v2127_v6 = vfloor.f32 %v1919_v34 }
 0xaf7   : > { %v2128_v55 = vsel %vm2125_vm7, %v2126_v4, %v2127_v6 }
 0xaf8   : > { %v2129_v20 = vcvt.f32.s32 %v2128_v55 }
 0xafa   : > { %vm1930_vm8 = vcmp.lt.s32.totalorder %v1927_v51, %v2129_v20  ;;  %vm1946_vm13 = vcmp.gt.s32.totalorder %v2129_v20, 0 }
 0xafb   : > { %vm1932_vm3 = vmand %vm1928_vm5, %vm1930_vm8 }
 0xafc   : > { %v1921_v10 = vpop.xlane.xlu0 %1920  ;;  %v1934_v33 = vsel %vm1932_vm3, 1.0, %v2494_v16 }
 0xafd   : > { %vm2130_vm10 = vcmp.lt.s32.totalorder %v1921_v10, 0  ;;  %v2131_v37 = vceil.f32 %v1921_v10  ;;  %v2132_v49 = vfloor.f32 %v1921_v10  ;;  %v1936_v26 = vsub.f32 %v1924_v39, %v1934_v33 }
 0xaff   : > { %v2133_v12 = vsel %vm2130_vm10, %v2131_v37, %v2132_v49  ;;  %v1938_v24 = vand.u32 2147483647, %v1936_v26 }
 0xb00   : > { %v2134_v25 = vcvt.f32.s32 %v2133_v12 }
 0xb01   : > { %v1940_v30 = vsel %vm1928_vm5, %v1938_v24, 0.0 }
 0xb02   : > { %1942 = vadd.xlane.f32.xlu1 %v1940_v30  ;;  %vm1931_vm9 = vcmp.lt.s32.totalorder %v1927_v51, %v2134_v25  ;;  %vm1947_vm2 = vcmp.gt.s32.totalorder %v2134_v25, 0 }
 0xb03   : > { %vm1933_vm11 = vmand %vm1929_vm0, %vm1931_vm9 }
 0xb04   : > { %v1935_v8 = vsel %vm1933_vm11, 1.0, %v2494_v16 }
 0xb05   : > { %v1937_v13 = vsub.f32 %v1925_v17, %v1935_v8 }
 0xb07   : > { %v1939_v52 = vand.u32 2147483647, %v1937_v13 }
 0xb09   : > { %v1941_v29 = vsel %vm1929_vm0, %v1939_v52, 0.0 }
 0xb0a   : > { %1944 = vadd.xlane.f32.xlu1 %v1941_v29 }
 0xb75   : > { %v1943_v23 = vpop.xlane.xlu1 %1942 }
 0xb76   : > { %v1948_v56 = vsel %vm1946_vm13, %v1943_v23, 0.0 }
 0xb77   : > { %1951 = vst.msk [vmem:[%s2712_s28] sm:$0xff] %vm1950_vm15, %v1948_v56 }
 0xb7d   : > { %v1945_v46 = vpop.xlane.xlu1 %1944 }
 0xb7e   : > { %v1949_v42 = vsel %vm1947_vm2, %v1945_v46, 0.0 }
 0xb7f   : > { %1952 = vst.msk [vmem:[%s2712_s28 + $0x8] sm:$0xff] %vm1950_vm15, %v1949_v42 }
 0xb80 PF: > { %p19_p5 = scmp.ge.s32.totalorder %s2590_s25, 4   ;;  %s4290_s18 = smov %s2456_s19 }
 0xb81   : > { %s4291_s19 = smov %s2460_s20  ;;  %s4292_s20 = smov %s2600_s29 }
 0xb82   : > { %s4293_s21 = smov %s2590_s25  ;;  %21 = sbr.rel (!%p19_p5) target bundleno = 8 (0x8), region = 123 }
 0xb87   :  { %1974 = vsyncpa [#allocation3], 1 }
 0xb88   :  { %1976 = vsyncpa [#allocation3 + $0x1], 1 }
 0xb89   :  { %1977 = vsyncpa [#allocation5], 1 }
 0xb8a   :  { %1979 = vsyncpa [#allocation5 + $0x1], 1 }
 0xb8b   :  { %1980 = vsyncpa [#allocation8], 1 }

</bundles_post_ra>
